<compile_context>
chip_gen: v7x
topology: tpu7x:2x2x1
jax: 0.10.0
libtpu: 0.0.40
codegen_flags: <defaults>
</compile_context>

<pallas_src>
import math
from functools import partial

import jax
import jax.numpy as jnp
from jax import lax
from jax.experimental import pallas as pl
from jax.experimental.pallas import tpu as pltpu


def _sq_dist(x):
    """Pairwise squared distances via one NT matmul (no explicit transposes).

    x: (N, d) pre-scaled features.  d2[p, q] = |x_p|^2 + |x_q|^2 - 2 x_p . x_q,
    built as A @ B^T with A = [n2, 1, -2x], B = [1, n2, x].
    """
    n2 = jnp.sum(x * x, axis=-1, keepdims=True)          # (N, 1)
    ones = jnp.ones_like(n2)
    a = jnp.concatenate([n2, ones, -2.0 * x], axis=-1)   # (N, d+2)
    b = jnp.concatenate([ones, n2, x], axis=-1)          # (N, d+2)
    return lax.dot_general(a, b, (((1,), (1,)), ((), ())),
                           preferred_element_type=jnp.float32)


def _crf_kernel(unary_ref, ucb_ref, posg_ref, fbil_ref, wsf_ref, wbf_ref,
                out_ref, kcat_ref, *, nb_iterations, nb_classes, n_pad,
                exp_in_bf16):
    C = nb_classes
    N = n_pad  # multiple of 128 (lane-aligned split/contraction)

    # ---- one-time setup: dense Gaussian kernels (what the permutohedral
    # lattice approximates), stored side-by-side on lanes in one bf16 scratch.
    # Sequenced store-then-next-d2 so only one f32 (N, N) temp is live at a
    # time (peak-VMEM reduction); exp runs on the EUP slot.
    def store_gauss(col0, feats):
        d2 = jnp.maximum(_sq_dist(feats), 0.0)            # (N, N) f32
        if exp_in_bf16:
            # v6e/v7x: bf16 EUP -> halve transcendental cost + drop f32 temp.
            kcat_ref[:, col0:col0 + N] = jnp.exp((-d2).astype(kcat_ref.dtype))
        else:
            kcat_ref[:, col0:col0 + N] = jnp.exp(-d2).astype(kcat_ref.dtype)

    store_gauss(0, posg_ref[...])      # spatial kernel   -> lanes [0, N)
    store_gauss(N, fbil_ref[...])      # bilateral kernel -> lanes [N, 2N)

    unaries = unary_ref[...]           # (C, N) original unaries (initial q)
    u_minus_cb = ucb_ref[...]          # (C, N) unaries - folded constant bias

    # Folded 1x1-conv weights (CxC) as SMEM scalars, read once.
    wsf = tuple(tuple(wsf_ref[c, k] for k in range(C)) for c in range(C))
    wbf = tuple(tuple(wbf_ref[c, k] for k in range(C)) for c in range(C))

    def softmax_cn(q, exact=False):
        # Softmax over classes (axis 0) with explicit row ops: no XLU reduces.
        m = q[0:1, :]
        for c in range(1, C):
            m = jnp.maximum(m, q[c:c + 1, :])
        e = jnp.exp(q - m)                                 # (C, N), EUP
        denom = e[0:1, :]
        for c in range(1, C):
            denom = denom + e[c:c + 1, :]
        if exact:
            return e / denom                               # exact divide
        return e * pl.reciprocal(denom, approx=True)       # EUP reciprocal

    def body(_, q):
        sm = softmax_cn(q)                                 # Softmax2d, (C, N)
        # One lane-dense matmul against [K_sp | K_bi]: (C, N)@(N, 2N) -> (C, 2N)
        msg = jnp.dot(sm.astype(kcat_ref.dtype), kcat_ref[...],
                      preferred_element_type=jnp.float32)
        sp = msg[:, 0:N]                                   # spatial messages
        bi = msg[:, N:2 * N]                               # bilateral messages
        # pairwise[c] = sum_k wsf[c][k]*sp[k] + wbf[c][k]*bi[k]  (pure VPU).
        rows = []
        for c in range(C):
            acc = wsf[c][0] * sp[0:1, :] + wbf[c][0] * bi[0:1, :]
            for k in range(1, C):
                acc = acc + wsf[c][k] * sp[k:k + 1, :] + wbf[c][k] * bi[k:k + 1, :]
            rows.append(acc)
        pairwise = jnp.concatenate(rows, axis=0)           # (C, N)
        return u_minus_cb - pairwise                       # unaries - pairwise

    q = lax.fori_loop(0, nb_iterations, body, unaries, unroll=True)

    sm = softmax_cn(q, exact=True)                         # exact final softmax
    sm = jnp.where(jnp.isnan(sm), 0.0, sm)                 # softmax_out[isnan]=0
    out_ref[...] = jnp.where(sm > 0.5, sm, 0.0)            # nn.Threshold(0.5, 0)


def generate_unaries_jax(image, anno):
    """Vectorized generate_unaries (Pixel_pos=None path); -log(exp(-x)) == x."""
    GT_PROB = 0.5
    M = 3
    n_energy = -math.log((1.0 - GT_PROB) / (M - 1))
    p_energy = -math.log(GT_PROB)
    label = (10.0, 120.0)
    d0 = (image - label[0]) ** 2 / (100.0 ** 2)
    d1 = (image - label[1]) ** 2 / (100.0 ** 2)
    u0 = jnp.where(anno == 0, p_energy + d0,
                   jnp.where(anno == 1, n_energy + d0, 0.0))
    u1 = jnp.where(anno == 0, n_energy + d1,
                   jnp.where(anno == 1, p_energy + d1, 0.0))
    return jnp.stack([u0, u1], axis=0).astype(jnp.float32)   # (2, H, W)


def crf_as_rnn_forward(image, output, anno,
                       ws, bs, wb, bb, wc, bc,
                       nb_iterations=5,
                       theta_alpha=8.0, theta_beta=0.5, theta_gamma=3.0):
    H, W = image.shape
    N = H * W
    C = ws.shape[0]
    F = output.shape[1]

    # Pad pixel count to a lane-tile multiple (item 1 of the review).
    Np = ((N + 127) // 128) * 128
    pad = Np - N
    PAD_OFFSET = 3.0e3   # padded scaled-feature value -> exp(-d2) underflows to 0

    # Unaries in class-major (C, N) layout.
    unaries_cn = generate_unaries_jax(image, anno).reshape(C, N)          # (C, N)

    # torch forward: `image = output` -> features for the bilateral filter.
    feat = output.reshape(F, N).T.astype(jnp.float32)                     # (N, F)

    yy, xx = jnp.meshgrid(jnp.arange(H, dtype=jnp.float32),
                          jnp.arange(W, dtype=jnp.float32), indexing="ij")
    pos = jnp.stack([yy.reshape(-1), xx.reshape(-1)], axis=-1)            # (N, 2)

    # Pre-scale features so the Gaussian kernels are exp(-sq_dist) directly.
    inv_a = 1.0 / (math.sqrt(2.0) * float(theta_alpha))
    inv_b = 1.0 / (math.sqrt(2.0) * float(theta_beta))
    inv_g = 1.0 / (math.sqrt(2.0) * float(theta_gamma))
    pos_g = pos * inv_g                                                   # (N, 2)
    f_bilat = jnp.concatenate([pos * inv_a, feat * inv_b], axis=-1)       # (N, 2+F)

    if pad:
        unaries_cn = jnp.pad(unaries_cn, ((0, 0), (0, pad)))
        pos_g = jnp.pad(pos_g, ((0, pad), (0, 0)), constant_values=PAD_OFFSET)
        f_bilat = jnp.pad(f_bilat, ((0, pad), (0, 0)), constant_values=PAD_OFFSET)

    # Fold the three 1x1 convs:
    #   pairwise = (Wc@Ws) @ Sp + (Wc@Wb) @ Bi + (Wc@(bs+bb) + bc)
    ws_f = (wc @ ws).astype(jnp.float32)                                  # (C, C)
    wb_f = (wc @ wb).astype(jnp.float32)                                  # (C, C)
    cb = (wc @ (bs + bb).reshape(C) + bc.reshape(C)).astype(jnp.float32)  # (C,)
    u_minus_cb = unaries_cn - cb[:, None]                                 # (C, Np)

    # bf16 exponentials only where the EUP supports bf16 (v6e / v7x).
    kind = jax.devices()[0].device_kind.lower()
    exp_in_bf16 = ("v6" in kind) or ("v7" in kind)

    kernel = partial(_crf_kernel,
                     nb_iterations=int(nb_iterations),
                     nb_classes=int(C),
                     n_pad=int(Np),
                     exp_in_bf16=bool(exp_in_bf16))

    # Generation-aware VMEM budget (item 6): stacked bf16 kernel (4*Np^2 B) +
    # one live f32 d2/exp temp (4*Np^2 B, thanks to sequenced setup) + I/O.
    try:
        vmem_cap = int(pltpu.get_tpu_info().vmem_capacity_bytes)
    except Exception:                                      # pragma: no cover
        vmem_cap = 64 * 1024 * 1024
    headroom = 12 * 1024 * 1024
    need = 8 * Np * Np + 16 * Np * (C + F + 4) + (4 << 20)
    vmem_limit = int(min(max(vmem_cap - headroom, 16 << 20),
                         max(32 << 20, need)))

    out_cn = pl.pallas_call(
        kernel,
        out_shape=jax.ShapeDtypeStruct((C, Np), jnp.float32),
        in_specs=[
            pl.BlockSpec(memory_space=pltpu.MemorySpace.VMEM),   # unaries (C, Np)
            pl.BlockSpec(memory_space=pltpu.MemorySpace.VMEM),   # unaries - cb (C, Np)
            pl.BlockSpec(memory_space=pltpu.MemorySpace.VMEM),   # scaled pos (Np, 2)
            pl.BlockSpec(memory_space=pltpu.MemorySpace.VMEM),   # bilateral feats (Np, 2+F)
            pl.BlockSpec(memory_space=pltpu.MemorySpace.SMEM),   # Wc@Ws (C, C)
            pl.BlockSpec(memory_space=pltpu.MemorySpace.SMEM),   # Wc@Wb (C, C)
        ],
        out_specs=pl.BlockSpec(memory_space=pltpu.MemorySpace.VMEM),
        scratch_shapes=[pltpu.VMEM((Np, 2 * Np), jnp.bfloat16)],  # [K_sp | K_bi]
        compiler_params=pltpu.CompilerParams(vmem_limit_bytes=vmem_limit),
    )(unaries_cn, u_minus_cb, pos_g, f_bilat, ws_f, wb_f)

    # (C, Np) -> drop padding -> (1, C, H, W): matches the PyTorch NCHW output.
    return out_cn[:, :N].reshape(1, C, H, W)


if __name__ == "__main__":
    key = jax.random.PRNGKey(0)
    H = W = 16
    nb_classes = 2

    k1, k2, k3, k4 = jax.random.split(key, 4)
    image = jax.random.uniform(k1, (H, W), minval=0.0, maxval=255.0,
                               dtype=jnp.float32)                       # grayscale image
    anno = jax.random.randint(k2, (H, W), 0, 2)                         # labels {0, 1}
    output = jax.random.normal(k3, (1, nb_classes, H, W),
                               dtype=jnp.float32)                       # network output

    # Deterministic 1x1-conv params (PyTorch-style U(-1/sqrt(fan_in), 1/sqrt(fan_in))).
    bound = 1.0 / math.sqrt(nb_classes)
    kws = jax.random.split(k4, 6)
    ws = jax.random.uniform(kws[0], (nb_classes, nb_classes), minval=-bound, maxval=bound)
    bs = jax.random.uniform(kws[1], (1, nb_classes), minval=-bound, maxval=bound)
    wb = jax.random.uniform(kws[2], (nb_classes, nb_classes), minval=-bound, maxval=bound)
    bb = jax.random.uniform(kws[3], (1, nb_classes), minval=-bound, maxval=bound)
    wc = jax.random.uniform(kws[4], (nb_classes, nb_classes), minval=-bound, maxval=bound)
    bc = jax.random.uniform(kws[5], (1, nb_classes), minval=-bound, maxval=bound)

    y = crf_as_rnn_forward(image, output, anno, ws, bs, wb, bb, wc, bc,
                           nb_iterations=5,
                           theta_alpha=8.0, theta_beta=0.5, theta_gamma=3.0)
    jax.block_until_ready(y)
    assert y.shape == (1, nb_classes, H, W)
    assert bool(jnp.all(jnp.isfinite(y)))
    print("KERNEL_OK")
</pallas_src>

<mosaic_0001>
module attributes {stable_mosaic.version = 11 : i64} {
  func.func @_crf_kernel(%arg0: memref<2x256xf32, #tpu.memory_space<vmem>>, %arg1: memref<2x256xf32, #tpu.memory_space<vmem>>, %arg2: memref<256x2xf32, #tpu.memory_space<vmem>>, %arg3: memref<256x4xf32, #tpu.memory_space<vmem>>, %arg4: memref<2x2xf32, #tpu.memory_space<smem>>, %arg5: memref<2x2xf32, #tpu.memory_space<smem>>, %arg6: memref<2x256xf32, #tpu.memory_space<vmem>>, %arg7: memref<256x512xbf16, #tpu.memory_space<vmem>>) attributes {dimension_semantics = [], scalar_prefetch = 0 : i64, scratch_operands = 1 : i64, tpu.core_type = #tpu.core_type<tc>} {
    %c0 = arith.constant 0 : index
    %c0_0 = arith.constant 0 : index
    %0 = vector.load %arg2[%c0, %c0_0] : memref<256x2xf32, #tpu.memory_space<vmem>>, vector<256x2xf32>
    %1 = arith.mulf %0, %0 : vector<256x2xf32>
    %cst = arith.constant dense<0.000000e+00> : vector<256xf32>
    %2 = vector.multi_reduction <add>, %1, %cst [1] : vector<256x2xf32> to vector<256xf32>
    %3 = vector.shape_cast %2 : vector<256xf32> to vector<256x1xf32>
    %cst_1 = arith.constant 1.000000e+00 : f32
    %4 = vector.broadcast %cst_1 : f32 to vector<256x1xf32>
    %cst_2 = arith.constant -2.000000e+00 : f32
    %5 = vector.broadcast %cst_2 : f32 to vector<256x2xf32>
    %6 = arith.mulf %5, %0 : vector<256x2xf32>
    %7 = tpu.concatenate %3, %4, %6 in 1 : vector<256x1xf32>, vector<256x1xf32>, vector<256x2xf32> -> vector<256x4xf32>
    %8 = tpu.concatenate %4, %3, %0 in 1 : vector<256x1xf32>, vector<256x1xf32>, vector<256x2xf32> -> vector<256x4xf32>
    %cst_3 = arith.constant dense<0.000000e+00> : vector<256x256xf32>
    %9 = tpu.matmul %7, %8, %cst_3 {dimension_numbers = #tpu.dot_dimension_numbers<[1], [1], [0], [0], [0, 0, 1, 0], [], []>} : vector<256x4xf32>, vector<256x4xf32>, vector<256x256xf32> -> vector<256x256xf32>
    %cst_4 = arith.constant 0.000000e+00 : f32
    %10 = vector.broadcast %cst_4 : f32 to vector<256x256xf32>
    %11 = arith.maximumf %9, %10 : vector<256x256xf32>
    %cst_5 = arith.constant 0.000000e+00 : f32
    %12 = vector.broadcast %cst_5 : f32 to vector<256x256xf32>
    %13 = arith.subf %12, %11 : vector<256x256xf32>
    %14 = math.exp %13 : vector<256x256xf32>
    %15 = arith.truncf %14 : vector<256x256xf32> to vector<256x256xbf16>
    %c0_6 = arith.constant 0 : index
    %c0_7 = arith.constant 0 : index
    %16 = vector.load %arg7[%c0_6, %c0_7] : memref<256x512xbf16, #tpu.memory_space<vmem>>, vector<256x256xbf16>
    tpu.vector_store %arg7[%c0_6, %c0_7], %15 {strides = array<i32>} : memref<256x512xbf16, #tpu.memory_space<vmem>>, vector<256x256xbf16>,
    %c0_8 = arith.constant 0 : index
    %c0_9 = arith.constant 0 : index
    %17 = vector.load %arg3[%c0_8, %c0_9] : memref<256x4xf32, #tpu.memory_space<vmem>>, vector<256x4xf32>
    %18 = arith.mulf %17, %17 : vector<256x4xf32>
    %cst_10 = arith.constant dense<0.000000e+00> : vector<256xf32>
    %19 = vector.multi_reduction <add>, %18, %cst_10 [1] : vector<256x4xf32> to vector<256xf32>
    %20 = vector.shape_cast %19 : vector<256xf32> to vector<256x1xf32>
    %cst_11 = arith.constant 1.000000e+00 : f32
    %21 = vector.broadcast %cst_11 : f32 to vector<256x1xf32>
    %cst_12 = arith.constant -2.000000e+00 : f32
    %22 = vector.broadcast %cst_12 : f32 to vector<256x4xf32>
    %23 = arith.mulf %22, %17 : vector<256x4xf32>
    %24 = tpu.concatenate %20, %21, %23 in 1 : vector<256x1xf32>, vector<256x1xf32>, vector<256x4xf32> -> vector<256x6xf32>
    %25 = tpu.concatenate %21, %20, %17 in 1 : vector<256x1xf32>, vector<256x1xf32>, vector<256x4xf32> -> vector<256x6xf32>
    %cst_13 = arith.constant dense<0.000000e+00> : vector<256x256xf32>
    %26 = tpu.matmul %24, %25, %cst_13 {dimension_numbers = #tpu.dot_dimension_numbers<[1], [1], [0], [0], [0, 0, 1, 0], [], []>} : vector<256x6xf32>, vector<256x6xf32>, vector<256x256xf32> -> vector<256x256xf32>
    %cst_14 = arith.constant 0.000000e+00 : f32
    %27 = vector.broadcast %cst_14 : f32 to vector<256x256xf32>
    %28 = arith.maximumf %26, %27 : vector<256x256xf32>
    %cst_15 = arith.constant 0.000000e+00 : f32
    %29 = vector.broadcast %cst_15 : f32 to vector<256x256xf32>
    %30 = arith.subf %29, %28 : vector<256x256xf32>
    %31 = math.exp %30 : vector<256x256xf32>
    %32 = arith.truncf %31 : vector<256x256xf32> to vector<256x256xbf16>
    %c0_16 = arith.constant 0 : index
    %c256 = arith.constant 256 : index
    %33 = vector.load %arg7[%c0_16, %c256] : memref<256x512xbf16, #tpu.memory_space<vmem>>, vector<256x256xbf16>
    tpu.vector_store %arg7[%c0_16, %c256], %32 {strides = array<i32>} : memref<256x512xbf16, #tpu.memory_space<vmem>>, vector<256x256xbf16>,
    %c0_17 = arith.constant 0 : index
    %c0_18 = arith.constant 0 : index
    %34 = vector.load %arg0[%c0_17, %c0_18] : memref<2x256xf32, #tpu.memory_space<vmem>>, vector<2x256xf32>
    %c0_19 = arith.constant 0 : index
    %c0_20 = arith.constant 0 : index
    %35 = vector.load %arg1[%c0_19, %c0_20] : memref<2x256xf32, #tpu.memory_space<vmem>>, vector<2x256xf32>
    %c0_21 = arith.constant 0 : index
    %c0_22 = arith.constant 0 : index
    %36 = memref.load %arg4[%c0_21, %c0_22] : memref<2x2xf32, #tpu.memory_space<smem>>
    %c0_23 = arith.constant 0 : index
    %c1 = arith.constant 1 : index
    %37 = memref.load %arg4[%c0_23, %c1] : memref<2x2xf32, #tpu.memory_space<smem>>
    %c1_24 = arith.constant 1 : index
    %c0_25 = arith.constant 0 : index
    %38 = memref.load %arg4[%c1_24, %c0_25] : memref<2x2xf32, #tpu.memory_space<smem>>
    %c1_26 = arith.constant 1 : index
    %c1_27 = arith.constant 1 : index
    %39 = memref.load %arg4[%c1_26, %c1_27] : memref<2x2xf32, #tpu.memory_space<smem>>
    %c0_28 = arith.constant 0 : index
    %c0_29 = arith.constant 0 : index
    %40 = memref.load %arg5[%c0_28, %c0_29] : memref<2x2xf32, #tpu.memory_space<smem>>
    %c0_30 = arith.constant 0 : index
    %c1_31 = arith.constant 1 : index
    %41 = memref.load %arg5[%c0_30, %c1_31] : memref<2x2xf32, #tpu.memory_space<smem>>
    %c1_32 = arith.constant 1 : index
    %c0_33 = arith.constant 0 : index
    %42 = memref.load %arg5[%c1_32, %c0_33] : memref<2x2xf32, #tpu.memory_space<smem>>
    %c1_34 = arith.constant 1 : index
    %c1_35 = arith.constant 1 : index
    %43 = memref.load %arg5[%c1_34, %c1_35] : memref<2x2xf32, #tpu.memory_space<smem>>
    %c0_i32 = arith.constant 0 : i32
    %44 = vector.extract_strided_slice %34 {offsets = [0, 0], sizes = [1, 256], strides = [1, 1]} : vector<2x256xf32> to vector<1x256xf32>
    %45 = vector.extract_strided_slice %34 {offsets = [1, 0], sizes = [1, 256], strides = [1, 1]} : vector<2x256xf32> to vector<1x256xf32>
    %46 = arith.maximumf %44, %45 : vector<1x256xf32>
    %47 = vector.broadcast %46 : vector<1x256xf32> to vector<2x256xf32>
    %48 = arith.subf %34, %47 : vector<2x256xf32>
    %49 = math.exp %48 : vector<2x256xf32>
    %50 = vector.extract_strided_slice %49 {offsets = [0, 0], sizes = [1, 256], strides = [1, 1]} : vector<2x256xf32> to vector<1x256xf32>
    %51 = vector.extract_strided_slice %49 {offsets = [1, 0], sizes = [1, 256], strides = [1, 1]} : vector<2x256xf32> to vector<1x256xf32>
    %52 = arith.addf %50, %51 : vector<1x256xf32>
    %53 = tpu.reciprocal %52 {approx = true} : vector<1x256xf32> -> vector<1x256xf32>
    %54 = vector.broadcast %53 : vector<1x256xf32> to vector<2x256xf32>
    %55 = arith.mulf %49, %54 : vector<2x256xf32>
    %56 = arith.truncf %55 : vector<2x256xf32> to vector<2x256xbf16>
    %c0_36 = arith.constant 0 : index
    %c0_37 = arith.constant 0 : index
    %57 = vector.load %arg7[%c0_36, %c0_37] : memref<256x512xbf16, #tpu.memory_space<vmem>>, vector<256x512xbf16>
    %cst_38 = arith.constant dense<0.000000e+00> : vector<2x512xf32>
    %58 = tpu.matmul %56, %57, %cst_38 {dimension_numbers = #tpu.dot_dimension_numbers<[1], [0], [0], [1], [0, 0, 1, 1], [], []>} : vector<2x256xbf16>, vector<256x512xbf16>, vector<2x512xf32> -> vector<2x512xf32>
    %59 = vector.extract_strided_slice %58 {offsets = [0, 0], sizes = [2, 256], strides = [1, 1]} : vector<2x512xf32> to vector<2x256xf32>
    %60 = vector.extract_strided_slice %58 {offsets = [0, 256], sizes = [2, 256], strides = [1, 1]} : vector<2x512xf32> to vector<2x256xf32>
    %61 = vector.extract_strided_slice %59 {offsets = [0, 0], sizes = [1, 256], strides = [1, 1]} : vector<2x256xf32> to vector<1x256xf32>
    %62 = vector.broadcast %36 : f32 to vector<1x256xf32>
    %63 = arith.mulf %62, %61 : vector<1x256xf32>
    %64 = vector.extract_strided_slice %60 {offsets = [0, 0], sizes = [1, 256], strides = [1, 1]} : vector<2x256xf32> to vector<1x256xf32>
    %65 = vector.broadcast %40 : f32 to vector<1x256xf32>
    %66 = arith.mulf %65, %64 : vector<1x256xf32>
    %67 = arith.addf %63, %66 : vector<1x256xf32>
    %68 = vector.extract_strided_slice %59 {offsets = [1, 0], sizes = [1, 256], strides = [1, 1]} : vector<2x256xf32> to vector<1x256xf32>
    %69 = vector.broadcast %37 : f32 to vector<1x256xf32>
    %70 = arith.mulf %69, %68 : vector<1x256xf32>
    %71 = arith.addf %67, %70 : vector<1x256xf32>
    %72 = vector.extract_strided_slice %60 {offsets = [1, 0], sizes = [1, 256], strides = [1, 1]} : vector<2x256xf32> to vector<1x256xf32>
    %73 = vector.broadcast %41 : f32 to vector<1x256xf32>
    %74 = arith.mulf %73, %72 : vector<1x256xf32>
    %75 = arith.addf %71, %74 : vector<1x256xf32>
    %76 = vector.extract_strided_slice %59 {offsets = [0, 0], sizes = [1, 256], strides = [1, 1]} : vector<2x256xf32> to vector<1x256xf32>
    %77 = vector.broadcast %38 : f32 to vector<1x256xf32>
    %78 = arith.mulf %77, %76 : vector<1x256xf32>
    %79 = vector.extract_strided_slice %60 {offsets = [0, 0], sizes = [1, 256], strides = [1, 1]} : vector<2x256xf32> to vector<1x256xf32>
    %80 = vector.broadcast %42 : f32 to vector<1x256xf32>
    %81 = arith.mulf %80, %79 : vector<1x256xf32>
    %82 = arith.addf %78, %81 : vector<1x256xf32>
    %83 = vector.extract_strided_slice %59 {offsets = [1, 0], sizes = [1, 256], strides = [1, 1]} : vector<2x256xf32> to vector<1x256xf32>
    %84 = vector.broadcast %39 : f32 to vector<1x256xf32>
    %85 = arith.mulf %84, %83 : vector<1x256xf32>
    %86 = arith.addf %82, %85 : vector<1x256xf32>
    %87 = vector.extract_strided_slice %60 {offsets = [1, 0], sizes = [1, 256], strides = [1, 1]} : vector<2x256xf32> to vector<1x256xf32>
    %88 = vector.broadcast %43 : f32 to vector<1x256xf32>
    %89 = arith.mulf %88, %87 : vector<1x256xf32>
    %90 = arith.addf %86, %89 : vector<1x256xf32>
    %91 = tpu.concatenate %75, %90 in 0 : vector<1x256xf32>, vector<1x256xf32> -> vector<2x256xf32>
    %92 = arith.subf %35, %91 : vector<2x256xf32>
    %c1_i32 = arith.constant 1 : i32
    %93 = vector.extract_strided_slice %92 {offsets = [0, 0], sizes = [1, 256], strides = [1, 1]} : vector<2x256xf32> to vector<1x256xf32>
    %94 = vector.extract_strided_slice %92 {offsets = [1, 0], sizes = [1, 256], strides = [1, 1]} : vector<2x256xf32> to vector<1x256xf32>
    %95 = arith.maximumf %93, %94 : vector<1x256xf32>
    %96 = vector.broadcast %95 : vector<1x256xf32> to vector<2x256xf32>
    %97 = arith.subf %92, %96 : vector<2x256xf32>
    %98 = math.exp %97 : vector<2x256xf32>
    %99 = vector.extract_strided_slice %98 {offsets = [0, 0], sizes = [1, 256], strides = [1, 1]} : vector<2x256xf32> to vector<1x256xf32>
    %100 = vector.extract_strided_slice %98 {offsets = [1, 0], sizes = [1, 256], strides = [1, 1]} : vector<2x256xf32> to vector<1x256xf32>
    %101 = arith.addf %99, %100 : vector<1x256xf32>
    %102 = tpu.reciprocal %101 {approx = true} : vector<1x256xf32> -> vector<1x256xf32>
    %103 = vector.broadcast %102 : vector<1x256xf32> to vector<2x256xf32>
    %104 = arith.mulf %98, %103 : vector<2x256xf32>
    %105 = arith.truncf %104 : vector<2x256xf32> to vector<2x256xbf16>
    %c0_39 = arith.constant 0 : index
    %c0_40 = arith.constant 0 : index
    %106 = vector.load %arg7[%c0_39, %c0_40] : memref<256x512xbf16, #tpu.memory_space<vmem>>, vector<256x512xbf16>
    %cst_41 = arith.constant dense<0.000000e+00> : vector<2x512xf32>
    %107 = tpu.matmul %105, %106, %cst_41 {dimension_numbers = #tpu.dot_dimension_numbers<[1], [0], [0], [1], [0, 0, 1, 1], [], []>} : vector<2x256xbf16>, vector<256x512xbf16>, vector<2x512xf32> -> vector<2x512xf32>
    %108 = vector.extract_strided_slice %107 {offsets = [0, 0], sizes = [2, 256], strides = [1, 1]} : vector<2x512xf32> to vector<2x256xf32>
    %109 = vector.extract_strided_slice %107 {offsets = [0, 256], sizes = [2, 256], strides = [1, 1]} : vector<2x512xf32> to vector<2x256xf32>
    %110 = vector.extract_strided_slice %108 {offsets = [0, 0], sizes = [1, 256], strides = [1, 1]} : vector<2x256xf32> to vector<1x256xf32>
    %111 = vector.broadcast %36 : f32 to vector<1x256xf32>
    %112 = arith.mulf %111, %110 : vector<1x256xf32>
    %113 = vector.extract_strided_slice %109 {offsets = [0, 0], sizes = [1, 256], strides = [1, 1]} : vector<2x256xf32> to vector<1x256xf32>
    %114 = vector.broadcast %40 : f32 to vector<1x256xf32>
    %115 = arith.mulf %114, %113 : vector<1x256xf32>
    %116 = arith.addf %112, %115 : vector<1x256xf32>
    %117 = vector.extract_strided_slice %108 {offsets = [1, 0], sizes = [1, 256], strides = [1, 1]} : vector<2x256xf32> to vector<1x256xf32>
    %118 = vector.broadcast %37 : f32 to vector<1x256xf32>
    %119 = arith.mulf %118, %117 : vector<1x256xf32>
    %120 = arith.addf %116, %119 : vector<1x256xf32>
    %121 = vector.extract_strided_slice %109 {offsets = [1, 0], sizes = [1, 256], strides = [1, 1]} : vector<2x256xf32> to vector<1x256xf32>
    %122 = vector.broadcast %41 : f32 to vector<1x256xf32>
    %123 = arith.mulf %122, %121 : vector<1x256xf32>
    %124 = arith.addf %120, %123 : vector<1x256xf32>
    %125 = vector.extract_strided_slice %108 {offsets = [0, 0], sizes = [1, 256], strides = [1, 1]} : vector<2x256xf32> to vector<1x256xf32>
    %126 = vector.broadcast %38 : f32 to vector<1x256xf32>
    %127 = arith.mulf %126, %125 : vector<1x256xf32>
    %128 = vector.extract_strided_slice %109 {offsets = [0, 0], sizes = [1, 256], strides = [1, 1]} : vector<2x256xf32> to vector<1x256xf32>
    %129 = vector.broadcast %42 : f32 to vector<1x256xf32>
    %130 = arith.mulf %129, %128 : vector<1x256xf32>
    %131 = arith.addf %127, %130 : vector<1x256xf32>
    %132 = vector.extract_strided_slice %108 {offsets = [1, 0], sizes = [1, 256], strides = [1, 1]} : vector<2x256xf32> to vector<1x256xf32>
    %133 = vector.broadcast %39 : f32 to vector<1x256xf32>
    %134 = arith.mulf %133, %132 : vector<1x256xf32>
    %135 = arith.addf %131, %134 : vector<1x256xf32>
    %136 = vector.extract_strided_slice %109 {offsets = [1, 0], sizes = [1, 256], strides = [1, 1]} : vector<2x256xf32> to vector<1x256xf32>
    %137 = vector.broadcast %43 : f32 to vector<1x256xf32>
    %138 = arith.mulf %137, %136 : vector<1x256xf32>
    %139 = arith.addf %135, %138 : vector<1x256xf32>
    %140 = tpu.concatenate %124, %139 in 0 : vector<1x256xf32>, vector<1x256xf32> -> vector<2x256xf32>
    %141 = arith.subf %35, %140 : vector<2x256xf32>
    %c2_i32 = arith.constant 2 : i32
    %142 = vector.extract_strided_slice %141 {offsets = [0, 0], sizes = [1, 256], strides = [1, 1]} : vector<2x256xf32> to vector<1x256xf32>
    %143 = vector.extract_strided_slice %141 {offsets = [1, 0], sizes = [1, 256], strides = [1, 1]} : vector<2x256xf32> to vector<1x256xf32>
    %144 = arith.maximumf %142, %143 : vector<1x256xf32>
    %145 = vector.broadcast %144 : vector<1x256xf32> to vector<2x256xf32>
    %146 = arith.subf %141, %145 : vector<2x256xf32>
    %147 = math.exp %146 : vector<2x256xf32>
    %148 = vector.extract_strided_slice %147 {offsets = [0, 0], sizes = [1, 256], strides = [1, 1]} : vector<2x256xf32> to vector<1x256xf32>
    %149 = vector.extract_strided_slice %147 {offsets = [1, 0], sizes = [1, 256], strides = [1, 1]} : vector<2x256xf32> to vector<1x256xf32>
    %150 = arith.addf %148, %149 : vector<1x256xf32>
    %151 = tpu.reciprocal %150 {approx = true} : vector<1x256xf32> -> vector<1x256xf32>
    %152 = vector.broadcast %151 : vector<1x256xf32> to vector<2x256xf32>
    %153 = arith.mulf %147, %152 : vector<2x256xf32>
    %154 = arith.truncf %153 : vector<2x256xf32> to vector<2x256xbf16>
    %c0_42 = arith.constant 0 : index
    %c0_43 = arith.constant 0 : index
    %155 = vector.load %arg7[%c0_42, %c0_43] : memref<256x512xbf16, #tpu.memory_space<vmem>>, vector<256x512xbf16>
    %cst_44 = arith.constant dense<0.000000e+00> : vector<2x512xf32>
    %156 = tpu.matmul %154, %155, %cst_44 {dimension_numbers = #tpu.dot_dimension_numbers<[1], [0], [0], [1], [0, 0, 1, 1], [], []>} : vector<2x256xbf16>, vector<256x512xbf16>, vector<2x512xf32> -> vector<2x512xf32>
    %157 = vector.extract_strided_slice %156 {offsets = [0, 0], sizes = [2, 256], strides = [1, 1]} : vector<2x512xf32> to vector<2x256xf32>
    %158 = vector.extract_strided_slice %156 {offsets = [0, 256], sizes = [2, 256], strides = [1, 1]} : vector<2x512xf32> to vector<2x256xf32>
    %159 = vector.extract_strided_slice %157 {offsets = [0, 0], sizes = [1, 256], strides = [1, 1]} : vector<2x256xf32> to vector<1x256xf32>
    %160 = vector.broadcast %36 : f32 to vector<1x256xf32>
    %161 = arith.mulf %160, %159 : vector<1x256xf32>
    %162 = vector.extract_strided_slice %158 {offsets = [0, 0], sizes = [1, 256], strides = [1, 1]} : vector<2x256xf32> to vector<1x256xf32>
    %163 = vector.broadcast %40 : f32 to vector<1x256xf32>
    %164 = arith.mulf %163, %162 : vector<1x256xf32>
    %165 = arith.addf %161, %164 : vector<1x256xf32>
    %166 = vector.extract_strided_slice %157 {offsets = [1, 0], sizes = [1, 256], strides = [1, 1]} : vector<2x256xf32> to vector<1x256xf32>
    %167 = vector.broadcast %37 : f32 to vector<1x256xf32>
    %168 = arith.mulf %167, %166 : vector<1x256xf32>
    %169 = arith.addf %165, %168 : vector<1x256xf32>
    %170 = vector.extract_strided_slice %158 {offsets = [1, 0], sizes = [1, 256], strides = [1, 1]} : vector<2x256xf32> to vector<1x256xf32>
    %171 = vector.broadcast %41 : f32 to vector<1x256xf32>
    %172 = arith.mulf %171, %170 : vector<1x256xf32>
    %173 = arith.addf %169, %172 : vector<1x256xf32>
    %174 = vector.extract_strided_slice %157 {offsets = [0, 0], sizes = [1, 256], strides = [1, 1]} : vector<2x256xf32> to vector<1x256xf32>
    %175 = vector.broadcast %38 : f32 to vector<1x256xf32>
    %176 = arith.mulf %175, %174 : vector<1x256xf32>
    %177 = vector.extract_strided_slice %158 {offsets = [0, 0], sizes = [1, 256], strides = [1, 1]} : vector<2x256xf32> to vector<1x256xf32>
    %178 = vector.broadcast %42 : f32 to vector<1x256xf32>
    %179 = arith.mulf %178, %177 : vector<1x256xf32>
    %180 = arith.addf %176, %179 : vector<1x256xf32>
    %181 = vector.extract_strided_slice %157 {offsets = [1, 0], sizes = [1, 256], strides = [1, 1]} : vector<2x256xf32> to vector<1x256xf32>
    %182 = vector.broadcast %39 : f32 to vector<1x256xf32>
    %183 = arith.mulf %182, %181 : vector<1x256xf32>
    %184 = arith.addf %180, %183 : vector<1x256xf32>
    %185 = vector.extract_strided_slice %158 {offsets = [1, 0], sizes = [1, 256], strides = [1, 1]} : vector<2x256xf32> to vector<1x256xf32>
    %186 = vector.broadcast %43 : f32 to vector<1x256xf32>
    %187 = arith.mulf %186, %185 : vector<1x256xf32>
    %188 = arith.addf %184, %187 : vector<1x256xf32>
    %189 = tpu.concatenate %173, %188 in 0 : vector<1x256xf32>, vector<1x256xf32> -> vector<2x256xf32>
    %190 = arith.subf %35, %189 : vector<2x256xf32>
    %c3_i32 = arith.constant 3 : i32
    %191 = vector.extract_strided_slice %190 {offsets = [0, 0], sizes = [1, 256], strides = [1, 1]} : vector<2x256xf32> to vector<1x256xf32>
    %192 = vector.extract_strided_slice %190 {offsets = [1, 0], sizes = [1, 256], strides = [1, 1]} : vector<2x256xf32> to vector<1x256xf32>
    %193 = arith.maximumf %191, %192 : vector<1x256xf32>
    %194 = vector.broadcast %193 : vector<1x256xf32> to vector<2x256xf32>
    %195 = arith.subf %190, %194 : vector<2x256xf32>
    %196 = math.exp %195 : vector<2x256xf32>
    %197 = vector.extract_strided_slice %196 {offsets = [0, 0], sizes = [1, 256], strides = [1, 1]} : vector<2x256xf32> to vector<1x256xf32>
    %198 = vector.extract_strided_slice %196 {offsets = [1, 0], sizes = [1, 256], strides = [1, 1]} : vector<2x256xf32> to vector<1x256xf32>
    %199 = arith.addf %197, %198 : vector<1x256xf32>
    %200 = tpu.reciprocal %199 {approx = true} : vector<1x256xf32> -> vector<1x256xf32>
    %201 = vector.broadcast %200 : vector<1x256xf32> to vector<2x256xf32>
    %202 = arith.mulf %196, %201 : vector<2x256xf32>
    %203 = arith.truncf %202 : vector<2x256xf32> to vector<2x256xbf16>
    %c0_45 = arith.constant 0 : index
    %c0_46 = arith.constant 0 : index
    %204 = vector.load %arg7[%c0_45, %c0_46] : memref<256x512xbf16, #tpu.memory_space<vmem>>, vector<256x512xbf16>
    %cst_47 = arith.constant dense<0.000000e+00> : vector<2x512xf32>
    %205 = tpu.matmul %203, %204, %cst_47 {dimension_numbers = #tpu.dot_dimension_numbers<[1], [0], [0], [1], [0, 0, 1, 1], [], []>} : vector<2x256xbf16>, vector<256x512xbf16>, vector<2x512xf32> -> vector<2x512xf32>
    %206 = vector.extract_strided_slice %205 {offsets = [0, 0], sizes = [2, 256], strides = [1, 1]} : vector<2x512xf32> to vector<2x256xf32>
    %207 = vector.extract_strided_slice %205 {offsets = [0, 256], sizes = [2, 256], strides = [1, 1]} : vector<2x512xf32> to vector<2x256xf32>
    %208 = vector.extract_strided_slice %206 {offsets = [0, 0], sizes = [1, 256], strides = [1, 1]} : vector<2x256xf32> to vector<1x256xf32>
    %209 = vector.broadcast %36 : f32 to vector<1x256xf32>
    %210 = arith.mulf %209, %208 : vector<1x256xf32>
    %211 = vector.extract_strided_slice %207 {offsets = [0, 0], sizes = [1, 256], strides = [1, 1]} : vector<2x256xf32> to vector<1x256xf32>
    %212 = vector.broadcast %40 : f32 to vector<1x256xf32>
    %213 = arith.mulf %212, %211 : vector<1x256xf32>
    %214 = arith.addf %210, %213 : vector<1x256xf32>
    %215 = vector.extract_strided_slice %206 {offsets = [1, 0], sizes = [1, 256], strides = [1, 1]} : vector<2x256xf32> to vector<1x256xf32>
    %216 = vector.broadcast %37 : f32 to vector<1x256xf32>
    %217 = arith.mulf %216, %215 : vector<1x256xf32>
    %218 = arith.addf %214, %217 : vector<1x256xf32>
    %219 = vector.extract_strided_slice %207 {offsets = [1, 0], sizes = [1, 256], strides = [1, 1]} : vector<2x256xf32> to vector<1x256xf32>
    %220 = vector.broadcast %41 : f32 to vector<1x256xf32>
    %221 = arith.mulf %220, %219 : vector<1x256xf32>
    %222 = arith.addf %218, %221 : vector<1x256xf32>
    %223 = vector.extract_strided_slice %206 {offsets = [0, 0], sizes = [1, 256], strides = [1, 1]} : vector<2x256xf32> to vector<1x256xf32>
    %224 = vector.broadcast %38 : f32 to vector<1x256xf32>
    %225 = arith.mulf %224, %223 : vector<1x256xf32>
    %226 = vector.extract_strided_slice %207 {offsets = [0, 0], sizes = [1, 256], strides = [1, 1]} : vector<2x256xf32> to vector<1x256xf32>
    %227 = vector.broadcast %42 : f32 to vector<1x256xf32>
    %228 = arith.mulf %227, %226 : vector<1x256xf32>
    %229 = arith.addf %225, %228 : vector<1x256xf32>
    %230 = vector.extract_strided_slice %206 {offsets = [1, 0], sizes = [1, 256], strides = [1, 1]} : vector<2x256xf32> to vector<1x256xf32>
    %231 = vector.broadcast %39 : f32 to vector<1x256xf32>
    %232 = arith.mulf %231, %230 : vector<1x256xf32>
    %233 = arith.addf %229, %232 : vector<1x256xf32>
    %234 = vector.extract_strided_slice %207 {offsets = [1, 0], sizes = [1, 256], strides = [1, 1]} : vector<2x256xf32> to vector<1x256xf32>
    %235 = vector.broadcast %43 : f32 to vector<1x256xf32>
    %236 = arith.mulf %235, %234 : vector<1x256xf32>
    %237 = arith.addf %233, %236 : vector<1x256xf32>
    %238 = tpu.concatenate %222, %237 in 0 : vector<1x256xf32>, vector<1x256xf32> -> vector<2x256xf32>
    %239 = arith.subf %35, %238 : vector<2x256xf32>
    %c4_i32 = arith.constant 4 : i32
    %240 = vector.extract_strided_slice %239 {offsets = [0, 0], sizes = [1, 256], strides = [1, 1]} : vector<2x256xf32> to vector<1x256xf32>
    %241 = vector.extract_strided_slice %239 {offsets = [1, 0], sizes = [1, 256], strides = [1, 1]} : vector<2x256xf32> to vector<1x256xf32>
    %242 = arith.maximumf %240, %241 : vector<1x256xf32>
    %243 = vector.broadcast %242 : vector<1x256xf32> to vector<2x256xf32>
    %244 = arith.subf %239, %243 : vector<2x256xf32>
    %245 = math.exp %244 : vector<2x256xf32>
    %246 = vector.extract_strided_slice %245 {offsets = [0, 0], sizes = [1, 256], strides = [1, 1]} : vector<2x256xf32> to vector<1x256xf32>
    %247 = vector.extract_strided_slice %245 {offsets = [1, 0], sizes = [1, 256], strides = [1, 1]} : vector<2x256xf32> to vector<1x256xf32>
    %248 = arith.addf %246, %247 : vector<1x256xf32>
    %249 = tpu.reciprocal %248 {approx = true} : vector<1x256xf32> -> vector<1x256xf32>
    %250 = vector.broadcast %249 : vector<1x256xf32> to vector<2x256xf32>
    %251 = arith.mulf %245, %250 : vector<2x256xf32>
    %252 = arith.truncf %251 : vector<2x256xf32> to vector<2x256xbf16>
    %c0_48 = arith.constant 0 : index
    %c0_49 = arith.constant 0 : index
    %253 = vector.load %arg7[%c0_48, %c0_49] : memref<256x512xbf16, #tpu.memory_space<vmem>>, vector<256x512xbf16>
    %cst_50 = arith.constant dense<0.000000e+00> : vector<2x512xf32>
    %254 = tpu.matmul %252, %253, %cst_50 {dimension_numbers = #tpu.dot_dimension_numbers<[1], [0], [0], [1], [0, 0, 1, 1], [], []>} : vector<2x256xbf16>, vector<256x512xbf16>, vector<2x512xf32> -> vector<2x512xf32>
    %255 = vector.extract_strided_slice %254 {offsets = [0, 0], sizes = [2, 256], strides = [1, 1]} : vector<2x512xf32> to vector<2x256xf32>
    %256 = vector.extract_strided_slice %254 {offsets = [0, 256], sizes = [2, 256], strides = [1, 1]} : vector<2x512xf32> to vector<2x256xf32>
    %257 = vector.extract_strided_slice %255 {offsets = [0, 0], sizes = [1, 256], strides = [1, 1]} : vector<2x256xf32> to vector<1x256xf32>
    %258 = vector.broadcast %36 : f32 to vector<1x256xf32>
    %259 = arith.mulf %258, %257 : vector<1x256xf32>
    %260 = vector.extract_strided_slice %256 {offsets = [0, 0], sizes = [1, 256], strides = [1, 1]} : vector<2x256xf32> to vector<1x256xf32>
    %261 = vector.broadcast %40 : f32 to vector<1x256xf32>
    %262 = arith.mulf %261, %260 : vector<1x256xf32>
    %263 = arith.addf %259, %262 : vector<1x256xf32>
    %264 = vector.extract_strided_slice %255 {offsets = [1, 0], sizes = [1, 256], strides = [1, 1]} : vector<2x256xf32> to vector<1x256xf32>
    %265 = vector.broadcast %37 : f32 to vector<1x256xf32>
    %266 = arith.mulf %265, %264 : vector<1x256xf32>
    %267 = arith.addf %263, %266 : vector<1x256xf32>
    %268 = vector.extract_strided_slice %256 {offsets = [1, 0], sizes = [1, 256], strides = [1, 1]} : vector<2x256xf32> to vector<1x256xf32>
    %269 = vector.broadcast %41 : f32 to vector<1x256xf32>
    %270 = arith.mulf %269, %268 : vector<1x256xf32>
    %271 = arith.addf %267, %270 : vector<1x256xf32>
    %272 = vector.extract_strided_slice %255 {offsets = [0, 0], sizes = [1, 256], strides = [1, 1]} : vector<2x256xf32> to vector<1x256xf32>
    %273 = vector.broadcast %38 : f32 to vector<1x256xf32>
    %274 = arith.mulf %273, %272 : vector<1x256xf32>
    %275 = vector.extract_strided_slice %256 {offsets = [0, 0], sizes = [1, 256], strides = [1, 1]} : vector<2x256xf32> to vector<1x256xf32>
    %276 = vector.broadcast %42 : f32 to vector<1x256xf32>
    %277 = arith.mulf %276, %275 : vector<1x256xf32>
    %278 = arith.addf %274, %277 : vector<1x256xf32>
    %279 = vector.extract_strided_slice %255 {offsets = [1, 0], sizes = [1, 256], strides = [1, 1]} : vector<2x256xf32> to vector<1x256xf32>
    %280 = vector.broadcast %39 : f32 to vector<1x256xf32>
    %281 = arith.mulf %280, %279 : vector<1x256xf32>
    %282 = arith.addf %278, %281 : vector<1x256xf32>
    %283 = vector.extract_strided_slice %256 {offsets = [1, 0], sizes = [1, 256], strides = [1, 1]} : vector<2x256xf32> to vector<1x256xf32>
    %284 = vector.broadcast %43 : f32 to vector<1x256xf32>
    %285 = arith.mulf %284, %283 : vector<1x256xf32>
    %286 = arith.addf %282, %285 : vector<1x256xf32>
    %287 = tpu.concatenate %271, %286 in 0 : vector<1x256xf32>, vector<1x256xf32> -> vector<2x256xf32>
    %288 = arith.subf %35, %287 : vector<2x256xf32>
    %289 = vector.extract_strided_slice %288 {offsets = [0, 0], sizes = [1, 256], strides = [1, 1]} : vector<2x256xf32> to vector<1x256xf32>
    %290 = vector.extract_strided_slice %288 {offsets = [1, 0], sizes = [1, 256], strides = [1, 1]} : vector<2x256xf32> to vector<1x256xf32>
    %291 = arith.maximumf %289, %290 : vector<1x256xf32>
    %292 = vector.broadcast %291 : vector<1x256xf32> to vector<2x256xf32>
    %293 = arith.subf %288, %292 : vector<2x256xf32>
    %294 = math.exp %293 : vector<2x256xf32>
    %295 = vector.extract_strided_slice %294 {offsets = [0, 0], sizes = [1, 256], strides = [1, 1]} : vector<2x256xf32> to vector<1x256xf32>
    %296 = vector.extract_strided_slice %294 {offsets = [1, 0], sizes = [1, 256], strides = [1, 1]} : vector<2x256xf32> to vector<1x256xf32>
    %297 = arith.addf %295, %296 : vector<1x256xf32>
    %298 = vector.broadcast %297 : vector<1x256xf32> to vector<2x256xf32>
    %299 = arith.divf %294, %298 : vector<2x256xf32>
    %300 = arith.cmpf one, %299, %299 : vector<2x256xf32>
    %cst_51 = arith.constant 0.000000e+00 : f32
    %301 = vector.broadcast %cst_51 : f32 to vector<2x256xf32>
    %302 = arith.select %300, %301, %299 : vector<2x256xi1>, vector<2x256xf32>
    %cst_52 = arith.constant 5.000000e-01 : f32
    %303 = vector.broadcast %cst_52 : f32 to vector<2x256xf32>
    %304 = arith.cmpf ogt, %302, %303 : vector<2x256xf32>
    %cst_53 = arith.constant 0.000000e+00 : f32
    %305 = vector.broadcast %cst_53 : f32 to vector<2x256xf32>
    %306 = arith.select %304, %302, %305 : vector<2x256xi1>, vector<2x256xf32>
    %c0_54 = arith.constant 0 : index
    %c0_55 = arith.constant 0 : index
    %307 = vector.load %arg6[%c0_54, %c0_55] : memref<2x256xf32, #tpu.memory_space<vmem>>, vector<2x256xf32>
    tpu.vector_store %arg6[%c0_54, %c0_55], %306 {strides = array<i32>} : memref<2x256xf32, #tpu.memory_space<vmem>>, vector<2x256xf32>,
    return
  }
}

</mosaic_0001>

<bundles_post_ra>
// kernel: tpu_custom_call.1
= control target key start
LH: loop header
LB: loop body
LE: loop exit
PB: predicated region body
PF: predicated region fallthrough
CT: control target
= control target key end

     0   :  { %11 = vsyncpa [#allocation5], 0  ;;  %s7622_s0 = inlined_call_operand.vmem [shape: f32[2,256], index: 0, kind: input, shape index: {}]   ;;  %s7623_s1 = inlined_call_operand.vmem [shape: f32[2,256], index: 1, kind: input, shape index: {}]   ;;  %s7624_s2 = inlined_call_operand.vmem [shape: f32[256,2], index: 2, kind: input, shape index: {}]   ;;  %s7625_s3 = inlined_call_operand.vmem [shape: f32[256,4], index: 3, kind: input, shape index: {}]   ;;  %s7626_s4 = inlined_call_operand.vmem [shape: f32[2,2], index: 4, kind: input, shape index: {}]   ;;  %s7627_s5 = inlined_call_operand.vmem [shape: f32[2,2], index: 5, kind: input, shape index: {}]   ;;  %s7628_s6 = inlined_call_operand.hbm [shape: f32[2,256], index: 6, kind: output, shape index: {}]  }
   0x1   :  { %12 = vsyncpa [#allocation7], 0 }
   0x2   :  { %13 = vsyncpa [#allocation4], 0  ;;  %s28_s23 = sshll.u32 %s7626_s4, 4  ;;  %s38_s26 = sshll.u32 %s7627_s5, 4  ;;  %s29_s23 = int_to_ptr.vmem [resolvable:$true] %s28_s23  ;;  %s39_s26 = int_to_ptr.vmem [resolvable:$true] %s38_s26 }
   0x3   :  { %s5036_s27 = scalar_lea.vmem %s29_s23, 32  ;;  %p5041_p1 = scmp.lt.s32.totalorder %s29_s23, %s29_s23 }
   0x4   :  { %p5037_p0 = scmp.ne.s32.totalorder %s29_s23, %s5036_s27  ;;  %p5042_p2 = scmp.lt.s32.totalorder %s5036_s27, %s5036_s27 }
   0x6   :  { %p5043_p3 = por %p5042_p2, %p5041_p1 }
   0x8   :  { %p5044_p4 = pnand %p5043_p3, %p5037_p0 }
   0xa   :  { %5047 = shalt.err (!%p5044_p4)
}
   0xb   :  { %s5088_s28 = smov [#allocation3]   ;;  %s5048_s29 = scalar_lea.vmem %s39_s26, 32 }
   0xc   :  { %31 = dma.vmem_to_smem %s29_s23, 32, %s5088_s28, [#allocation5]  }
   0xd   :  { %p5049_p5 = scmp.ne.s32.totalorder %s39_s26, %s5048_s29  ;;  %p5053_p6 = scmp.lt.s32.totalorder %s39_s26, %s39_s26 }
   0xe   :  { %p5054_p7 = scmp.lt.s32.totalorder %s5048_s29, %s5048_s29 }
  0x10   :  { %p5055_p8 = por %p5054_p7, %p5053_p6 }
  0x12   :  { %p5056_p9 = pnand %p5055_p8, %p5049_p5 }
  0x14   :  { %5059 = shalt.err (!%p5056_p9)
}
  0x15   :  { %s5089_s4 = smov [#allocation6]  }
  0x16   :  { %41 = dma.vmem_to_smem %s39_s26, 32, %s5089_s4, [#allocation7]  }
  0x17   :  { %5082 = dma.done.wait [#allocation5], 32  }
  0x18   :  { %5083 = vsyncadd [#allocation5], 4294967264 }
  0x19   :  { %5084 = dma.done.wait [#allocation7], 32  }
  0x1a   :  { %5085 = vsyncadd [#allocation7], 4294967264 }
  0x1b   :  { %48 = sfence }
  0x1c   :  { %vm627_vm0 = vcmask 31744   ;;  %v5137_v0 = vld [vmem:[%s7625_s3 + $0x80] sm:$0xff]  ;;  %vm113_vm1 = vcmask 15360   ;;  %v5147_v2 = vld [vmem:[%s7625_s3 + $0x88] sm:$0xff]  ;;  %v5199_v22 = vld [vmem:[%s7624_s2 + $0x98] sm:$0xff]  ;;  %s5090_s11 = smov 2  }
  0x1d   :  { %v5142_v1 = vld [vmem:[%s7624_s2 + $0x80] sm:$0xff]  ;;  %v1445_v3 = vmul.f32 %v5137_v0, %v5137_v0  ;;  %v5156_v5 = vld [vmem:[%s7624_s2 + $0x88] sm:$0xff]  ;;  %v1446_v6 = vmul.f32 %v5147_v2, %v5147_v2  ;;  %v5204_v23 = vld [vmem:[%s7624_s2 + $0x90] sm:$0xff]  ;;  %v100_v26 = vmul.f32 %v5199_v22, %v5199_v22  ;;  %v4576_v51 = vpack.i.bf16 %v5147_v2, %v5137_v0  ;;  %s4261_s5 = sld [smem:[#allocation3 + $0x80]]  ;;  %s4262_s30 = sld [smem:[#allocation3 + $0x81]] }
  0x1e   :  { %v97_v4 = vmul.f32 %v5142_v1, %v5142_v1  ;;  %v98_v7 = vmul.f32 %v5156_v5, %v5156_v5  ;;  %v5165_v8 = vld [vmem:[%s7624_s2 + $0x8] sm:$0xff]  ;;  %v5170_v9 = vld [vmem:[%s7624_s2] sm:$0xff]  ;;  %v99_v27 = vmul.f32 %v5204_v23, %v5204_v23  ;;  %v5215_v28 = vld [vmem:[%s7625_s3 + $0x98] sm:$0xff]  ;;  %v4591_v50 = vpack.i.bf16 %v5199_v22, %v5204_v23  ;;  %s2749_s7 = sld [smem:[#allocation6]]  ;;  %s4263_s8 = sld [smem:[#allocation6 + $0x1]] }
  0x1f   :  { %v1509_v10 = vsel %vm627_vm0, %v1445_v3, 0.0  ;;  %v1512_v12 = vsel %vm627_vm0, %v1446_v6, 0.0  ;;  %v82_v14 = vmul.f32 %v5165_v8, %v5165_v8  ;;  %v81_v15 = vmul.f32 %v5170_v9, %v5170_v9  ;;  %v5183_v16 = vld [vmem:[%s7625_s3 + $0x8] sm:$0xff]  ;;  %v5188_v17 = vld [vmem:[%s7625_s3] sm:$0xff]  ;;  %v5220_v29 = vld [vmem:[%s7625_s3 + $0x90] sm:$0xff]  ;;  %s4264_s9 = sld [smem:[#allocation6 + $0x80]] }
  0x20   :  { %v162_v11 = vsel %vm113_vm1, %v97_v4, 0.0  ;;  %1510 = vadd.xlane.f32.xlu1 %v1509_v10  ;;  %v165_v13 = vsel %vm113_vm1, %v98_v7, 0.0  ;;  %v1430_v20 = vmul.f32 %v5183_v16, %v5183_v16  ;;  %v1429_v21 = vmul.f32 %v5188_v17, %v5188_v17  ;;  %v5233_v35 = vld [vmem:[%s7624_s2 + $0x18] sm:$0xff]  ;;  %v5238_v36 = vld [vmem:[%s7624_s2 + $0x10] sm:$0xff]  ;;  %v5277_v53 = vld [vmem:[%s7624_s2 + $0xa0] sm:$0xff]  ;;  %s4265_s10 = sld [smem:[#allocation6 + $0x81]] }
  0x21   :  { %163 = vadd.xlane.f32.xlu0 %v162_v11  ;;  %v117_v18 = vsel %vm113_vm1, %v82_v14, 0.0  ;;  %v114_v19 = vsel %vm113_vm1, %v81_v15, 0.0  ;;  %v4586_v30 = vpack.i.bf16 %v5183_v16, %v5188_v17  ;;  %v171_v31 = vsel %vm113_vm1, %v100_v26, 0.0  ;;  %v5249_v41 = vld [vmem:[%s7625_s3 + $0x18] sm:$0xff]  ;;  %v5254_v42 = vld [vmem:[%s7625_s3 + $0x10] sm:$0xff]  ;;  %v5282_v54 = vld [vmem:[%s7624_s2 + $0xa8] sm:$0xff] }
  0x22   :  { %v1464_v24 = vsel %vm627_vm0, %v1430_v20, 0.0  ;;  %v1461_v25 = vsel %vm627_vm0, %v1429_v21, 0.0  ;;  %v168_v32 = vsel %vm113_vm1, %v99_v27, 0.0  ;;  %v1448_v33 = vmul.f32 %v5215_v28, %v5215_v28  ;;  %v5291_v57 = vld [vmem:[%s7625_s3 + $0xa0] sm:$0xff]  ;;  %v5300_v61 = vld [vmem:[%s7625_s3 + $0xa8] sm:$0xff]  ;;  %vm5386_vm4 = vmpackc.low %vm627_vm0, %vm627_vm0 }
  0x23   :  { %v1447_v34 = vmul.f32 %v5220_v29, %v5220_v29  ;;  %v84_v39 = vmul.f32 %v5233_v35, %v5233_v35  ;;  %v83_v40 = vmul.f32 %v5238_v36, %v5238_v36  ;;  %v1432_v45 = vmul.f32 %v5249_v41, %v5249_v41  ;;  %v5313_v2 = vld [vmem:[%s7624_s2 + $0x20] sm:$0xff]  ;;  %v5328_v7 = vld [vmem:[%s7624_s2 + $0x28] sm:$0xff] }
  0x24   :  { %1513 = vadd.xlane.f32.xlu1 %v1512_v12  ;;  %v1518_v37 = vsel %vm627_vm0, %v1448_v33, 0.0  ;;  %v1431_v46 = vmul.f32 %v5254_v42, %v5254_v42  ;;  %v4596_v49 = vpack.i.bf16 %v5215_v28, %v5220_v29  ;;  %v4571_v52 = vpack.i.bf16 %v5156_v5, %v5142_v1  ;;  %v5320_v4 = vld [vmem:[%s7625_s3 + $0x20] sm:$0xff] }
  0x25   :  { %166 = vadd.xlane.f32.xlu0 %v165_v13  ;;  %v1515_v38 = vsel %vm627_vm0, %v1447_v34, 0.0  ;;  %v123_v43 = vsel %vm113_vm1, %v84_v39, 0.0  ;;  %v120_v44 = vsel %vm113_vm1, %v83_v40, 0.0  ;;  %v1470_v47 = vsel %vm627_vm0, %v1432_v45, 0.0 }
  0x26   :  { %v1467_v48 = vsel %vm627_vm0, %v1431_v46, 0.0  ;;  %v101_v55 = vmul.f32 %v5277_v53, %v5277_v53  ;;  %v102_v56 = vmul.f32 %v5282_v54, %v5282_v54  ;;  %v1449_v60 = vmul.f32 %v5291_v57, %v5291_v57 }
  0x27   :  { %v1450_v63 = vmul.f32 %v5300_v61, %v5300_v61  ;;  %v4581_v1 = vpack.i.bf16 %v5165_v8, %v5170_v9  ;;  %v85_v3 = vmul.f32 %v5313_v2, %v5313_v2  ;;  %v1433_v6 = vmul.f32 %v5320_v4, %v5320_v4  ;;  %v5333_v8 = vld [vmem:[%s7625_s3 + $0x28] sm:$0xff] }
  0x28   :  { %118 = vadd.xlane.f32.xlu1 %v117_v18  ;;  %v174_v58 = vsel %vm113_vm1, %v101_v55, 0.0  ;;  %v177_v59 = vsel %vm113_vm1, %v102_v56, 0.0  ;;  %v1521_v62 = vsel %vm627_vm0, %v1449_v60, 0.0  ;;  %v86_v10 = vmul.f32 %v5328_v7, %v5328_v7  ;;  %v5412_v55 = vld [vmem:[%s7624_s2 + $0xb8] sm:$0xff] }
  0x29   :  { %115 = vadd.xlane.f32.xlu0 %v114_v19  ;;  %v1524_v0 = vsel %vm627_vm0, %v1450_v63, 0.0  ;;  %v126_v5 = vsel %vm113_vm1, %v85_v3, 0.0  ;;  %v1473_v9 = vsel %vm627_vm0, %v1433_v6, 0.0  ;;  %v1434_v11 = vmul.f32 %v5333_v8, %v5333_v8 }
  0x2a   :  { %v129_v12 = vsel %vm113_vm1, %v86_v10, 0.0  ;;  %vm370_vm2 = vcmask 7168   ;;  %vm1973_vm3 = vcmask 48128   ;;  %v4601_v6 = vpack.i.bf16 %v5233_v35, %v5238_v36 }
  0x2b   :  { %v1476_v13 = vsel %vm627_vm0, %v1434_v11, 0.0  ;;  %vm5396_vm5 = vmpackc.low %vm1973_vm3, %vm1973_vm3  ;;  %vm3053_vm6 = vcmask 1040384  }
  0x2c   :  { %1465 = vadd.xlane.f32.xlu1 %v1464_v24 }
  0x2d   :  { %1462 = vadd.xlane.f32.xlu0 %v1461_v25 }
  0x30   :  { %172 = vadd.xlane.f32.xlu1 %v171_v31 }
  0x31   :  { %169 = vadd.xlane.f32.xlu0 %v168_v32 }
  0x34   :  { %1519 = vadd.xlane.f32.xlu1 %v1518_v37 }
  0x35   :  { %1516 = vadd.xlane.f32.xlu0 %v1515_v38 }
  0x38   :  { %124 = vadd.xlane.f32.xlu1 %v123_v43 }
  0x39   :  { %121 = vadd.xlane.f32.xlu0 %v120_v44 }
  0x3c   :  { %1471 = vadd.xlane.f32.xlu1 %v1470_v47 }
  0x3d   :  { %1468 = vadd.xlane.f32.xlu0 %v1467_v48 }
  0x4d   :  { %4577 = vrot.lane.b32.xlu1 %v4576_v51, %s5090_s11 }
  0x53   :  { %4572 = vrot.lane.b32.xlu0 %v4571_v52, %s5090_s11  ;;  %v5407_v52 = vld [vmem:[%s7624_s2 + $0xb0] sm:$0xff] }
  0x54   :  { %v103_v56 = vmul.f32 %v5407_v52, %v5407_v52 }
  0x56   :  { %v180_v60 = vsel %vm113_vm1, %v103_v56, 0.0 }
  0x71   :  { %175 = vadd.xlane.f32.xlu1 %v174_v58  ;;  %v104_v58 = vmul.f32 %v5412_v55, %v5412_v55 }
  0x72   :  { %178 = vadd.xlane.f32.xlu0 %v177_v59  ;;  %v5421_v59 = vld [vmem:[%s7625_s3 + $0xb0] sm:$0xff] }
  0x73   :  { %v1451_v63 = vmul.f32 %v5421_v59, %v5421_v59 }
  0x75   :  { %1522 = vadd.xlane.f32.xlu1 %v1521_v62  ;;  %v183_v62 = vsel %vm113_vm1, %v104_v58, 0.0  ;;  %v5484_v58 = vld [vmem:[%s7624_s2 + $0x38] sm:$0xff] }
  0x79   :  { %1525 = vadd.xlane.f32.xlu1 %v1524_v0  ;;  %v5430_v0 = vld [vmem:[%s7625_s3 + $0xb8] sm:$0xff] }
  0x7a   :  { %v1452_v3 = vmul.f32 %v5430_v0, %v5430_v0 }
  0x88   :  { %4582 = vrot.lane.b32.xlu0 %v4581_v1, %s5090_s11  ;;  %v1527_v1 = vsel %vm627_vm0, %v1451_v63, 0.0  ;;  %v88_v63 = vmul.f32 %v5484_v58, %v5484_v58 }
  0x8a   :  { %4587 = vrot.lane.b32.xlu1 %v4586_v30, %s5090_s11 }
  0xa7   :  { %127 = vadd.xlane.f32.xlu0 %v126_v5  ;;  %v1530_v5 = vsel %vm627_vm0, %v1452_v3, 0.0  ;;  %v135_v3 = vsel %vm113_vm1, %v88_v63, 0.0  ;;  %v5545_v63 = vld [vmem:[%s7625_s3 + $0xc0] sm:$0xff] }
  0xab   :  { %1474 = vadd.xlane.f32.xlu0 %v1473_v9  ;;  %v4606_v9 = vpack.i.bf16 %v5249_v41, %v5254_v42 }
  0xad   :  { %v5342_v14 = vpop.xlane.xlu1 %1510 }
  0xae   :  { %7787 = vst [vmem:[#allocation12_spill] sm:$0xff] %v5342_v14  ;;  %v5344_v15 = vpop.xlane.xlu0 %163  ;;  %130 = vadd.xlane.f32.xlu1 %v129_v12  ;;  %v1925_v38 = vsel %vm370_vm2, 1.0, %v5342_v14 }
  0xaf   :  { %7788 = vst [vmem:[#allocation13_spill] sm:$0xff] %v5344_v15  ;;  %1477 = vadd.xlane.f32.xlu0 %v1476_v13  ;;  %v579_v39 = vsel %vm370_vm2, 1.0, %v5344_v15 }
  0xb1   :  { %v5346_v16 = vpop.xlane.xlu1 %1513 }
  0xb2   :  { %7789 = vst [vmem:[#allocation14_spill] sm:$0xff] %v5346_v16  ;;  %v5348_v17 = vpop.xlane.xlu0 %166  ;;  %v1926_v40 = vsel %vm370_vm2, 1.0, %v5346_v16 }
  0xb3   :  { %7790 = vst [vmem:[#allocation15_spill] sm:$0xff] %v5348_v17  ;;  %v580_v43 = vsel %vm370_vm2, 1.0, %v5348_v17 }
  0xb5   :  { %v5350_v18 = vpop.xlane.xlu1 %118 }
  0xb6   :  { %7791 = vst [vmem:[#allocation16_spill] sm:$0xff] %v5350_v18  ;;  %v5352_v19 = vpop.xlane.xlu0 %115 }
  0xb7   :  { %7792 = vst [vmem:[#allocation17_spill] sm:$0xff] %v5352_v19  ;;  %v563_v35 = vsel %vm370_vm2, 1.0, %v5352_v19 }
  0xb9   :  { %v5354_v20 = vpop.xlane.xlu1 %1465 }
  0xba   :  { %7793 = vst [vmem:[#allocation18_spill] sm:$0xff] %v5354_v20  ;;  %v5356_v21 = vpop.xlane.xlu0 %1462 }
  0xbb   :  { %7794 = vst [vmem:[#allocation19_spill] sm:$0xff] %v5356_v21 }
  0xbd   :  { %v5358_v22 = vpop.xlane.xlu1 %172  ;;  %v7856_v44 = vld [vmem:[#allocation16_spill] sm:$0xff] }
  0xbe   :  { %7795 = vst [vmem:[#allocation20_spill] sm:$0xff] %v5358_v22  ;;  %v5360_v23 = vpop.xlane.xlu0 %169 }
  0xbf   :  { %7796 = vst [vmem:[#allocation21_spill] sm:$0xff] %v5360_v23  ;;  %4597 = vrot.lane.b32.xlu1 %v4596_v49, %s5090_s11 }
  0xc1   :  { %v5363_v24 = vpop.xlane.xlu1 %1519 }
  0xc2   :  { %7797 = vst [vmem:[#allocation22_spill] sm:$0xff] %v5363_v24  ;;  %v5365_v25 = vpop.xlane.xlu0 %1516 }
  0xc3   :  { %7798 = vst [vmem:[#allocation23_spill] sm:$0xff] %v5365_v25 }
  0xc5   :  { %4592 = vrot.lane.b32.xlu0 %v4591_v50, %s5090_s11  ;;  %v5368_v26 = vpop.xlane.xlu1 %124 }
  0xc6   :  { %7799 = vst [vmem:[#allocation24_spill] sm:$0xff] %v5368_v26  ;;  %v5370_v27 = vpop.xlane.xlu0 %121 }
  0xc7   :  { %7800 = vst [vmem:[#allocation25_spill] sm:$0xff] %v5370_v27 }
  0xc9   :  { %v5372_v28 = vpop.xlane.xlu1 %1471 }
  0xca   :  { %7801 = vst [vmem:[#allocation26_spill] sm:$0xff] %v5372_v28  ;;  %v5374_v29 = vpop.xlane.xlu0 %1468 }
  0xcb   :  { %7802 = vst [vmem:[#allocation27_spill] sm:$0xff] %v5374_v29 }
  0xcd   :  { %v4578_v30 = vpop.permute.xlu1 %4577 }
  0xce   :  { %v4573_v31 = vpop.permute.xlu0 %4572  ;;  %v4580_v32 = vunpack.i.h.bf16 %v4578_v30  ;;  %v4579_v33 = vunpack.i.l.bf16 %v4578_v30 }
  0xcf   :  { %v4575_v34 = vunpack.i.h.bf16 %v4573_v31  ;;  %v4574_v37 = vunpack.i.l.bf16 %v4573_v31 }
  0xd0   :  { %v1957_v47 = vsel %vm113_vm1, %v1925_v38, %v4579_v33  ;;  %v1958_v48 = vsel %vm113_vm1, %v1926_v40, %v4580_v32  ;;  %v564_v32 = vsel %vm370_vm2, 1.0, %v5350_v18  ;;  %v1909_v40 = vsel %vm370_vm2, 1.0, %v5356_v21 }
  0xd1   :  { %v611_v45 = vsel %vm113_vm1, %v579_v39, %v4574_v37  ;;  %v612_v46 = vsel %vm113_vm1, %v580_v43, %v4575_v34  ;;  %v4518_v51 = vpack.c.bf16 %v1958_v48, %v1957_v47  ;;  %v1910_v39 = vsel %vm370_vm2, 1.0, %v5354_v20  ;;  %v5467_v47 = vld [vmem:[%s7624_s2 + $0x30] sm:$0xff] }
  0xd2   :  { %v4470_v50 = vpack.c.bf16 %v612_v46, %v611_v45  ;;  %v87_v48 = vmul.f32 %v5467_v47, %v5467_v47 }
  0xd3   :  { %4520 = vmatprep.subr.msk.bf16.mxu1 %vm5396_vm5, %v4518_v51 }
  0xd4   :  { %4472 = vmatprep.subr.msk.bf16.mxu0 %vm5386_vm4, %v4470_v50  ;;  %v5476_v50 = vld [vmem:[%s7625_s3 + $0x30] sm:$0xff]  ;;  %v132_v51 = vsel %vm113_vm1, %v87_v48, 0.0  ;;  %v5531_v48 = vld [vmem:[%s7624_s2 + $0xc0] sm:$0xff] }
  0xd5   :  { %v1435_v56 = vmul.f32 %v5476_v50, %v5476_v50 }
  0xe3   :  { %181 = vadd.xlane.f32.xlu1 %v180_v60  ;;  %v5489_v60 = vld [vmem:[%s7625_s3 + $0x38] sm:$0xff] }
  0xe4   :  { %184 = vadd.xlane.f32.xlu0 %v183_v62  ;;  %v1479_v62 = vsel %vm627_vm0, %v1435_v56, 0.0  ;;  %v105_v56 = vmul.f32 %v5531_v48, %v5531_v48 }
  0xe7   :  { %1528 = vadd.xlane.f32.xlu1 %v1527_v1  ;;  %v1436_v1 = vmul.f32 %v5489_v60, %v5489_v60 }
  0xeb   :  { %1531 = vadd.xlane.f32.xlu1 %v1530_v5  ;;  %v1482_v5 = vsel %vm627_vm0, %v1436_v1, 0.0  ;;  %v186_v1 = vsel %vm113_vm1, %v105_v56, 0.0 }
  0xfa   :  { %4602 = vrot.lane.b32.xlu0 %v4601_v6, %s5090_s11  ;;  %v4616_v6 = vpack.i.bf16 %v5300_v61, %v5291_v57 }
  0xfc   :  { %4607 = vrot.lane.b32.xlu1 %v4606_v9, %s5090_s11  ;;  %v4611_v9 = vpack.i.bf16 %v5282_v54, %v5277_v53  ;;  %v581_v53 = vsel %vm370_vm2, 1.0, %v5360_v23  ;;  %v1928_v54 = vsel %vm370_vm2, 1.0, %v5363_v24 }
  0xfe   :  { %v5442_v10 = vpop.xlane.xlu1 %175 }
  0xff   :  { %7807 = vst [vmem:[#allocation28_spill] sm:$0xff] %v5442_v10  ;;  %v5444_v11 = vpop.xlane.xlu0 %178 }
 0x100   :  { %7808 = vst [vmem:[#allocation29_spill] sm:$0xff] %v5444_v11 }
 0x102   :  { %v5446_v12 = vpop.xlane.xlu1 %1522 }
 0x103   :  { %7809 = vst [vmem:[#allocation30_spill] sm:$0xff] %v5446_v12  ;;  %v4583_v13 = vpop.permute.xlu0 %4582 }
 0x104   :  { %v4585_v30 = vunpack.i.h.bf16 %v4583_v13  ;;  %v4584_v31 = vunpack.i.l.bf16 %v4583_v13 }
 0x106   :  { %v595_v36 = vsel %vm113_vm1, %v563_v35, %v4584_v31  ;;  %v596_v41 = vsel %vm113_vm1, %v564_v32, %v4585_v30  ;;  %v5454_v42 = vpop.xlane.xlu1 %1525 }
 0x107   :  { %7810 = vst [vmem:[#allocation31_spill] sm:$0xff] %v5454_v42  ;;  %v4473_v33 = vpack.c.bf16 %v596_v41, %v595_v36 }
 0x109   :  { %4475 = vmatpush3.bf16.xpose.msk.msra.mxu0 %vm5386_vm4, %v4473_v33 }
 0x10a   :  { %v4588_v34 = vpop.permute.xlu1 %4587 }
 0x10b   :  { %v4590_v37 = vunpack.i.h.bf16 %v4588_v34  ;;  %v4589_v38 = vunpack.i.l.bf16 %v4588_v34  ;;  %v582_v34 = vsel %vm370_vm2, 1.0, %v5358_v22 }
 0x10d   :  { %v1941_v43 = vsel %vm113_vm1, %v1909_v40, %v4589_v38  ;;  %v1942_v45 = vsel %vm113_vm1, %v1910_v39, %v4590_v37  ;;  %v1927_v37 = vsel %vm370_vm2, 1.0, %v5365_v25 }
 0x10e   :  { %v4521_v46 = vpack.c.bf16 %v1942_v45, %v1941_v43 }
 0x110   :  { %4523 = vmatpush3.bf16.xpose.msk.msra.mxu1 %vm5396_vm5, %v4521_v46 }
 0x119   :  { %133 = vadd.xlane.f32.xlu0 %v132_v51  ;;  %v5536_v51 = vld [vmem:[%s7624_s2 + $0xc8] sm:$0xff] }
 0x11d   :  { %1480 = vadd.xlane.f32.xlu0 %v1479_v62  ;;  %v106_v62 = vmul.f32 %v5536_v51, %v5536_v51 }
 0x120   :  { %136 = vadd.xlane.f32.xlu1 %v135_v3  ;;  %v189_v3 = vsel %vm113_vm1, %v106_v62, 0.0 }
 0x121   :  { %1483 = vadd.xlane.f32.xlu0 %v1482_v5  ;;  %v1453_v5 = vmul.f32 %v5545_v63, %v5545_v63 }
 0x131   :  { %4617 = vrot.lane.b32.xlu1 %v4616_v6, %s5090_s11  ;;  %v5554_v6 = vld [vmem:[%s7625_s3 + $0xc8] sm:$0xff] }
 0x134   :  { %v5503_v13 = vpop.xlane.xlu0 %127 }
 0x135   :  { %7811 = vst [vmem:[#allocation32_spill] sm:$0xff] %v5503_v13 }
 0x137   :  { %4612 = vrot.lane.b32.xlu0 %v4611_v9, %s5090_s11  ;;  %v1533_v9 = vsel %vm627_vm0, %v1453_v5, 0.0  ;;  %v1911_v5 = vsel %vm370_vm2, 1.0, %v5374_v29 }
 0x138   :  { %v5506_v30 = vpop.xlane.xlu0 %1474 }
 0x139   :  { %7812 = vst [vmem:[#allocation33_spill] sm:$0xff] %v5506_v30 }
 0x13b   :  { %v5508_v31 = vpop.xlane.xlu1 %130 }
 0x13c   :  { %7813 = vst [vmem:[#allocation34_spill] sm:$0xff] %v5508_v31  ;;  %v5510_v32 = vpop.xlane.xlu0 %1477 }
 0x13d   :  { %7814 = vst [vmem:[#allocation35_spill] sm:$0xff] %v5510_v32  ;;  %v1914_v25 = vsel %vm370_vm2, 1.0, %v5510_v32 }
 0x13f   :  { %v4598_v35 = vpop.permute.xlu1 %4597 }
 0x140   :  { %v4593_v36 = vpop.permute.xlu0 %4592  ;;  %v4600_v41 = vunpack.i.h.bf16 %v4598_v35  ;;  %v4599_v33 = vunpack.i.l.bf16 %v4598_v35  ;;  %v1454_v35 = vmul.f32 %v5554_v6, %v5554_v6 }
 0x141   :  { %v4595_v57 = vunpack.i.h.bf16 %v4593_v36  ;;  %v4594_v61 = vunpack.i.l.bf16 %v4593_v36 }
 0x142   :  { %v1960_v38 = vsel %vm113_vm1, %v1928_v54, %v4600_v41  ;;  %v1959_v39 = vsel %vm113_vm1, %v1927_v37, %v4599_v33  ;;  %v1536_v36 = vsel %vm627_vm0, %v1454_v35, 0.0  ;;  %v4621_v41 = vpack.i.bf16 %v5328_v7, %v5313_v2 }
 0x143   :  { %v614_v40 = vsel %vm113_vm1, %v582_v34, %v4595_v57  ;;  %v613_v43 = vsel %vm113_vm1, %v581_v53, %v4594_v61  ;;  %v4524_v46 = vpack.c.bf16 %v1960_v38, %v1959_v39  ;;  %v4626_v33 = vpack.i.bf16 %v5333_v8, %v5320_v4 }
 0x144   :  { %v4476_v45 = vpack.c.bf16 %v614_v40, %v613_v43  ;;  %v566_v38 = vsel %vm370_vm2, 1.0, %v5368_v26  ;;  %v565_v39 = vsel %vm370_vm2, 1.0, %v5370_v27 }
 0x145   :  { %4526 = vmatprep.subr.msk.bf16.mxu1 %vm5396_vm5, %v4524_v46 }
 0x146   :  { %4478 = vmatprep.subr.msk.bf16.mxu0 %vm5386_vm4, %v4476_v45 }
 0x155   :  { %187 = vadd.xlane.f32.xlu1 %v186_v1 }
 0x156   :  { %190 = vadd.xlane.f32.xlu0 %v189_v3  ;;  %v1912_v3 = vsel %vm370_vm2, 1.0, %v5372_v28 }
 0x159   :  { %1534 = vadd.xlane.f32.xlu1 %v1533_v9 }
 0x15d   :  { %1537 = vadd.xlane.f32.xlu1 %v1536_v36 }
 0x16c   :  { %4622 = vrot.lane.b32.xlu0 %v4621_v41, %s5090_s11  ;;  %v5591_v41 = vld [vmem:[%s7624_s2 + $0x40] sm:$0xff] }
 0x16e   :  { %4627 = vrot.lane.b32.xlu1 %v4626_v33, %s5090_s11  ;;  %v89_v33 = vmul.f32 %v5591_v41, %v5591_v41 }
 0x170   :  { %v5566_v57 = vpop.xlane.xlu1 %181 }
 0x171   :  { %7815 = vst [vmem:[#allocation36_spill] sm:$0xff] %v5566_v57  ;;  %v5568_v61 = vpop.xlane.xlu0 %184 }
 0x172   :  { %7816 = vst [vmem:[#allocation37_spill] sm:$0xff] %v5568_v61  ;;  %v586_v14 = vsel %vm370_vm2, 1.0, %v5568_v61 }
 0x174   :  { %v5570_v34 = vpop.xlane.xlu1 %1528 }
 0x175   :  { %7817 = vst [vmem:[#allocation38_spill] sm:$0xff] %v5570_v34  ;;  %v4603_v53 = vpop.permute.xlu0 %4602 }
 0x176   :  { %v4605_v54 = vunpack.i.h.bf16 %v4603_v53  ;;  %v4604_v37 = vunpack.i.l.bf16 %v4603_v53  ;;  %v5600_v53 = vld [vmem:[%s7625_s3 + $0x40] sm:$0xff] }
 0x178   :  { %v598_v40 = vsel %vm113_vm1, %v566_v38, %v4605_v54  ;;  %v597_v43 = vsel %vm113_vm1, %v565_v39, %v4604_v37  ;;  %v5578_v45 = vpop.xlane.xlu1 %1531  ;;  %v138_v54 = vsel %vm113_vm1, %v89_v33, 0.0  ;;  %v1437_v37 = vmul.f32 %v5600_v53, %v5600_v53  ;;  %v5608_v38 = vld [vmem:[%s7624_s2 + $0x48] sm:$0xff] }
 0x179   :  { %7818 = vst [vmem:[#allocation39_spill] sm:$0xff] %v5578_v45  ;;  %v4479_v46 = vpack.c.bf16 %v598_v40, %v597_v43  ;;  %v5613_v39 = vld [vmem:[%s7625_s3 + $0x48] sm:$0xff]  ;;  %v90_v43 = vmul.f32 %v5608_v38, %v5608_v38  ;;  %v1932_v15 = vsel %vm370_vm2, 1.0, %v5578_v45  ;;  %v5779_v45 = vld [vmem:[%s7624_s2 + $0xe0] sm:$0xff] }
 0x17a   :  { %v1485_v40 = vsel %vm627_vm0, %v1437_v37, 0.0 }
 0x17b   :  { %4481 = vmatpush3.bf16.xpose.msk.msra.mxu0 %vm5386_vm4, %v4479_v46  ;;  %v1438_v46 = vmul.f32 %v5613_v39, %v5613_v39 }
 0x17c   :  { %v4608_v56 = vpop.permute.xlu1 %4607 }
 0x17d   :  { %v4610_v62 = vunpack.i.h.bf16 %v4608_v56  ;;  %v4609_v1 = vunpack.i.l.bf16 %v4608_v56  ;;  %v141_v56 = vsel %vm113_vm1, %v90_v43, 0.0  ;;  %v583_v43 = vsel %vm370_vm2, 1.0, %v5442_v10 }
 0x17f   :  { %v1944_v9 = vsel %vm113_vm1, %v1912_v3, %v4610_v62  ;;  %v1943_v35 = vsel %vm113_vm1, %v1911_v5, %v4609_v1  ;;  %v1488_v62 = vsel %vm627_vm0, %v1438_v46, 0.0  ;;  %v4636_v1 = vpack.i.bf16 %v5430_v0, %v5421_v59 }
 0x180   :  { %v4527_v36 = vpack.c.bf16 %v1944_v9, %v1943_v35  ;;  %v4631_v3 = vpack.i.bf16 %v5412_v55, %v5407_v52  ;;  %v584_v52 = vsel %vm370_vm2, 1.0, %v5444_v11  ;;  %v1929_v55 = vsel %vm370_vm2, 1.0, %v5446_v12 }
 0x181   :  { %v1930_v46 = vsel %vm370_vm2, 1.0, %v5454_v42  ;;  %v5655_v42 = vld [vmem:[%s7624_s2 + $0xd0] sm:$0xff] }
 0x182   :  { %4529 = vmatpush3.bf16.xpose.msk.msra.mxu1 %vm5396_vm5, %v4527_v36 }
 0x18b   :  { %139 = vadd.xlane.f32.xlu0 %v138_v54 }
 0x18f   :  { %1486 = vadd.xlane.f32.xlu0 %v1485_v40 }
 0x192   :  { %142 = vadd.xlane.f32.xlu1 %v141_v56 }
 0x193   :  { %1489 = vadd.xlane.f32.xlu0 %v1488_v62 }
 0x1a3   :  { %4637 = vrot.lane.b32.xlu1 %v4636_v1, %s5090_s11 }
 0x1a6   :  { %v5627_v5 = vpop.xlane.xlu0 %133 }
 0x1a7   :  { %7819 = vst [vmem:[#allocation40_spill] sm:$0xff] %v5627_v5 }
 0x1a9   :  { %4632 = vrot.lane.b32.xlu0 %v4631_v3, %s5090_s11 }
 0x1aa   :  { %v5630_v9 = vpop.xlane.xlu0 %1480 }
 0x1ab   :  { %7820 = vst [vmem:[#allocation41_spill] sm:$0xff] %v5630_v9 }
 0x1ad   :  { %v5632_v35 = vpop.xlane.xlu1 %136 }
 0x1ae   :  { %7821 = vst [vmem:[#allocation42_spill] sm:$0xff] %v5632_v35  ;;  %v5634_v36 = vpop.xlane.xlu0 %1483 }
 0x1af   :  { %7822 = vst [vmem:[#allocation43_spill] sm:$0xff] %v5634_v36 }
 0x1b1   :  { %v4618_v33 = vpop.permute.xlu1 %4617 }
 0x1b2   :  { %v4613_v54 = vpop.permute.xlu0 %4612  ;;  %v4620_v37 = vunpack.i.h.bf16 %v4618_v33  ;;  %v4619_v40 = vunpack.i.l.bf16 %v4618_v33 }
 0x1b3   :  { %v4615_v59 = vunpack.i.h.bf16 %v4613_v54  ;;  %v4614_v0 = vunpack.i.l.bf16 %v4613_v54 }
 0x1b4   :  { %v1962_v56 = vsel %vm113_vm1, %v1930_v46, %v4620_v37  ;;  %v1961_v62 = vsel %vm113_vm1, %v1929_v55, %v4619_v40  ;;  %v5660_v37 = vld [vmem:[%s7624_s2 + $0xd8] sm:$0xff]  ;;  %v107_v40 = vmul.f32 %v5655_v42, %v5655_v42 }
 0x1b5   :  { %v616_v1 = vsel %vm113_vm1, %v584_v52, %v4615_v59  ;;  %v615_v3 = vsel %vm113_vm1, %v583_v43, %v4614_v0  ;;  %v4530_v54 = vpack.c.bf16 %v1962_v56, %v1961_v62  ;;  %v108_v59 = vmul.f32 %v5660_v37, %v5660_v37  ;;  %v5669_v0 = vld [vmem:[%s7625_s3 + $0xd0] sm:$0xff]  ;;  %v5678_v46 = vld [vmem:[%s7625_s3 + $0xd8] sm:$0xff] }
 0x1b6   :  { %v4482_v33 = vpack.c.bf16 %v616_v1, %v615_v3  ;;  %v192_v43 = vsel %vm113_vm1, %v107_v40, 0.0  ;;  %v1455_v55 = vmul.f32 %v5669_v0, %v5669_v0  ;;  %v1456_v62 = vmul.f32 %v5678_v46, %v5678_v46 }
 0x1b7   :  { %4532 = vmatprep.subr.msk.bf16.mxu1 %vm5396_vm5, %v4530_v54  ;;  %v195_v52 = vsel %vm113_vm1, %v108_v59, 0.0  ;;  %v4641_v3 = vpack.i.bf16 %v5484_v58, %v5467_v47 }
 0x1b8   :  { %4484 = vmatprep.subr.msk.bf16.mxu0 %vm5386_vm4, %v4482_v33  ;;  %v1539_v56 = vsel %vm627_vm0, %v1455_v55, 0.0  ;;  %v1542_v1 = vsel %vm627_vm0, %v1456_v62, 0.0  ;;  %v4646_v33 = vpack.i.bf16 %v5489_v60, %v5476_v50  ;;  %v568_v62 = vsel %vm370_vm2, 1.0, %v5508_v31 }
 0x1c7   :  { %193 = vadd.xlane.f32.xlu1 %v192_v43 }
 0x1c8   :  { %196 = vadd.xlane.f32.xlu0 %v195_v52 }
 0x1cb   :  { %1540 = vadd.xlane.f32.xlu1 %v1539_v56  ;;  %v567_v56 = vsel %vm370_vm2, 1.0, %v5503_v13 }
 0x1cf   :  { %1543 = vadd.xlane.f32.xlu1 %v1542_v1 }
 0x1de   :  { %4642 = vrot.lane.b32.xlu0 %v4641_v3, %s5090_s11 }
 0x1e0   :  { %4647 = vrot.lane.b32.xlu1 %v4646_v33, %s5090_s11 }
 0x1e2   :  { %v5690_v54 = vpop.xlane.xlu1 %187 }
 0x1e3   :  { %7823 = vst [vmem:[#allocation44_spill] sm:$0xff] %v5690_v54  ;;  %v5692_v40 = vpop.xlane.xlu0 %190 }
 0x1e4   :  { %7824 = vst [vmem:[#allocation45_spill] sm:$0xff] %v5692_v40  ;;  %v588_v26 = vsel %vm370_vm2, 1.0, %v5692_v40 }
 0x1e6   :  { %v5694_v59 = vpop.xlane.xlu1 %1534 }
 0x1e7   :  { %7825 = vst [vmem:[#allocation46_spill] sm:$0xff] %v5694_v59  ;;  %v4623_v43 = vpop.permute.xlu0 %4622 }
 0x1e8   :  { %v4625_v52 = vunpack.i.h.bf16 %v4623_v43  ;;  %v4624_v55 = vunpack.i.l.bf16 %v4623_v43  ;;  %v1913_v43 = vsel %vm370_vm2, 1.0, %v5506_v30 }
 0x1ea   :  { %v600_v1 = vsel %vm113_vm1, %v568_v62, %v4625_v52  ;;  %v599_v3 = vsel %vm113_vm1, %v567_v56, %v4624_v55  ;;  %v5702_v33 = vpop.xlane.xlu1 %1537  ;;  %v5715_v56 = vld [vmem:[%s7624_s2 + $0x50] sm:$0xff] }
 0x1eb   :  { %7826 = vst [vmem:[#allocation47_spill] sm:$0xff] %v5702_v33  ;;  %v4485_v12 = vpack.c.bf16 %v600_v1, %v599_v3  ;;  %v1934_v27 = vsel %vm370_vm2, 1.0, %v5702_v33  ;;  %v5903_v33 = vld [vmem:[%s7624_s2 + $0xf0] sm:$0xff] }
 0x1ec   :  { %7835 = vst [vmem:[#allocation56_spill] sm:$0xff] %v5903_v33 }
 0x1ed   :  { %4487 = vmatpush3.bf16.xpose.msk.msra.mxu0 %vm5386_vm4, %v4485_v12  ;;  %v5724_v12 = vld [vmem:[%s7625_s3 + $0x50] sm:$0xff] }
 0x1ee   :  { %v4628_v11 = vpop.permute.xlu1 %4627 }
 0x1ef   :  { %v4630_v10 = vunpack.i.h.bf16 %v4628_v11  ;;  %v4629_v24 = vunpack.i.l.bf16 %v4628_v11  ;;  %v91_v11 = vmul.f32 %v5715_v56, %v5715_v56 }
 0x1f1   :  { %v1945_v22 = vsel %vm113_vm1, %v1913_v43, %v4629_v24  ;;  %v1946_v52 = vsel %vm113_vm1, %v1914_v25, %v4630_v10  ;;  %v144_v24 = vsel %vm113_vm1, %v91_v11, 0.0  ;;  %v5732_v25 = vld [vmem:[%s7624_s2 + $0x58] sm:$0xff]  ;;  %v4651_v11 = vpack.i.bf16 %v5536_v51, %v5531_v48 }
 0x1f2   :  { %v4533_v55 = vpack.c.bf16 %v1946_v52, %v1945_v22  ;;  %v1439_v22 = vmul.f32 %v5724_v12, %v5724_v12  ;;  %v5737_v10 = vld [vmem:[%s7625_s3 + $0x58] sm:$0xff]  ;;  %v92_v1 = vmul.f32 %v5732_v25, %v5732_v25 }
 0x1f3   :  { %v1440_v3 = vmul.f32 %v5737_v10, %v5737_v10 }
 0x1f4   :  { %4535 = vmatpush3.bf16.xpose.msk.msra.mxu1 %vm5396_vm5, %v4533_v55  ;;  %v1491_v62 = vsel %vm627_vm0, %v1439_v22, 0.0  ;;  %v147_v43 = vsel %vm113_vm1, %v92_v1, 0.0  ;;  %v4656_v55 = vpack.i.bf16 %v5554_v6, %v5545_v63 }
 0x1f5   :  { %v1494_v52 = vsel %vm627_vm0, %v1440_v3, 0.0 }
 0x1fd   :  { %145 = vadd.xlane.f32.xlu0 %v144_v24 }
 0x201   :  { %1492 = vadd.xlane.f32.xlu0 %v1491_v62 }
 0x204   :  { %148 = vadd.xlane.f32.xlu1 %v147_v43 }
 0x205   :  { %1495 = vadd.xlane.f32.xlu0 %v1494_v52 }
 0x215   :  { %4657 = vrot.lane.b32.xlu1 %v4656_v55, %s5090_s11  ;;  %v585_v55 = vsel %vm370_vm2, 1.0, %v5566_v57 }
 0x218   :  { %v5751_v24 = vpop.xlane.xlu0 %139 }
 0x219   :  { %7827 = vst [vmem:[#allocation48_spill] sm:$0xff] %v5751_v24 }
 0x21b   :  { %4652 = vrot.lane.b32.xlu0 %v4651_v11, %s5090_s11  ;;  %v1931_v11 = vsel %vm370_vm2, 1.0, %v5570_v34 }
 0x21c   :  { %v5754_v22 = vpop.xlane.xlu0 %1486 }
 0x21d   :  { %7828 = vst [vmem:[#allocation49_spill] sm:$0xff] %v5754_v22 }
 0x21f   :  { %v5756_v62 = vpop.xlane.xlu1 %142 }
 0x220   :  { %7829 = vst [vmem:[#allocation50_spill] sm:$0xff] %v5756_v62  ;;  %v5758_v1 = vpop.xlane.xlu0 %1489 }
 0x221   :  { %7830 = vst [vmem:[#allocation51_spill] sm:$0xff] %v5758_v1 }
 0x223   :  { %v4638_v3 = vpop.permute.xlu1 %4637 }
 0x224   :  { %v4633_v43 = vpop.permute.xlu0 %4632  ;;  %v4640_v52 = vunpack.i.h.bf16 %v4638_v3  ;;  %v4639_v23 = vunpack.i.l.bf16 %v4638_v3 }
 0x225   :  { %v4635_v16 = vunpack.i.h.bf16 %v4633_v43  ;;  %v4634_v17 = vunpack.i.l.bf16 %v4633_v43 }
 0x226   :  { %v1964_v32 = vsel %vm113_vm1, %v1932_v15, %v4640_v52  ;;  %v1963_v31 = vsel %vm113_vm1, %v1931_v11, %v4639_v23  ;;  %v5784_v15 = vld [vmem:[%s7624_s2 + $0xe8] sm:$0xff]  ;;  %v4661_v11 = vpack.i.bf16 %v5608_v38, %v5591_v41 }
 0x227   :  { %v618_v3 = vsel %vm113_vm1, %v586_v14, %v4635_v16  ;;  %v617_v43 = vsel %vm113_vm1, %v585_v55, %v4634_v17  ;;  %v4536_v13 = vpack.c.bf16 %v1964_v32, %v1963_v31  ;;  %v109_v14 = vmul.f32 %v5779_v45, %v5779_v45  ;;  %v5793_v17 = vld [vmem:[%s7625_s3 + $0xe0] sm:$0xff]  ;;  %v5802_v31 = vld [vmem:[%s7625_s3 + $0xe8] sm:$0xff] }
 0x228   :  { %v4488_v30 = vpack.c.bf16 %v618_v3, %v617_v43  ;;  %v110_v16 = vmul.f32 %v5784_v15, %v5784_v15  ;;  %7831 = vst [vmem:[#allocation52_spill] sm:$0xff] %v5802_v31  ;;  %v1458_v52 = vmul.f32 %v5802_v31, %v5802_v31  ;;  %v4666_v3 = vpack.i.bf16 %v5613_v39, %v5600_v53 }
 0x229   :  { %4538 = vmatprep.subr.msk.bf16.mxu1 %vm5396_vm5, %v4536_v13  ;;  %v198_v23 = vsel %vm113_vm1, %v109_v14, 0.0 }
 0x22a   :  { %4490 = vmatprep.subr.msk.bf16.mxu0 %vm5386_vm4, %v4488_v30  ;;  %v201_v13 = vsel %vm113_vm1, %v110_v16, 0.0  ;;  %v1457_v30 = vmul.f32 %v5793_v17, %v5793_v17  ;;  %v1548_v55 = vsel %vm627_vm0, %v1458_v52, 0.0  ;;  %v570_v52 = vsel %vm370_vm2, 1.0, %v5632_v35 }
 0x22c   :  { %v1545_v32 = vsel %vm627_vm0, %v1457_v30, 0.0 }
 0x239   :  { %199 = vadd.xlane.f32.xlu1 %v198_v23 }
 0x23a   :  { %202 = vadd.xlane.f32.xlu0 %v201_v13 }
 0x23d   :  { %1546 = vadd.xlane.f32.xlu1 %v1545_v32  ;;  %v569_v32 = vsel %vm370_vm2, 1.0, %v5627_v5  ;;  %v1916_v5 = vsel %vm370_vm2, 1.0, %v5634_v36 }
 0x241   :  { %1549 = vadd.xlane.f32.xlu1 %v1548_v55 }
 0x250   :  { %4662 = vrot.lane.b32.xlu0 %v4661_v11, %s5090_s11 }
 0x252   :  { %4667 = vrot.lane.b32.xlu1 %v4666_v3, %s5090_s11 }
 0x254   :  { %v5814_v43 = vpop.xlane.xlu1 %193 }
 0x255   :  { %7832 = vst [vmem:[#allocation53_spill] sm:$0xff] %v5814_v43  ;;  %v5816_v14 = vpop.xlane.xlu0 %196 }
 0x256   :  { %7833 = vst [vmem:[#allocation54_spill] sm:$0xff] %v5816_v14 }
 0x258   :  { %v5818_v16 = vpop.xlane.xlu1 %1540 }
 0x259   :  { %7834 = vst [vmem:[#allocation55_spill] sm:$0xff] %v5818_v16  ;;  %v4643_v23 = vpop.permute.xlu0 %4642 }
 0x25a   :  { %v4645_v13 = vunpack.i.h.bf16 %v4643_v23  ;;  %v4644_v30 = vunpack.i.l.bf16 %v4643_v23  ;;  %v1915_v23 = vsel %vm370_vm2, 1.0, %v5630_v9 }
 0x25c   :  { %v602_v55 = vsel %vm113_vm1, %v570_v52, %v4645_v13  ;;  %v601_v11 = vsel %vm113_vm1, %v569_v32, %v4644_v30  ;;  %v5826_v3 = vpop.xlane.xlu1 %1543  ;;  %v5839_v32 = vld [vmem:[%s7624_s2 + $0x60] sm:$0xff] }
 0x25d   :  { %v4491_v34 = vpack.c.bf16 %v602_v55, %v601_v11 }
 0x25f   :  { %4493 = vmatpush3.bf16.xpose.msk.msra.mxu0 %vm5386_vm4, %v4491_v34  ;;  %v5848_v34 = vld [vmem:[%s7625_s3 + $0x60] sm:$0xff] }
 0x260   :  { %v4648_v61 = vpop.permute.xlu1 %4647 }
 0x261   :  { %v4650_v57 = vunpack.i.h.bf16 %v4648_v61  ;;  %v4649_v28 = vunpack.i.l.bf16 %v4648_v61  ;;  %v93_v61 = vmul.f32 %v5839_v32, %v5839_v32 }
 0x263   :  { %v1947_v35 = vsel %vm113_vm1, %v1915_v23, %v4649_v28  ;;  %v1948_v13 = vsel %vm113_vm1, %v1916_v5, %v4650_v57  ;;  %v150_v28 = vsel %vm113_vm1, %v93_v61, 0.0  ;;  %v1441_v57 = vmul.f32 %v5848_v34, %v5848_v34  ;;  %v5856_v5 = vld [vmem:[%s7624_s2 + $0x68] sm:$0xff] }
 0x264   :  { %v4539_v30 = vpack.c.bf16 %v1948_v13, %v1947_v35  ;;  %v5861_v35 = vld [vmem:[%s7625_s3 + $0x68] sm:$0xff]  ;;  %v94_v55 = vmul.f32 %v5856_v5, %v5856_v5  ;;  %v4671_v61 = vpack.i.bf16 %v5660_v37, %v5655_v42 }
 0x265   :  { %v1497_v52 = vsel %vm627_vm0, %v1441_v57, 0.0  ;;  %v1442_v11 = vmul.f32 %v5861_v35, %v5861_v35 }
 0x266   :  { %4541 = vmatpush3.bf16.xpose.msk.msra.mxu1 %vm5396_vm5, %v4539_v30  ;;  %v153_v23 = vsel %vm113_vm1, %v94_v55, 0.0  ;;  %v4676_v30 = vpack.i.bf16 %v5678_v46, %v5669_v0 }
 0x267   :  { %v1500_v13 = vsel %vm627_vm0, %v1442_v11, 0.0 }
 0x26f   :  { %151 = vadd.xlane.f32.xlu0 %v150_v28 }
 0x273   :  { %1498 = vadd.xlane.f32.xlu0 %v1497_v52 }
 0x276   :  { %154 = vadd.xlane.f32.xlu1 %v153_v23 }
 0x277   :  { %1501 = vadd.xlane.f32.xlu0 %v1500_v13 }
 0x287   :  { %4677 = vrot.lane.b32.xlu1 %v4676_v30, %s5090_s11  ;;  %v587_v30 = vsel %vm370_vm2, 1.0, %v5690_v54 }
 0x28a   :  { %v5875_v28 = vpop.xlane.xlu0 %145 }
 0x28d   :  { %4672 = vrot.lane.b32.xlu0 %v4671_v61, %s5090_s11  ;;  %v1933_v61 = vsel %vm370_vm2, 1.0, %v5694_v59 }
 0x28e   :  { %v5878_v57 = vpop.xlane.xlu0 %1492 }
 0x291   :  { %v5880_v52 = vpop.xlane.xlu1 %148 }
 0x292   :  { %v5882_v55 = vpop.xlane.xlu0 %1495 }
 0x295   :  { %v4658_v11 = vpop.permute.xlu1 %4657 }
 0x296   :  { %v4653_v23 = vpop.permute.xlu0 %4652  ;;  %v4660_v13 = vunpack.i.h.bf16 %v4658_v11  ;;  %v4659_v36 = vunpack.i.l.bf16 %v4658_v11 }
 0x297   :  { %v4655_v9 = vunpack.i.h.bf16 %v4653_v23  ;;  %v4654_v29 = vunpack.i.l.bf16 %v4653_v23 }
 0x298   :  { %v1966_v20 = vsel %vm113_vm1, %v1934_v27, %v4660_v13  ;;  %v1965_v18 = vsel %vm113_vm1, %v1933_v61, %v4659_v36  ;;  %v5908_v27 = vld [vmem:[%s7624_s2 + $0xf8] sm:$0xff]  ;;  %v4681_v61 = vpack.i.bf16 %v5732_v25, %v5715_v56 }
 0x299   :  { %v620_v11 = vsel %vm113_vm1, %v588_v26, %v4655_v9  ;;  %v619_v23 = vsel %vm113_vm1, %v587_v30, %v4654_v29  ;;  %v4542_v21 = vpack.c.bf16 %v1966_v20, %v1965_v18  ;;  %7836 = vst [vmem:[#allocation57_spill] sm:$0xff] %v5908_v27  ;;  %v111_v18 = vmul.f32 %v5903_v33, %v5903_v33  ;;  %v5926_v9 = vld [vmem:[%s7625_s3 + $0xf8] sm:$0xff] }
 0x29a   :  { %v4494_v19 = vpack.c.bf16 %v620_v11, %v619_v23  ;;  %v112_v20 = vmul.f32 %v5908_v27, %v5908_v27  ;;  %7838 = vst [vmem:[#allocation59_spill] sm:$0xff] %v5926_v9  ;;  %v1460_v13 = vmul.f32 %v5926_v9, %v5926_v9  ;;  %v4686_v11 = vpack.i.bf16 %v5737_v10, %v5724_v12 }
 0x29b   :  { %4544 = vmatprep.subr.msk.bf16.mxu1 %vm5396_vm5, %v4542_v21  ;;  %v204_v21 = vsel %vm113_vm1, %v111_v18, 0.0 }
 0x29c   :  { %4496 = vmatprep.subr.msk.bf16.mxu0 %vm5386_vm4, %v4494_v19  ;;  %v5917_v19 = vld [vmem:[%s7625_s3 + $0xf0] sm:$0xff]  ;;  %v207_v26 = vsel %vm113_vm1, %v112_v20, 0.0  ;;  %v1554_v30 = vsel %vm627_vm0, %v1460_v13, 0.0  ;;  %v572_v13 = vsel %vm370_vm2, 1.0, %v5756_v62 }
 0x29d   :  { %7837 = vst [vmem:[#allocation58_spill] sm:$0xff] %v5917_v19  ;;  %v1459_v29 = vmul.f32 %v5917_v19, %v5917_v19 }
 0x29f   :  { %v1551_v36 = vsel %vm627_vm0, %v1459_v29, 0.0 }
 0x2ab   :  { %205 = vadd.xlane.f32.xlu1 %v204_v21 }
 0x2ac   :  { %208 = vadd.xlane.f32.xlu0 %v207_v26 }
 0x2af   :  { %1552 = vadd.xlane.f32.xlu1 %v1551_v36  ;;  %v571_v36 = vsel %vm370_vm2, 1.0, %v5751_v24  ;;  %v1918_v24 = vsel %vm370_vm2, 1.0, %v5758_v1 }
 0x2b3   :  { %1555 = vadd.xlane.f32.xlu1 %v1554_v30 }
 0x2c2   :  { %4682 = vrot.lane.b32.xlu0 %v4681_v61, %s5090_s11 }
 0x2c4   :  { %4687 = vrot.lane.b32.xlu1 %v4686_v11, %s5090_s11 }
 0x2c6   :  { %v5938_v23 = vpop.xlane.xlu1 %199 }
 0x2c7   :  { %v5940_v18 = vpop.xlane.xlu0 %202 }
 0x2ca   :  { %v5942_v20 = vpop.xlane.xlu1 %1546 }
 0x2cb   :  { %7839 = vst [vmem:[#allocation60_spill] sm:$0xff] %v5942_v20  ;;  %v4663_v21 = vpop.permute.xlu0 %4662 }
 0x2cc   :  { %v4665_v26 = vunpack.i.h.bf16 %v4663_v21  ;;  %v4664_v29 = vunpack.i.l.bf16 %v4663_v21  ;;  %v1917_v21 = vsel %vm370_vm2, 1.0, %v5754_v22 }
 0x2ce   :  { %v604_v30 = vsel %vm113_vm1, %v572_v13, %v4665_v26  ;;  %v603_v61 = vsel %vm113_vm1, %v571_v36, %v4664_v29  ;;  %v5950_v59 = vpop.xlane.xlu1 %1549  ;;  %v5963_v36 = vld [vmem:[%s7624_s2 + $0x70] sm:$0xff] }
 0x2cf   :  { %v4497_v11 = vpack.c.bf16 %v604_v30, %v603_v61  ;;  %v5972_v13 = vld [vmem:[%s7625_s3 + $0x70] sm:$0xff] }
 0x2d1   :  { %4499 = vmatpush3.bf16.xpose.msk.msra.mxu0 %vm5386_vm4, %v4497_v11 }
 0x2d2   :  { %v4668_v40 = vpop.permute.xlu1 %4667 }
 0x2d3   :  { %v4670_v54 = vunpack.i.h.bf16 %v4668_v40  ;;  %v4669_v20 = vunpack.i.l.bf16 %v4668_v40  ;;  %v95_v40 = vmul.f32 %v5963_v36, %v5963_v36 }
 0x2d5   :  { %v1949_v62 = vsel %vm113_vm1, %v1917_v21, %v4669_v20  ;;  %v1950_v26 = vsel %vm113_vm1, %v1918_v24, %v4670_v54  ;;  %v156_v20 = vsel %vm113_vm1, %v95_v40, 0.0  ;;  %v1443_v54 = vmul.f32 %v5972_v13, %v5972_v13  ;;  %v5980_v24 = vld [vmem:[%s7624_s2 + $0x78] sm:$0xff] }
 0x2d6   :  { %v4545_v29 = vpack.c.bf16 %v1950_v26, %v1949_v62  ;;  %v5985_v62 = vld [vmem:[%s7625_s3 + $0x78] sm:$0xff]  ;;  %v96_v61 = vmul.f32 %v5980_v24, %v5980_v24  ;;  %v4701_v40 = vpack.i.bf16 %v5856_v5, %v5839_v32 }
 0x2d7   :  { %v1503_v30 = vsel %vm627_vm0, %v1443_v54, 0.0  ;;  %v1444_v11 = vmul.f32 %v5985_v62, %v5985_v62 }
 0x2d8   :  { %4547 = vmatpush3.bf16.xpose.msk.msra.mxu1 %vm5396_vm5, %v4545_v29  ;;  %v159_v21 = vsel %vm113_vm1, %v96_v61, 0.0  ;;  %v4696_v29 = vpack.i.bf16 %v5802_v31, %v5793_v17  ;;  %v4711_v61 = vpack.i.bf16 %v5908_v27, %v5903_v33 }
 0x2d9   :  { %v1506_v26 = vsel %vm627_vm0, %v1444_v11, 0.0 }
 0x2e1   :  { %157 = vadd.xlane.f32.xlu0 %v156_v20  ;;  %v4691_v20 = vpack.i.bf16 %v5784_v15, %v5779_v45 }
 0x2e5   :  { %1504 = vadd.xlane.f32.xlu0 %v1503_v30  ;;  %v4706_v30 = vpack.i.bf16 %v5861_v35, %v5848_v34 }
 0x2e8   :  { %160 = vadd.xlane.f32.xlu1 %v159_v21  ;;  %v4716_v21 = vpack.i.bf16 %v5926_v9, %v5917_v19  ;;  %v589_v9 = vsel %vm370_vm2, 1.0, %v5814_v43 }
 0x2e9   :  { %1507 = vadd.xlane.f32.xlu0 %v1506_v26  ;;  %v4721_v26 = vpack.i.bf16 %v5980_v24, %v5963_v36 }
 0x2f9   :  { %4697 = vrot.lane.b32.xlu1 %v4696_v29, %s5090_s11 }
 0x2fc   :  { %v6001_v54 = vpop.xlane.xlu0 %151 }
 0x2fd   :  { %7840 = vst [vmem:[#allocation61_spill] sm:$0xff] %v6001_v54  ;;  %4702 = vrot.lane.b32.xlu1 %v4701_v40, %s5090_s11 }
 0x2ff   :  { %4692 = vrot.lane.b32.xlu0 %v4691_v20, %s5090_s11  ;;  %v4726_v20 = vpack.i.bf16 %v5985_v62, %v5972_v13 }
 0x300   :  { %v6009_v11 = vpop.xlane.xlu0 %1498 }
 0x301   :  { %7841 = vst [vmem:[#allocation62_spill] sm:$0xff] %v6009_v11  ;;  %4707 = vrot.lane.b32.xlu1 %v4706_v30, %s5090_s11  ;;  %v5011_v30 = vld [vmem:[%s7624_s2] sm:$0xff] }
 0x302   :  { %v210_v1 = vmul.f32 -2.0, %v5011_v30  ;;  %v1935_v30 = vsel %vm370_vm2, 1.0, %v5818_v16 }
 0x303   :  { %4712 = vrot.lane.b32.xlu0 %v4711_v61, %s5090_s11  ;;  %v6017_v29 = vpop.xlane.xlu1 %154  ;;  %v5012_v61 = vld [vmem:[%s7625_s3] sm:$0xff] }
 0x304   :  { %7842 = vst [vmem:[#allocation63_spill] sm:$0xff] %v6017_v29  ;;  %v6019_v40 = vpop.xlane.xlu0 %1501  ;;  %v1557_v22 = vmul.f32 -2.0, %v5012_v61  ;;  %v1936_v29 = vsel %vm370_vm2, 1.0, %v5826_v3  ;;  %v5013_v61 = vld [vmem:[%s7624_s2 + $0x8] sm:$0xff] }
 0x305   :  { %7843 = vst [vmem:[#allocation64_spill] sm:$0xff] %v6019_v40  ;;  %4717 = vrot.lane.b32.xlu1 %v4716_v21, %s5090_s11  ;;  %v211_v43 = vmul.f32 -2.0, %v5013_v61 }
 0x307   :  { %4722 = vrot.lane.b32.xlu0 %v4721_v26, %s5090_s11  ;;  %v4678_v19 = vpop.permute.xlu1 %4677  ;;  %v590_v26 = vsel %vm370_vm2, 1.0, %v5816_v14 }
 0x308   :  { %v4673_v21 = vpop.permute.xlu0 %4672  ;;  %v4680_v40 = vunpack.i.h.bf16 %v4678_v19  ;;  %v4679_v11 = vunpack.i.l.bf16 %v4678_v19 }
 0x309   :  { %v4675_v27 = vunpack.i.h.bf16 %v4673_v21  ;;  %v4674_v31 = vunpack.i.l.bf16 %v4673_v21  ;;  %4727 = vrot.lane.b32.xlu1 %v4726_v20, %s5090_s11  ;;  %v1562_v20 = vmul.f32 -2.0, %v5333_v8  ;;  %v1565_v8 = vmul.f32 -2.0, %v5600_v53 }
 0x30a   :  { %v1968_v19 = vsel %vm113_vm1, %v1936_v29, %v4680_v40  ;;  %v1967_v21 = vsel %vm113_vm1, %v1935_v30, %v4679_v11  ;;  %v5014_v29 = vld [vmem:[%s7625_s3 + $0x8] sm:$0xff]  ;;  %v215_v11 = vmul.f32 -2.0, %v5328_v7  ;;  %v217_v30 = vmul.f32 -2.0, %v5484_v58 }
 0x30b   :  { %v622_v54 = vsel %vm113_vm1, %v590_v26, %v4675_v27  ;;  %v621_v14 = vsel %vm113_vm1, %v589_v9, %v4674_v31  ;;  %274 = vrot.lane.b32.xlu0 %v210_v1, %s5090_s11  ;;  %v4548_v16 = vpack.c.bf16 %v1968_v19, %v1967_v21  ;;  %v1558_v40 = vmul.f32 -2.0, %v5014_v29  ;;  %v5015_v27 = vld [vmem:[%s7624_s2 + $0x10] sm:$0xff] }
 0x30c   :  { %v4500_v33 = vpack.c.bf16 %v622_v54, %v621_v14  ;;  %v212_v31 = vmul.f32 -2.0, %v5015_v27  ;;  %v5017_v14 = vld [vmem:[%s7625_s3 + $0x10] sm:$0xff]  ;;  %v1561_v54 = vmul.f32 -2.0, %v5320_v4  ;;  %v216_v26 = vmul.f32 -2.0, %v5467_v47 }
 0x30d   :  { %4550 = vmatprep.subr.msk.bf16.mxu1 %vm5396_vm5, %v4548_v16  ;;  %1621 = vrot.lane.b32.xlu1 %v1557_v22, %s5090_s11  ;;  %v1559_v16 = vmul.f32 -2.0, %v5017_v14  ;;  %v214_v22 = vmul.f32 -2.0, %v5313_v2  ;;  %v1563_v2 = vmul.f32 -2.0, %v5476_v50  ;;  %v1564_v4 = vmul.f32 -2.0, %v5489_v60 }
 0x30e   :  { %4502 = vmatprep.subr.msk.bf16.mxu0 %vm5386_vm4, %v4500_v33  ;;  %v5016_v33 = vld [vmem:[%s7624_s2 + $0x18] sm:$0xff]  ;;  %v218_v7 = vmul.f32 -2.0, %v5591_v41  ;;  %v219_v47 = vmul.f32 -2.0, %v5608_v38  ;;  %v1566_v50 = vmul.f32 -2.0, %v5613_v39  ;;  %v220_v58 = vmul.f32 -2.0, %v5715_v56 }
 0x30f   :  { %276 = vrot.lane.b32.xlu0 %v211_v43, %s5090_s11  ;;  %v213_v1 = vmul.f32 -2.0, %v5016_v33  ;;  %v5018_v43 = vld [vmem:[%s7625_s3 + $0x18] sm:$0xff]  ;;  %v1567_v60 = vmul.f32 -2.0, %v5724_v12  ;;  %v221_v41 = vmul.f32 -2.0, %v5732_v25  ;;  %v1568_v53 = vmul.f32 -2.0, %v5737_v10 }
 0x310   :  { %v1560_v9 = vmul.f32 -2.0, %v5018_v43  ;;  %v222_v38 = vmul.f32 -2.0, %v5839_v32  ;;  %v1569_v12 = vmul.f32 -2.0, %v5848_v34  ;;  %v223_v25 = vmul.f32 -2.0, %v5856_v5  ;;  %v5019_v43 = vld [vmem:[%s7624_s2 + $0x80] sm:$0xff] }
 0x311   :  { %1623 = vrot.lane.b32.xlu1 %v1558_v40, %s5090_s11  ;;  %v573_v21 = vsel %vm370_vm2, 1.0, %v5875_v28  ;;  %v574_v29 = vsel %vm370_vm2, 1.0, %v5880_v52  ;;  %v224_v40 = vmul.f32 -2.0, %v5963_v36  ;;  %v1570_v34 = vmul.f32 -2.0, %v5861_v35 }
 0x312   :  { %v1571_v36 = vmul.f32 -2.0, %v5972_v13  ;;  %v1572_v13 = vmul.f32 -2.0, %v5985_v62  ;;  %v5021_v62 = vld [vmem:[%s7625_s3 + $0x80] sm:$0xff] }
 0x313   :  { %278 = vrot.lane.b32.xlu0 %v212_v31, %s5090_s11 }
 0x315   :  { %1625 = vrot.lane.b32.xlu1 %v1559_v16, %s5090_s11 }
 0x317   :  { %280 = vrot.lane.b32.xlu0 %v213_v1, %s5090_s11  ;;  %v225_v1 = vmul.f32 -2.0, %v5980_v24  ;;  %v1919_v24 = vsel %vm370_vm2, 1.0, %v5878_v57 }
 0x319   :  { %1627 = vrot.lane.b32.xlu1 %v1560_v9, %s5090_s11  ;;  %v226_v9 = vmul.f32 -2.0, %v5019_v43  ;;  %v235_v43 = vmul.f32 -2.0, %v5536_v51  ;;  %v237_v51 = vmul.f32 -2.0, %v5660_v37  ;;  %v239_v37 = vmul.f32 -2.0, %v5784_v15 }
 0x31a   :  { %v1938_v15 = vsel %vm370_vm2, 1.0, %v5950_v59 }
 0x31b   :  { %282 = vrot.lane.b32.xlu0 %v214_v22, %s5090_s11  ;;  %v1920_v22 = vsel %vm370_vm2, 1.0, %v5882_v55 }
 0x31d   :  { %1629 = vrot.lane.b32.xlu1 %v1561_v54, %s5090_s11 }
 0x31f   :  { %284 = vrot.lane.b32.xlu0 %v215_v11, %s5090_s11 }
 0x321   :  { %1631 = vrot.lane.b32.xlu1 %v1562_v20, %s5090_s11 }
 0x323   :  { %286 = vrot.lane.b32.xlu0 %v216_v26, %s5090_s11  ;;  %v5020_v26 = vld [vmem:[%s7624_s2 + $0x88] sm:$0xff] }
 0x325   :  { %1633 = vrot.lane.b32.xlu1 %v1563_v2, %s5090_s11  ;;  %v227_v2 = vmul.f32 -2.0, %v5020_v26 }
 0x327   :  { %288 = vrot.lane.b32.xlu0 %v217_v30, %s5090_s11  ;;  %v1573_v30 = vmul.f32 -2.0, %v5021_v62 }
 0x329   :  { %1635 = vrot.lane.b32.xlu1 %v1564_v4, %s5090_s11  ;;  %v5022_v4 = vld [vmem:[%s7624_s2 + $0x90] sm:$0xff] }
 0x32b   :  { %290 = vrot.lane.b32.xlu0 %v218_v7, %s5090_s11  ;;  %v228_v7 = vmul.f32 -2.0, %v5022_v4 }
 0x32d   :  { %1637 = vrot.lane.b32.xlu1 %v1565_v8, %s5090_s11  ;;  %v5023_v8 = vld [vmem:[%s7625_s3 + $0x88] sm:$0xff] }
 0x32f   :  { %292 = vrot.lane.b32.xlu0 %v219_v47, %s5090_s11  ;;  %v1574_v47 = vmul.f32 -2.0, %v5023_v8 }
 0x331   :  { %1639 = vrot.lane.b32.xlu1 %v1566_v50, %s5090_s11  ;;  %v5024_v50 = vld [vmem:[%s7624_s2 + $0x98] sm:$0xff] }
 0x333   :  { %294 = vrot.lane.b32.xlu0 %v220_v58, %s5090_s11  ;;  %v229_v58 = vmul.f32 -2.0, %v5024_v50 }
 0x335   :  { %1641 = vrot.lane.b32.xlu1 %v1567_v60, %s5090_s11  ;;  %v5025_v60 = vld [vmem:[%s7625_s3 + $0x90] sm:$0xff] }
 0x337   :  { %296 = vrot.lane.b32.xlu0 %v221_v41, %s5090_s11  ;;  %v1575_v41 = vmul.f32 -2.0, %v5025_v60  ;;  %v7845_v60 = vld [vmem:[#allocation56_spill] sm:$0xff] }
 0x338   :  { %v6106_v39 = vpop.xlane.xlu1 %205 }
 0x339   :  { %v6108_v56 = vpop.xlane.xlu0 %208  ;;  %1643 = vrot.lane.b32.xlu1 %v1568_v53, %s5090_s11  ;;  %v5026_v53 = vld [vmem:[%s7624_s2 + $0xa0] sm:$0xff] }
 0x33b   :  { %298 = vrot.lane.b32.xlu0 %v222_v38, %s5090_s11  ;;  %v230_v38 = vmul.f32 -2.0, %v5026_v53 }
 0x33c   :  { %v6114_v61 = vpop.xlane.xlu1 %1552 }
 0x33d   :  { %v4683_v10 = vpop.permute.xlu0 %4682  ;;  %1645 = vrot.lane.b32.xlu1 %v1569_v12, %s5090_s11  ;;  %v5027_v12 = vld [vmem:[%s7625_s3 + $0x98] sm:$0xff] }
 0x33e   :  { %v4685_v32 = vunpack.i.h.bf16 %v4683_v10  ;;  %v4684_v19 = vunpack.i.l.bf16 %v4683_v10  ;;  %v5028_v10 = vld [vmem:[%s7624_s2 + $0xa8] sm:$0xff] }
 0x33f   :  { %300 = vrot.lane.b32.xlu0 %v223_v25, %s5090_s11  ;;  %v1576_v25 = vmul.f32 -2.0, %v5027_v12 }
 0x340   :  { %v606_v5 = vsel %vm113_vm1, %v574_v29, %v4685_v32  ;;  %v605_v27 = vsel %vm113_vm1, %v573_v21, %v4684_v19  ;;  %v6126_v33 = vpop.xlane.xlu1 %1555  ;;  %v231_v32 = vmul.f32 -2.0, %v5028_v10  ;;  %v5029_v19 = vld [vmem:[%s7625_s3 + $0xa0] sm:$0xff]  ;;  %v5030_v29 = vld [vmem:[%s7624_s2 + $0xb0] sm:$0xff] }
 0x341   :  { %v4503_v31 = vpack.c.bf16 %v606_v5, %v605_v27  ;;  %1647 = vrot.lane.b32.xlu1 %v1570_v34, %s5090_s11  ;;  %v1577_v21 = vmul.f32 -2.0, %v5029_v19  ;;  %v5031_v34 = vld [vmem:[%s7625_s3 + $0xa8] sm:$0xff]  ;;  %v5032_v27 = vld [vmem:[%s7624_s2 + $0xb8] sm:$0xff] }
 0x342   :  { %v1578_v5 = vmul.f32 -2.0, %v5031_v34  ;;  %v7847_v34 = vld [vmem:[#allocation63_spill] sm:$0xff] }
 0x343   :  { %4505 = vmatpush3.bf16.xpose.msk.msra.mxu0 %vm5386_vm4, %v4503_v31  ;;  %302 = vrot.lane.b32.xlu0 %v224_v40, %s5090_s11  ;;  %v232_v40 = vmul.f32 -2.0, %v5030_v29  ;;  %v233_v31 = vmul.f32 -2.0, %v5032_v27  ;;  %v7846_v29 = vld [vmem:[#allocation61_spill] sm:$0xff]  ;;  %v593_v27 = vsel %vm370_vm2, 1.0, %v6106_v39 }
 0x344   :  { %v4688_v14 = vpop.permute.xlu1 %4687 }
 0x345   :  { %v4690_v35 = vunpack.i.h.bf16 %v4688_v14  ;;  %v4689_v16 = vunpack.i.l.bf16 %v4688_v14  ;;  %1649 = vrot.lane.b32.xlu1 %v1571_v36, %s5090_s11  ;;  %v234_v14 = vmul.f32 -2.0, %v5531_v48  ;;  %v236_v48 = vmul.f32 -2.0, %v5655_v42 }
 0x346   :  { %v238_v42 = vmul.f32 -2.0, %v5779_v45  ;;  %v591_v45 = vsel %vm370_vm2, 1.0, %v5938_v23 }
 0x347   :  { %304 = vrot.lane.b32.xlu0 %v225_v1, %s5090_s11  ;;  %v1951_v54 = vsel %vm113_vm1, %v1919_v24, %v4689_v16  ;;  %v1952_v11 = vsel %vm113_vm1, %v1920_v22, %v4690_v35  ;;  %v5033_v1 = vld [vmem:[%s7625_s3 + $0xb0] sm:$0xff]  ;;  %v5034_v35 = vld [vmem:[%s7625_s3 + $0xb8] sm:$0xff]  ;;  %v1582_v22 = vmul.f32 -2.0, %v5554_v6  ;;  %v1584_v6 = vmul.f32 -2.0, %v5678_v46 }
 0x348   :  { %v4551_v20 = vpack.c.bf16 %v1952_v11, %v1951_v54  ;;  %v1579_v36 = vmul.f32 -2.0, %v5033_v1  ;;  %v1580_v16 = vmul.f32 -2.0, %v5034_v35  ;;  %v592_v46 = vsel %vm370_vm2, 1.0, %v5940_v18 }
 0x349   :  { %1651 = vrot.lane.b32.xlu1 %v1572_v13, %s5090_s11 }
 0x34a   :  { %4553 = vmatpush3.bf16.xpose.msk.msra.mxu1 %vm5396_vm5, %v4551_v20  ;;  %v1585_v20 = vmul.f32 -2.0, %v5793_v17 }
 0x34b   :  { %306 = vrot.lane.b32.xlu0 %v226_v9, %s5090_s11  ;;  %v1581_v9 = vmul.f32 -2.0, %v5545_v63  ;;  %v1583_v63 = vmul.f32 -2.0, %v5669_v0 }
 0x34d   :  { %1653 = vrot.lane.b32.xlu1 %v1573_v30, %s5090_s11 }
 0x34f   :  { %308 = vrot.lane.b32.xlu0 %v227_v2, %s5090_s11 }
 0x351   :  { %1655 = vrot.lane.b32.xlu1 %v1574_v47, %s5090_s11 }
 0x353   :  { %310 = vrot.lane.b32.xlu0 %v228_v7, %s5090_s11  ;;  %v7844_v7 = vld [vmem:[#allocation60_spill] sm:$0xff] }
 0x354   :  { %v1937_v8 = vsel %vm370_vm2, 1.0, %v7844_v7 }
 0x355   :  { %1657 = vrot.lane.b32.xlu1 %v1575_v41, %s5090_s11  ;;  %v240_v41 = vmul.f32 -2.0, %v7845_v60 }
 0x357   :  { %312 = vrot.lane.b32.xlu0 %v229_v58, %s5090_s11 }
 0x359   :  { %1659 = vrot.lane.b32.xlu1 %v1576_v25, %s5090_s11 }
 0x35b   :  { %314 = vrot.lane.b32.xlu0 %v230_v38, %s5090_s11 }
 0x35d   :  { %1661 = vrot.lane.b32.xlu1 %v1577_v21, %s5090_s11 }
 0x35f   :  { %316 = vrot.lane.b32.xlu0 %v231_v32, %s5090_s11 }
 0x361   :  { %1663 = vrot.lane.b32.xlu1 %v1578_v5, %s5090_s11  ;;  %v576_v5 = vsel %vm370_vm2, 1.0, %v7847_v34 }
 0x363   :  { %318 = vrot.lane.b32.xlu0 %v232_v40, %s5090_s11  ;;  %v575_v40 = vsel %vm370_vm2, 1.0, %v7846_v29 }
 0x365   :  { %1665 = vrot.lane.b32.xlu1 %v1579_v36, %s5090_s11 }
 0x367   :  { %320 = vrot.lane.b32.xlu0 %v233_v31, %s5090_s11  ;;  %v594_v31 = vsel %vm370_vm2, 1.0, %v6108_v56 }
 0x369   :  { %1667 = vrot.lane.b32.xlu1 %v1580_v16, %s5090_s11  ;;  %v7848_v16 = vld [vmem:[#allocation52_spill] sm:$0xff] }
 0x36b   :  { %322 = vrot.lane.b32.xlu0 %v234_v14, %s5090_s11 }
 0x36d   :  { %1669 = vrot.lane.b32.xlu1 %v1581_v9, %s5090_s11  ;;  %v7849_v9 = vld [vmem:[#allocation57_spill] sm:$0xff] }
 0x36e   :  { %v6214_v24 = vpop.xlane.xlu0 %157 }
 0x36f   :  { %324 = vrot.lane.b32.xlu0 %v235_v43, %s5090_s11  ;;  %v1586_v43 = vmul.f32 -2.0, %v7848_v16 }
 0x371   :  { %1671 = vrot.lane.b32.xlu1 %v1582_v22, %s5090_s11 }
 0x372   :  { %v6220_v13 = vpop.xlane.xlu0 %1504 }
 0x373   :  { %326 = vrot.lane.b32.xlu0 %v236_v48, %s5090_s11  ;;  %v241_v48 = vmul.f32 -2.0, %v7849_v9 }
 0x375   :  { %v6226_v54 = vpop.xlane.xlu1 %160  ;;  %1673 = vrot.lane.b32.xlu1 %v1583_v63, %s5090_s11 }
 0x376   :  { %v6228_v11 = vpop.xlane.xlu0 %1507 }
 0x377   :  { %328 = vrot.lane.b32.xlu0 %v237_v51, %s5090_s11  ;;  %v1924_v9 = vsel %vm370_vm2, 1.0, %v6228_v11 }
 0x379   :  { %v4698_v26 = vpop.permute.xlu1 %4697  ;;  %1675 = vrot.lane.b32.xlu1 %v1584_v6, %s5090_s11 }
 0x37a   :  { %v4693_v0 = vpop.permute.xlu0 %4692  ;;  %v4700_v2 = vunpack.i.h.bf16 %v4698_v26  ;;  %v4699_v62 = vunpack.i.l.bf16 %v4698_v26 }
 0x37b   :  { %v4695_v30 = vunpack.i.h.bf16 %v4693_v0  ;;  %v4694_v4 = vunpack.i.l.bf16 %v4693_v0  ;;  %330 = vrot.lane.b32.xlu0 %v238_v42, %s5090_s11 }
 0x37c   :  { %v1970_v17 = vsel %vm113_vm1, %v1938_v15, %v4700_v2  ;;  %v1969_v47 = vsel %vm113_vm1, %v1937_v8, %v4699_v62  ;;  %v7850_v2 = vld [vmem:[#allocation62_spill] sm:$0xff]  ;;  %v7852_v8 = vld [vmem:[#allocation17_spill] sm:$0xff] }
 0x37d   :  { %v624_v50 = vsel %vm113_vm1, %v592_v46, %v4695_v30  ;;  %v623_v58 = vsel %vm113_vm1, %v591_v45, %v4694_v4  ;;  %v4554_v53 = vpack.c.bf16 %v1970_v17, %v1969_v47  ;;  %v4703_v12 = vpop.permute.xlu1 %4702  ;;  %1677 = vrot.lane.b32.xlu1 %v1585_v20, %s5090_s11  ;;  %v1921_v62 = vsel %vm370_vm2, 1.0, %v7850_v2  ;;  %v7851_v30 = vld [vmem:[#allocation64_spill] sm:$0xff]  ;;  %v7853_v17 = vld [vmem:[#allocation58_spill] sm:$0xff] }
 0x37e   :  { %v4506_v38 = vpack.c.bf16 %v624_v50, %v623_v58  ;;  %v4713_v25 = vpop.permute.xlu0 %4712  ;;  %v4705_v10 = vunpack.i.h.bf16 %v4703_v12  ;;  %v4704_v32 = vunpack.i.l.bf16 %v4703_v12  ;;  %v1922_v20 = vsel %vm370_vm2, 1.0, %v7851_v30 }
 0x37f   :  { %v4715_v19 = vunpack.i.h.bf16 %v4713_v25  ;;  %v4714_v21 = vunpack.i.l.bf16 %v4713_v25  ;;  %332 = vrot.lane.b32.xlu0 %v239_v37, %s5090_s11  ;;  %4556 = vmatprep.subr.msk.bf16.mxu1 %vm5396_vm5, %v4554_v53  ;;  %v578_v4 = vsel %vm370_vm2, 1.0, %v6226_v54  ;;  %v371_v15 = vsel %vm370_vm2, %v7852_v8, 1.0  ;;  %v7858_v8 = vld [vmem:[#allocation25_spill] sm:$0xff] }
 0x380   :  { %4508 = vmatprep.subr.msk.bf16.mxu0 %vm5386_vm4, %v4506_v38  ;;  %v608_v1 = vsel %vm113_vm1, %v576_v5, %v4705_v10  ;;  %v607_v36 = vsel %vm113_vm1, %v575_v40, %v4704_v32  ;;  %v1587_v47 = vmul.f32 -2.0, %v7853_v17  ;;  %v577_v50 = vsel %vm370_vm2, 1.0, %v6214_v24  ;;  %v7854_v5 = vld [vmem:[#allocation59_spill] sm:$0xff] }
 0x381   :  { %v626_v14 = vsel %vm113_vm1, %v594_v31, %v4715_v19  ;;  %v625_v35 = vsel %vm113_vm1, %v593_v27, %v4714_v21  ;;  %v4509_v22 = vpack.c.bf16 %v608_v1, %v607_v36  ;;  %v4708_v63 = vpop.permute.xlu1 %4707  ;;  %1679 = vrot.lane.b32.xlu1 %v1586_v43, %s5090_s11  ;;  %v1939_v32 = vsel %vm370_vm2, 1.0, %v6114_v61 }
 0x382   :  { %v4512_v51 = vpack.c.bf16 %v626_v14, %v625_v35  ;;  %v4723_v42 = vpop.permute.xlu0 %4722  ;;  %v4710_v6 = vunpack.i.h.bf16 %v4708_v63  ;;  %v4709_v37 = vunpack.i.l.bf16 %v4708_v63  ;;  %v1940_v19 = vsel %vm370_vm2, 1.0, %v6126_v33 }
 0x383   :  { %v4725_v26 = vunpack.i.h.bf16 %v4723_v42  ;;  %v4724_v0 = vunpack.i.l.bf16 %v4723_v42  ;;  %334 = vrot.lane.b32.xlu0 %v240_v41, %s5090_s11  ;;  %4511 = vmatpush3.bf16.xpose.msk.msra.mxu0 %vm5386_vm4, %v4509_v22  ;;  %v1588_v27 = vmul.f32 -2.0, %v7854_v5  ;;  %v1923_v43 = vsel %vm370_vm2, 1.0, %v6220_v13 }
 0x384   :  { %v1953_v45 = vsel %vm113_vm1, %v1921_v62, %v4709_v37  ;;  %v1954_v46 = vsel %vm113_vm1, %v1922_v20, %v4710_v6  ;;  %4514 = vmatprep.subr.msk.bf16.mxu0 %vm5386_vm4, %v4512_v51  ;;  %v7855_v6 = vld [vmem:[#allocation19_spill] sm:$0xff] }
 0x385   :  { %v4557_v58 = vpack.c.bf16 %v1954_v46, %v1953_v45  ;;  %v610_v60 = vsel %vm113_vm1, %v578_v4, %v4725_v26  ;;  %v4718_v41 = vpop.permute.xlu1 %4717  ;;  %v609_v38 = vsel %vm113_vm1, %v577_v50, %v4724_v0  ;;  %1681 = vrot.lane.b32.xlu1 %v1587_v47, %s5090_s11  ;;  %v1717_v37 = vsel %vm370_vm2, %v7855_v6, 1.0  ;;  %v7857_v45 = vld [vmem:[#allocation18_spill] sm:$0xff] }
 0x386   :  { %v275_v53 = vpop.permute.xlu0 %274  ;;  %v4720_v12 = vunpack.i.h.bf16 %v4718_v41  ;;  %v4719_v25 = vunpack.i.l.bf16 %v4718_v41  ;;  %v4515_v31 = vpack.c.bf16 %v610_v60, %v609_v38  ;;  %v372_v0 = vsel %vm370_vm2, %v7856_v44, 1.0  ;;  %v7860_v41 = vld [vmem:[#allocation27_spill] sm:$0xff] }
 0x387   :  { %v403_v10 = vsel %vm113_vm1, %v371_v15, %v275_v53  ;;  %336 = vrot.lane.b32.xlu0 %v241_v48, %s5090_s11  ;;  %4559 = vmatpush3.bf16.xpose.msk.msra.mxu1 %vm5396_vm5, %v4557_v58  ;;  %v1718_v46 = vsel %vm370_vm2, %v7857_v45, 1.0  ;;  %v373_v15 = vsel %vm370_vm2, %v7858_v8, 1.0  ;;  %v7859_v58 = vld [vmem:[#allocation24_spill] sm:$0xff]  ;;  %v1719_v53 = vsel %vm370_vm2, %v7860_v41, 1.0 }
 0x388   :  { %4310 = vmatprep.mubr.msk.f32.mxu0 %vm627_vm0, %v403_v10  ;;  %v1972_v21 = vsel %vm113_vm1, %v1940_v19, %v4720_v12  ;;  %v1971_v40 = vsel %vm113_vm1, %v1939_v32, %v4719_v25  ;;  %v374_v60 = vsel %vm370_vm2, %v7859_v58, 1.0  ;;  %v7861_v32 = vld [vmem:[#allocation26_spill] sm:$0xff] }
 0x389   :  { %v4560_v1 = vpack.c.bf16 %v1972_v21, %v1971_v40  ;;  %v4728_v36 = vpop.permute.xlu1 %4727  ;;  %1683 = vrot.lane.b32.xlu1 %v1588_v27, %s5090_s11  ;;  %v1720_v19 = vsel %vm370_vm2, %v7861_v32, 1.0  ;;  %v7862_v21 = vld [vmem:[#allocation32_spill] sm:$0xff]  ;;  %s4260_s11 = sld [smem:[#allocation3 + $0x1]] }
 0x38a   :  { %v277_v14 = vpop.permute.xlu0 %276  ;;  %v4730_v35 = vunpack.i.h.bf16 %v4728_v36  ;;  %v4729_v16 = vunpack.i.l.bf16 %v4728_v36  ;;  %v375_v40 = vsel %vm370_vm2, %v7862_v21, 1.0  ;;  %v7863_v36 = vld [vmem:[#allocation33_spill] sm:$0xff] }
 0x38b   :  { %4517 = vmatpush3.bf16.xpose.msk.msra.mxu0 %vm5386_vm4, %v4515_v31  ;;  %4562 = vmatprep.subr.msk.bf16.mxu1 %vm5396_vm5, %v4560_v1  ;;  %v404_v4 = vsel %vm113_vm1, %v372_v0, %v277_v14  ;;  %v1721_v14 = vsel %vm370_vm2, %v7863_v36, 1.0 }
 0x38c   :  { %v1955_v48 = vsel %vm113_vm1, %v1923_v43, %v4729_v16  ;;  %v1956_v22 = vsel %vm113_vm1, %v1924_v9, %v4730_v35  ;;  %v7864_v35 = vld [vmem:[#allocation34_spill] sm:$0xff] }
 0x38d   :  { %v4563_v51 = vpack.c.bf16 %v1956_v22, %v1955_v48  ;;  %v1622_v63 = vpop.permute.xlu1 %1621  ;;  %v376_v16 = vsel %vm370_vm2, %v7864_v35, 1.0 }
 0x38e   :  { %v279_v42 = vpop.permute.xlu0 %278  ;;  %v1749_v26 = vsel %vm113_vm1, %v1717_v37, %v1622_v63 }
 0x38f   :  { %4406 = vmatprep.mubr.msk.f32.mxu1 %vm1973_vm3, %v1749_v26  ;;  %4565 = vmatpush3.bf16.xpose.msk.msra.mxu1 %vm5396_vm5, %v4563_v51  ;;  %v405_v47 = vsel %vm113_vm1, %v373_v15, %v279_v42  ;;  %v7865_v51 = vld [vmem:[#allocation35_spill] sm:$0xff]  ;;  %v7866_v42 = vld [vmem:[#allocation40_spill] sm:$0xff] }
 0x390   :  { %v1722_v63 = vsel %vm370_vm2, %v7865_v51, 1.0  ;;  %v377_v6 = vsel %vm370_vm2, %v7866_v42, 1.0 }
 0x391   :  { %v1624_v62 = vpop.permute.xlu1 %1623 }
 0x392   :  { %v281_v20 = vpop.permute.xlu0 %280  ;;  %4311 = vmatmul.mubr.msk.f32.vlgmr.msra.gmra.mrb[0].mxu0 %vm627_vm0, %v403_v10  ;;  %v1750_v50 = vsel %vm113_vm1, %v1718_v46, %v1624_v62  ;;  %v7867_v62 = vld [vmem:[#allocation41_spill] sm:$0xff] }
 0x393   :  { %4312 = vmatprep.mubr.msk.f32.mxu0 %vm627_vm0, %v404_v4  ;;  %v406_v25 = vsel %vm113_vm1, %v374_v60, %v281_v20  ;;  %v1723_v20 = vsel %vm370_vm2, %v7867_v62, 1.0 }
 0x395   :  { %v1626_v17 = vpop.permute.xlu1 %1625 }
 0x396   :  { %v283_v49 = vpop.permute.xlu0 %282  ;;  %4313 = vmatmul.mubr.msk.f32.gmra.mrb[2].mxu0 %vm627_vm0, %v404_v4  ;;  %4407 = vmatmul.mubr.msk.f32.vlgmr.msra.gmra.mrb[0].mxu1 %vm1973_vm3, %v1749_v26  ;;  %v1751_v10 = vsel %vm113_vm1, %v1719_v53, %v1626_v17  ;;  %v7868_v4 = vld [vmem:[#allocation42_spill] sm:$0xff] }
 0x397   :  { %4314 = vmatprep.mubr.msk.f32.mxu0 %vm627_vm0, %v405_v47  ;;  %4408 = vmatprep.mubr.msk.f32.mxu1 %vm1973_vm3, %v1750_v50  ;;  %v407_v31 = vsel %vm113_vm1, %v375_v40, %v283_v49  ;;  %v378_v45 = vsel %vm370_vm2, %v7868_v4, 1.0  ;;  %v7869_v49 = vld [vmem:[#allocation43_spill] sm:$0xff] }
 0x399   :  { %v1628_v38 = vpop.permute.xlu1 %1627 }
 0x39a   :  { %v285_v12 = vpop.permute.xlu0 %284  ;;  %4315 = vmatmul.mubr.msk.f32.gmra.mrb[4].mxu0 %vm627_vm0, %v405_v47  ;;  %4409 = vmatmul.mubr.msk.f32.gmra.mrb[2].mxu1 %vm1973_vm3, %v1750_v50  ;;  %v1752_v1 = vsel %vm113_vm1, %v1720_v19, %v1628_v38  ;;  %v1724_v47 = vsel %vm370_vm2, %v7869_v49, 1.0  ;;  %v7870_v50 = vld [vmem:[#allocation48_spill] sm:$0xff] }
 0x39b   :  { %4316 = vmatprep.mubr.msk.f32.mxu0 %vm627_vm0, %v406_v25  ;;  %4410 = vmatprep.mubr.msk.f32.mxu1 %vm1973_vm3, %v1751_v10  ;;  %v408_v48 = vsel %vm113_vm1, %v376_v16, %v285_v12  ;;  %v379_v58 = vsel %vm370_vm2, %v7870_v50, 1.0  ;;  %v7871_v12 = vld [vmem:[#allocation49_spill] sm:$0xff] }
 0x39d   :  { %v1630_v5 = vpop.permute.xlu1 %1629 }
 0x39e   :  { %v287_v27 = vpop.permute.xlu0 %286  ;;  %4317 = vmatmul.mubr.msk.f32.gmra.mrb[6].mxu0 %vm627_vm0, %v406_v25  ;;  %4411 = vmatmul.mubr.msk.f32.gmra.mrb[4].mxu1 %vm1973_vm3, %v1751_v10  ;;  %v1753_v22 = vsel %vm113_vm1, %v1721_v14, %v1630_v5  ;;  %v1725_v25 = vsel %vm370_vm2, %v7871_v12, 1.0  ;;  %v7872_v10 = vld [vmem:[#allocation50_spill] sm:$0xff]  ;;  %v7876_v12 = vld [vmem:[#allocation15_spill] sm:$0xff] }
 0x39f   :  { %4318 = vmatprep.mubr.msk.f32.mxu0 %vm627_vm0, %v407_v31  ;;  %4412 = vmatprep.mubr.msk.f32.mxu1 %vm1973_vm3, %v1752_v1  ;;  %v409_v44 = vsel %vm113_vm1, %v377_v6, %v287_v27  ;;  %v380_v32 = vsel %vm370_vm2, %v7872_v10, 1.0  ;;  %v7873_v27 = vld [vmem:[#allocation51_spill] sm:$0xff] }
 0x3a1   :  { %v1632_v43 = vpop.permute.xlu1 %1631 }
 0x3a2   :  { %v289_v9 = vpop.permute.xlu0 %288  ;;  %4319 = vmatmul.mubr.msk.f32.gmra.mrb[8].mxu0 %vm627_vm0, %v407_v31  ;;  %4413 = vmatmul.mubr.msk.f32.gmra.mrb[6].mxu1 %vm1973_vm3, %v1752_v1  ;;  %v1754_v0 = vsel %vm113_vm1, %v1722_v63, %v1632_v43  ;;  %v1726_v31 = vsel %vm370_vm2, %v7873_v27, 1.0  ;;  %v381_v1 = vsel %vm370_vm2, %v5875_v28, 1.0  ;;  %v1727_v43 = vsel %vm370_vm2, %v5878_v57, 1.0 }
 0x3a3   :  { %4320 = vmatprep.mubr.msk.f32.mxu0 %vm627_vm0, %v408_v48  ;;  %4414 = vmatprep.mubr.msk.f32.mxu1 %vm1973_vm3, %v1753_v22  ;;  %v410_v15 = vsel %vm113_vm1, %v378_v45, %v289_v9  ;;  %v382_v28 = vsel %vm370_vm2, %v5880_v52, 1.0  ;;  %v1728_v57 = vsel %vm370_vm2, %v5882_v55, 1.0  ;;  %v383_v52 = vsel %vm370_vm2, %v7846_v29, 1.0 }
 0x3a4   :  { %v1729_v55 = vsel %vm370_vm2, %v7850_v2, 1.0  ;;  %v384_v29 = vsel %vm370_vm2, %v7847_v34, 1.0  ;;  %v1730_v2 = vsel %vm370_vm2, %v7851_v30, 1.0  ;;  %v385_v34 = vsel %vm370_vm2, %v6214_v24, 1.0 }
 0x3a5   :  { %v1634_v37 = vpop.permute.xlu1 %1633  ;;  %v1731_v30 = vsel %vm370_vm2, %v6220_v13, 1.0  ;;  %v386_v24 = vsel %vm370_vm2, %v6226_v54, 1.0  ;;  %v1732_v54 = vsel %vm370_vm2, %v6228_v11, 1.0  ;;  %v388_v11 = vsel %vm370_vm2, %v7876_v12, 1.0 }
 0x3a6   :  { %v291_v26 = vpop.permute.xlu0 %290  ;;  %4321 = vmatmul.mubr.msk.f32.gmra.mrb[10].mxu0 %vm627_vm0, %v408_v48  ;;  %4415 = vmatmul.mubr.msk.f32.gmra.mrb[8].mxu1 %vm1973_vm3, %v1753_v22  ;;  %v1755_v17 = vsel %vm113_vm1, %v1723_v20, %v1634_v37 }
 0x3a7   :  { %4322 = vmatprep.mubr.msk.f32.mxu0 %vm627_vm0, %v409_v44  ;;  %4416 = vmatprep.mubr.msk.f32.mxu1 %vm1973_vm3, %v1754_v0  ;;  %v411_v53 = vsel %vm113_vm1, %v379_v58, %v291_v26 }
 0x3a9   :  { %v1636_v46 = vpop.permute.xlu1 %1635 }
 0x3aa   :  { %v293_v8 = vpop.permute.xlu0 %292  ;;  %4323 = vmatmul.mubr.msk.f32.gmra.mrb[12].mxu0 %vm627_vm0, %v409_v44  ;;  %4417 = vmatmul.mubr.msk.f32.gmra.mrb[10].mxu1 %vm1973_vm3, %v1754_v0  ;;  %v1756_v38 = vsel %vm113_vm1, %v1724_v47, %v1636_v46  ;;  %v7874_v47 = vld [vmem:[#allocation13_spill] sm:$0xff] }
 0x3ab   :  { %4324 = vmatprep.mubr.msk.f32.mxu0 %vm627_vm0, %v410_v15  ;;  %4418 = vmatprep.mubr.msk.f32.mxu1 %vm1973_vm3, %v1755_v17  ;;  %v412_v40 = vsel %vm113_vm1, %v380_v32, %v293_v8  ;;  %v387_v13 = vsel %vm370_vm2, %v7874_v47, 1.0  ;;  %v7887_v47 = vld [vmem:[#allocation37_spill] sm:$0xff] }
 0x3ad   :  { %v1638_v60 = vpop.permute.xlu1 %1637 }
 0x3ae   :  { %v295_v41 = vpop.permute.xlu0 %294  ;;  %4325 = vmatmul.mubr.msk.f32.gmra.mrb[14].mxu0 %vm627_vm0, %v410_v15  ;;  %4419 = vmatmul.mubr.msk.f32.gmra.mrb[12].mxu1 %vm1973_vm3, %v1755_v17  ;;  %v1757_v5 = vsel %vm113_vm1, %v1725_v25, %v1638_v60 }
 0x3af   :  { %4326 = vmatprep.mubr.msk.f32.mxu0 %vm627_vm0, %v411_v53  ;;  %4420 = vmatprep.mubr.msk.f32.mxu1 %vm1973_vm3, %v1756_v38  ;;  %v413_v35 = vsel %vm113_vm1, %v381_v1, %v295_v41 }
 0x3b1   :  { %v1640_v19 = vpop.permute.xlu1 %1639 }
 0x3b2   :  { %v297_v21 = vpop.permute.xlu0 %296  ;;  %4327 = vmatmul.mubr.msk.f32.gmra.mrb[16].mxu0 %vm627_vm0, %v411_v53  ;;  %4421 = vmatmul.mubr.msk.f32.gmra.mrb[14].mxu1 %vm1973_vm3, %v1756_v38  ;;  %v1758_v16 = vsel %vm113_vm1, %v1726_v31, %v1640_v19  ;;  %v7875_v53 = vld [vmem:[#allocation12_spill] sm:$0xff] }
 0x3b3   :  { %4328 = vmatprep.mubr.msk.f32.mxu0 %vm627_vm0, %v412_v40  ;;  %4422 = vmatprep.mubr.msk.f32.mxu1 %vm1973_vm3, %v1757_v5  ;;  %v414_v22 = vsel %vm113_vm1, %v382_v28, %v297_v21  ;;  %v1733_v38 = vsel %vm370_vm2, %v7875_v53, 1.0  ;;  %v7877_v21 = vld [vmem:[#allocation14_spill] sm:$0xff] }
 0x3b5   :  { %v1642_v36 = vpop.permute.xlu1 %1641 }
 0x3b6   :  { %v299_v14 = vpop.permute.xlu0 %298  ;;  %4329 = vmatmul.mubr.msk.f32.gmra.mrb[18].mxu0 %vm627_vm0, %v412_v40  ;;  %4423 = vmatmul.mubr.msk.f32.gmra.mrb[16].mxu1 %vm1973_vm3, %v1757_v5  ;;  %v1759_v51 = vsel %vm113_vm1, %v1727_v43, %v1642_v36  ;;  %v1734_v40 = vsel %vm370_vm2, %v7877_v21, 1.0  ;;  %v7878_v5 = vld [vmem:[#allocation21_spill] sm:$0xff]  ;;  %v7880_v43 = vld [vmem:[#allocation23_spill] sm:$0xff] }
 0x3b7   :  { %4330 = vmatprep.mubr.msk.f32.mxu0 %vm627_vm0, %v413_v35  ;;  %4424 = vmatprep.mubr.msk.f32.mxu1 %vm1973_vm3, %v1758_v16  ;;  %v415_v6 = vsel %vm113_vm1, %v383_v52, %v299_v14  ;;  %v389_v27 = vsel %vm370_vm2, %v7878_v5, 1.0  ;;  %v1735_v28 = vsel %vm370_vm2, %v7880_v43, 1.0 }
 0x3b9   :  { %v1644_v9 = vpop.permute.xlu1 %1643 }
 0x3ba   :  { %v301_v48 = vpop.permute.xlu0 %300  ;;  %4331 = vmatmul.mubr.msk.f32.gmra.mrb[20].mxu0 %vm627_vm0, %v413_v35  ;;  %4425 = vmatmul.mubr.msk.f32.gmra.mrb[18].mxu1 %vm1973_vm3, %v1758_v16  ;;  %v1760_v37 = vsel %vm113_vm1, %v1728_v57, %v1644_v9  ;;  %v7879_v35 = vld [vmem:[#allocation20_spill] sm:$0xff]  ;;  %v7881_v57 = vld [vmem:[#allocation22_spill] sm:$0xff] }
 0x3bb   :  { %4332 = vmatprep.mubr.msk.f32.mxu0 %vm627_vm0, %v414_v22  ;;  %4426 = vmatprep.mubr.msk.f32.mxu1 %vm1973_vm3, %v1759_v51  ;;  %v416_v0 = vsel %vm113_vm1, %v384_v29, %v301_v48  ;;  %v390_v16 = vsel %vm370_vm2, %v7879_v35, 1.0  ;;  %v1736_v52 = vsel %vm370_vm2, %v7881_v57, 1.0 }
 0x3bd   :  { %v1646_v63 = vpop.permute.xlu1 %1645 }
 0x3be   :  { %v303_v42 = vpop.permute.xlu0 %302  ;;  %4333 = vmatmul.mubr.msk.f32.gmra.mrb[22].mxu0 %vm627_vm0, %v414_v22  ;;  %4427 = vmatmul.mubr.msk.f32.gmra.mrb[20].mxu1 %vm1973_vm3, %v1759_v51  ;;  %v1761_v62 = vsel %vm113_vm1, %v1729_v55, %v1646_v63  ;;  %v7882_v63 = vld [vmem:[#allocation28_spill] sm:$0xff] }
 0x3bf   :  { %4334 = vmatprep.mubr.msk.f32.mxu0 %vm627_vm0, %v415_v6  ;;  %4428 = vmatprep.mubr.msk.f32.mxu1 %vm1973_vm3, %v1760_v37  ;;  %v417_v45 = vsel %vm113_vm1, %v385_v34, %v303_v42  ;;  %v391_v42 = vsel %vm370_vm2, %v7882_v63, 1.0 }
 0x3c1   :  { %v1648_v26 = vpop.permute.xlu1 %1647 }
 0x3c2   :  { %v305_v44 = vpop.permute.xlu0 %304  ;;  %4335 = vmatmul.mubr.msk.f32.gmra.mrb[24].mxu0 %vm627_vm0, %v415_v6  ;;  %4429 = vmatmul.mubr.msk.f32.gmra.mrb[22].mxu1 %vm1973_vm3, %v1760_v37  ;;  %v1762_v46 = vsel %vm113_vm1, %v1730_v2, %v1648_v26  ;;  %v7883_v26 = vld [vmem:[#allocation29_spill] sm:$0xff] }
 0x3c3   :  { %4336 = vmatprep.mubr.msk.f32.mxu0 %vm627_vm0, %v416_v0  ;;  %4430 = vmatprep.mubr.msk.f32.mxu1 %vm1973_vm3, %v1761_v62  ;;  %v418_v17 = vsel %vm113_vm1, %v386_v24, %v305_v44  ;;  %v392_v44 = vsel %vm370_vm2, %v7883_v26, 1.0 }
 0x3c5   :  { %v1650_v20 = vpop.permute.xlu1 %1649 }
 0x3c6   :  { %v307_v4 = vpop.permute.xlu0 %306  ;;  %4337 = vmatmul.mubr.msk.f32.gmra.mrb[26].mxu0 %vm627_vm0, %v416_v0  ;;  %4431 = vmatmul.mubr.msk.f32.gmra.mrb[24].mxu1 %vm1973_vm3, %v1761_v62  ;;  %v1763_v49 = vsel %vm113_vm1, %v1731_v30, %v1650_v20  ;;  %v7884_v0 = vld [vmem:[#allocation30_spill] sm:$0xff]  ;;  %v7886_v30 = vld [vmem:[#allocation36_spill] sm:$0xff] }
 0x3c7   :  { %4338 = vmatprep.mubr.msk.f32.mxu0 %vm627_vm0, %v417_v45  ;;  %4432 = vmatprep.mubr.msk.f32.mxu1 %vm1973_vm3, %v1762_v46  ;;  %v419_v60 = vsel %vm113_vm1, %v387_v13, %v307_v4  ;;  %v1737_v62 = vsel %vm370_vm2, %v7884_v0, 1.0  ;;  %v393_v24 = vsel %vm370_vm2, %v7886_v30, 1.0  ;;  %v394_v13 = vsel %vm370_vm2, %v7887_v47, 1.0 }
 0x3c8   :  { %v399_v0 = vsel %vm370_vm2, %v5938_v23, 1.0 }
 0x3c9   :  { %v1652_v8 = vpop.permute.xlu1 %1651 }
 0x3ca   :  { %v309_v15 = vpop.permute.xlu0 %308  ;;  %4339 = vmatmul.mubr.msk.f32.gmra.mrb[28].mxu0 %vm627_vm0, %v417_v45  ;;  %4433 = vmatmul.mubr.msk.f32.gmra.mrb[26].mxu1 %vm1973_vm3, %v1762_v46  ;;  %v1764_v41 = vsel %vm113_vm1, %v1732_v54, %v1652_v8  ;;  %v7885_v45 = vld [vmem:[#allocation31_spill] sm:$0xff]  ;;  %v7888_v54 = vld [vmem:[#allocation38_spill] sm:$0xff] }
 0x3cb   :  { %4340 = vmatprep.mubr.msk.f32.mxu0 %vm627_vm0, %v418_v17  ;;  %4434 = vmatprep.mubr.msk.f32.mxu1 %vm1973_vm3, %v1763_v49  ;;  %v420_v32 = vsel %vm113_vm1, %v388_v11, %v309_v15  ;;  %v1738_v46 = vsel %vm370_vm2, %v7885_v45, 1.0  ;;  %v7890_v11 = vld [vmem:[#allocation44_spill] sm:$0xff] }
 0x3cd   :  { %v1654_v50 = vpop.permute.xlu1 %1653 }
 0x3ce   :  { %v311_v58 = vpop.permute.xlu0 %310  ;;  %4341 = vmatmul.mubr.msk.f32.gmra.mrb[30].mxu0 %vm627_vm0, %v418_v17  ;;  %4435 = vmatmul.mubr.msk.f32.gmra.mrb[28].mxu1 %vm1973_vm3, %v1763_v49  ;;  %v1765_v19 = vsel %vm113_vm1, %v1733_v38, %v1654_v50  ;;  %v1739_v50 = vsel %vm370_vm2, %v7888_v54, 1.0  ;;  %v7889_v38 = vld [vmem:[#allocation39_spill] sm:$0xff] }
 0x3cf   :  { %4342 = vmatprep.mubr.msk.f32.mxu0 %vm627_vm0, %v419_v60  ;;  %4436 = vmatprep.mubr.msk.f32.mxu1 %vm1973_vm3, %v1764_v41  ;;  %v421_v36 = vsel %vm113_vm1, %v389_v27, %v311_v58  ;;  %v1740_v12 = vsel %vm370_vm2, %v7889_v38, 1.0  ;;  %v7892_v27 = vld [vmem:[#allocation46_spill] sm:$0xff]  ;;  %v2743_v54 = vld [vmem:[%s7622_s0] sm:$0xf]  ;;  %s2745_s0 = sld [smem:[#allocation3]] }
 0x3d1   :  { %v1656_v25 = vpop.permute.xlu1 %1655 }
 0x3d2   :  { %v313_v10 = vpop.permute.xlu0 %312  ;;  %4343 = vmatmul.mubr.msk.f32.gmra.mrb[32].mxu0 %vm627_vm0, %v419_v60  ;;  %4437 = vmatmul.mubr.msk.f32.gmra.mrb[30].mxu1 %vm1973_vm3, %v1764_v41  ;;  %v1766_v14 = vsel %vm113_vm1, %v1734_v40, %v1656_v25  ;;  %v395_v25 = vsel %vm370_vm2, %v7890_v11, 1.0  ;;  %v7891_v40 = vld [vmem:[#allocation45_spill] sm:$0xff] }
 0x3d3   :  { %4344 = vmatprep.mubr.msk.f32.mxu0 %vm627_vm0, %v420_v32  ;;  %4438 = vmatprep.mubr.msk.f32.mxu1 %vm1973_vm3, %v1765_v19  ;;  %v422_v22 = vsel %vm113_vm1, %v390_v16, %v313_v10  ;;  %v396_v5 = vsel %vm370_vm2, %v7891_v40, 1.0  ;;  %v7893_v16 = vld [vmem:[#allocation47_spill] sm:$0xff] }
 0x3d4   :  { %v1742_v43 = vsel %vm370_vm2, %v7893_v16, 1.0 }
 0x3d5   :  { %v1658_v31 = vpop.permute.xlu1 %1657 }
 0x3d6   :  { %v315_v1 = vpop.permute.xlu0 %314  ;;  %4345 = vmatmul.mubr.msk.f32.gmra.mrb[34].mxu0 %vm627_vm0, %v420_v32  ;;  %4439 = vmatmul.mubr.msk.f32.gmra.mrb[32].mxu1 %vm1973_vm3, %v1765_v19  ;;  %v1767_v51 = vsel %vm113_vm1, %v1735_v28, %v1658_v31  ;;  %v1741_v31 = vsel %vm370_vm2, %v7892_v27, 1.0  ;;  %v7894_v28 = vld [vmem:[#allocation53_spill] sm:$0xff] }
 0x3d7   :  { %4346 = vmatprep.mubr.msk.f32.mxu0 %vm627_vm0, %v421_v36  ;;  %4440 = vmatprep.mubr.msk.f32.mxu1 %vm1973_vm3, %v1766_v14  ;;  %v423_v55 = vsel %vm113_vm1, %v391_v42, %v315_v1  ;;  %v7896_v42 = vld [vmem:[#allocation55_spill] sm:$0xff] }
 0x3d9   :  { %v1660_v9 = vpop.permute.xlu1 %1659 }
 0x3da   :  { %v317_v48 = vpop.permute.xlu0 %316  ;;  %4347 = vmatmul.mubr.msk.f32.gmra.mrb[36].mxu0 %vm627_vm0, %v421_v36  ;;  %4441 = vmatmul.mubr.msk.f32.gmra.mrb[34].mxu1 %vm1973_vm3, %v1766_v14  ;;  %v1768_v29 = vsel %vm113_vm1, %v1736_v52, %v1660_v9  ;;  %v397_v9 = vsel %vm370_vm2, %v7894_v28, 1.0  ;;  %v7895_v52 = vld [vmem:[#allocation54_spill] sm:$0xff] }
 0x3db   :  { %4348 = vmatprep.mubr.msk.f32.mxu0 %vm627_vm0, %v422_v22  ;;  %4442 = vmatprep.mubr.msk.f32.mxu1 %vm1973_vm3, %v1767_v51  ;;  %v424_v20 = vsel %vm113_vm1, %v392_v44, %v317_v48  ;;  %v398_v63 = vsel %vm370_vm2, %v7895_v52, 1.0  ;;  %v1744_v44 = vsel %vm370_vm2, %v5826_v3, 1.0  ;;  %v1745_v3 = vsel %vm370_vm2, %v7844_v7, 1.0 }
 0x3dc   :  { %v401_v7 = vsel %vm370_vm2, %v6106_v39, 1.0  ;;  %v1747_v39 = vsel %vm370_vm2, %v6114_v61, 1.0  ;;  %v2759_v61 = vlaneseq }
 0x3dd   :  { %v1662_v6 = vpop.permute.xlu1 %1661 }
 0x3de   :  { %v319_v37 = vpop.permute.xlu0 %318  ;;  %4349 = vmatmul.mubr.msk.f32.gmra.mrb[38].mxu0 %vm627_vm0, %v422_v22  ;;  %4443 = vmatmul.mubr.msk.f32.gmra.mrb[36].mxu1 %vm1973_vm3, %v1767_v51  ;;  %v1769_v4 = vsel %vm113_vm1, %v1737_v62, %v1662_v6  ;;  %v1743_v6 = vsel %vm370_vm2, %v7896_v42, 1.0 }
 0x3df   :  { %4350 = vmatprep.mubr.msk.f32.mxu0 %vm627_vm0, %v423_v55  ;;  %4444 = vmatprep.mubr.msk.f32.mxu1 %vm1973_vm3, %v1768_v29  ;;  %v425_v17 = vsel %vm113_vm1, %v393_v24, %v319_v37 }
 0x3e1   :  { %v1664_v2 = vpop.permute.xlu1 %1663 }
 0x3e2   :  { %v321_v34 = vpop.permute.xlu0 %320  ;;  %4351 = vmatmul.mubr.msk.f32.gmra.mrb[40].mxu0 %vm627_vm0, %v423_v55  ;;  %4445 = vmatmul.mubr.msk.f32.gmra.mrb[38].mxu1 %vm1973_vm3, %v1768_v29  ;;  %v1770_v49 = vsel %vm113_vm1, %v1738_v46, %v1664_v2 }
 0x3e3   :  { %4352 = vmatprep.mubr.msk.f32.mxu0 %vm627_vm0, %v424_v20  ;;  %4446 = vmatprep.mubr.msk.f32.mxu1 %vm1973_vm3, %v1769_v4  ;;  %v426_v41 = vsel %vm113_vm1, %v394_v13, %v321_v34  ;;  %v1748_v13 = vsel %vm370_vm2, %v6126_v33, 1.0 }
 0x3e5   :  { %v1666_v8 = vpop.permute.xlu1 %1665 }
 0x3e6   :  { %v323_v15 = vpop.permute.xlu0 %322  ;;  %4353 = vmatmul.mubr.msk.f32.gmra.mrb[42].mxu0 %vm627_vm0, %v424_v20  ;;  %4447 = vmatmul.mubr.msk.f32.gmra.mrb[40].mxu1 %vm1973_vm3, %v1769_v4  ;;  %v1771_v53 = vsel %vm113_vm1, %v1739_v50, %v1666_v8  ;;  %v400_v20 = vsel %vm370_vm2, %v5940_v18, 1.0  ;;  %v1746_v18 = vsel %vm370_vm2, %v5950_v59, 1.0  ;;  %v402_v59 = vsel %vm370_vm2, %v6108_v56, 1.0 }
 0x3e7   :  { %4354 = vmatprep.mubr.msk.f32.mxu0 %vm627_vm0, %v425_v17  ;;  %4448 = vmatprep.mubr.msk.f32.mxu1 %vm1973_vm3, %v1770_v49  ;;  %v427_v19 = vsel %vm113_vm1, %v395_v25, %v323_v15  ;;  %v4266_v50 = vrot.slane %v2743_v54, 9 }
 0x3e9   :  { %v1668_v58 = vpop.permute.xlu1 %1667 }
 0x3ea   :  { %v325_v60 = vpop.permute.xlu0 %324  ;;  %4355 = vmatmul.mubr.msk.f32.gmra.mrb[44].mxu0 %vm627_vm0, %v425_v17  ;;  %4449 = vmatmul.mubr.msk.f32.gmra.mrb[42].mxu1 %vm1973_vm3, %v1770_v49  ;;  %v1772_v21 = vsel %vm113_vm1, %v1740_v12, %v1668_v58  ;;  %v2760_v58 = vshrl.u32 %v2759_v61, 7  ;;  %v5091_v12 = vmov 1983009808  }
 0x3eb   :  { %4356 = vmatprep.mubr.msk.f32.mxu0 %vm627_vm0, %v426_v41  ;;  %4450 = vmatprep.mubr.msk.f32.mxu1 %vm1973_vm3, %v1771_v53  ;;  %v428_v14 = vsel %vm113_vm1, %v396_v5, %v325_v60  ;;  %v2757_v60 = vmax.f32 %v2743_v54, %v4266_v50  ;;  %v2781_v11 = vunpack.c.l.s4 %v5091_v12 }
 0x3ec   :  { %v6639_v33 = vsub.s32 2, %v2760_v58 }
 0x3ed   :  { %v1670_v10 = vpop.permute.xlu1 %1669 }
 0x3ee   :  { %v327_v32 = vpop.permute.xlu0 %326  ;;  %4357 = vmatmul.mubr.msk.f32.gmra.mrb[46].mxu0 %vm627_vm0, %v426_v41  ;;  %4451 = vmatmul.mubr.msk.f32.gmra.mrb[44].mxu1 %vm1973_vm3, %v1771_v53  ;;  %v1773_v35 = vsel %vm113_vm1, %v1741_v31, %v1670_v10  ;;  %v6637_v41 = vsub.s32 0, %v2760_v58  ;;  %v2766_v38 = vrot.slane %v2757_v60, %v6639_v33 }
 0x3ef   :  { %4358 = vmatprep.mubr.msk.f32.mxu0 %vm627_vm0, %v427_v19  ;;  %4452 = vmatprep.mubr.msk.f32.mxu1 %vm1973_vm3, %v1772_v21  ;;  %v429_v51 = vsel %vm113_vm1, %v397_v9, %v327_v32  ;;  %v2782_v32 = vunpack.c.0.s8 %v2781_v11 }
 0x3f0   :  { %v2762_v53 = vrot.slane %v2757_v60, %v6637_v41  ;;  %v2776_v10 = vrot.slane %v2766_v38, %v6637_v41 }
 0x3f1   :  { %v1672_v1 = vpop.permute.xlu1 %1671 }
 0x3f2   :  { %v329_v36 = vpop.permute.xlu0 %328  ;;  %4359 = vmatmul.mubr.msk.f32.gmra.mrb[48].mxu0 %vm627_vm0, %v427_v19  ;;  %4453 = vmatmul.mubr.msk.f32.gmra.mrb[46].mxu1 %vm1973_vm3, %v1772_v21  ;;  %v1774_v57 = vsel %vm113_vm1, %v1742_v43, %v1672_v1  ;;  %v2772_v25 = vrot.slane %v2762_v53, %v6637_v41  ;;  %v6645_v21 = vsub.s32 %v2782_v32, %v2760_v58 }
 0x3f3   :  { %4360 = vmatprep.mubr.msk.f32.mxu0 %vm627_vm0, %v428_v14  ;;  %4454 = vmatprep.mubr.msk.f32.mxu1 %vm1973_vm3, %v1773_v35  ;;  %v430_v55 = vsel %vm113_vm1, %v398_v63, %v329_v36 }
 0x3f4   :  { %v2779_v19 = vcombine.low %v2772_v25, %v2776_v10 }
 0x3f5   :  { %v1674_v48 = vpop.permute.xlu1 %1673 }
 0x3f6   :  { %v331_v22 = vpop.permute.xlu0 %330  ;;  %4361 = vmatmul.mubr.msk.f32.gmra.mrb[50].mxu0 %vm627_vm0, %v428_v14  ;;  %4455 = vmatmul.mubr.msk.f32.gmra.mrb[48].mxu1 %vm1973_vm3, %v1773_v35  ;;  %v1775_v29 = vsel %vm113_vm1, %v1743_v6, %v1674_v48  ;;  %v2786_v40 = vrot.slane %v2779_v19, %v6645_v21 }
 0x3f7   :  { %4362 = vmatprep.mubr.msk.f32.mxu0 %vm627_vm0, %v429_v51  ;;  %4456 = vmatprep.mubr.msk.f32.mxu1 %vm1973_vm3, %v1774_v57  ;;  %v431_v2 = vsel %vm113_vm1, %v399_v0, %v331_v22 }
 0x3f8   :  { %v2788_v5 = vsub.f32 %v2743_v54, %v2786_v40 }
 0x3f9   :  { %v1676_v37 = vpop.permute.xlu1 %1675 }
 0x3fa   :  { %4363 = vmatmul.mubr.msk.f32.gmra.mrb[52].mxu0 %vm627_vm0, %v429_v51  ;;  %4457 = vmatmul.mubr.msk.f32.gmra.mrb[50].mxu1 %vm1973_vm3, %v1774_v57  ;;  %v333_v26 = vpop.permute.xlu0 %332  ;;  %v1776_v34 = vsel %vm113_vm1, %v1744_v44, %v1676_v37  ;;  %v2789_v35 = vmul.f32 1.442695, %v2788_v5 }
 0x3fb   :  { %4364 = vmatprep.mubr.msk.f32.mxu0 %vm627_vm0, %v430_v55  ;;  %4458 = vmatprep.mubr.msk.f32.mxu1 %vm1973_vm3, %v1775_v29  ;;  %v432_v45 = vsel %vm113_vm1, %v400_v20, %v333_v26 }
 0x3fc   :  { %4731 = vpow2.f32 %v2789_v35 }
 0x3fd   :  { %v1678_v62 = vpop.permute.xlu1 %1677 }
 0x3fe   :  { %4365 = vmatmul.mubr.msk.f32.gmra.mrb[54].mxu0 %vm627_vm0, %v430_v55  ;;  %4459 = vmatmul.mubr.msk.f32.gmra.mrb[52].mxu1 %vm1973_vm3, %v1775_v29  ;;  %v335_v23 = vpop.permute.xlu0 %334  ;;  %v1777_v46 = vsel %vm113_vm1, %v1745_v3, %v1678_v62 }
 0x3ff   :  { %4366 = vmatprep.mubr.msk.f32.mxu0 %vm627_vm0, %v431_v2  ;;  %4460 = vmatprep.mubr.msk.f32.mxu1 %vm1973_vm3, %v1776_v34  ;;  %v433_v24 = vsel %vm113_vm1, %v401_v7, %v335_v23 }
 0x401   :  { %v1680_v4 = vpop.permute.xlu1 %1679 }
 0x402   :  { %4367 = vmatmul.mubr.msk.f32.gmra.mrb[56].mxu0 %vm627_vm0, %v431_v2  ;;  %4461 = vmatmul.mubr.msk.f32.gmra.mrb[54].mxu1 %vm1973_vm3, %v1776_v34  ;;  %v1778_v8 = vsel %vm113_vm1, %v1746_v18, %v1680_v4  ;;  %v337_v15 = vpop.permute.xlu0 %336 }
 0x403   :  { %4368 = vmatprep.mubr.msk.f32.mxu0 %vm627_vm0, %v432_v45  ;;  %4462 = vmatprep.mubr.msk.f32.mxu1 %vm1973_vm3, %v1777_v46  ;;  %v434_v17 = vsel %vm113_vm1, %v402_v59, %v337_v15 }
 0x405   :  { %v1682_v30 = vpop.permute.xlu1 %1681 }
 0x406   :  { %4369 = vmatmul.mubr.msk.f32.gmra.mrb[58].mxu0 %vm627_vm0, %v432_v45  ;;  %4463 = vmatmul.mubr.msk.f32.gmra.mrb[56].mxu1 %vm1973_vm3, %v1777_v46  ;;  %v1779_v49 = vsel %vm113_vm1, %v1747_v39, %v1682_v30  ;;  %v6648_v12 = vpop.eup %4731 }
 0x407   :  { %4370 = vmatprep.mubr.msk.f32.mxu0 %vm627_vm0, %v433_v24  ;;  %4464 = vmatprep.mubr.msk.f32.mxu1 %vm1973_vm3, %v1778_v8 }
 0x409   :  { %v1684_v47 = vpop.permute.xlu1 %1683 }
 0x40a   :  { %4371 = vmatmul.mubr.msk.f32.gmra.mrb[60].mxu0 %vm627_vm0, %v433_v24  ;;  %4465 = vmatmul.mubr.msk.f32.gmra.mrb[58].mxu1 %vm1973_vm3, %v1778_v8  ;;  %v1780_v56 = vsel %vm113_vm1, %v1748_v13, %v1684_v47 }
 0x40b   :  { %4372 = vmatprep.mubr.msk.f32.mxu0 %vm627_vm0, %v434_v17  ;;  %4466 = vmatprep.mubr.msk.f32.mxu1 %vm1973_vm3, %v1779_v49 }
 0x40e   :  { %4373 = vmatmul.mubr.msk.f32.gmra.mrb[62].mxu0 %vm627_vm0, %v434_v17  ;;  %4467 = vmatmul.mubr.msk.f32.gmra.mrb[60].mxu1 %vm1973_vm3, %v1779_v49 }
 0x40f   :  { %4468 = vmatprep.mubr.msk.f32.mxu1 %vm1973_vm3, %v1780_v56 }
 0x412   :  { %4469 = vmatmul.mubr.msk.f32.gmra.mrb[62].mxu1 %vm1973_vm3, %v1780_v56 }
 0x465   :  { %v886_v27 = vpop.f32.mrb[0].mxu0 }
 0x466   :  { %v1077_v31 = vmax.f32 %v886_v27, 0.0  ;;  %v888_v1 = vpop.f32.mrb[1].mxu0 }
 0x467   :  { %v1078_v36 = vmax.f32 %v888_v1, 0.0 }
 0x468   :  { %v1141_v14 = vsub.f32 0.0, %v1077_v31 }
 0x469   :  { %v1142_v16 = vsub.f32 0.0, %v1078_v36  ;;  %v892_v43 = vpop.f32.mrb[2].mxu0  ;;  %v2232_v28 = vpop.f32.mrb[0].mxu1 }
 0x46a   :  { %v1205_v9 = vmul.f32 1.442695, %v1141_v14  ;;  %v1079_v48 = vmax.f32 %v892_v43, 0.0  ;;  %v2423_v22 = vmax.f32 %v2232_v28, 0.0  ;;  %v894_v51 = vpop.f32.mrb[3].mxu0  ;;  %v2234_v57 = vpop.f32.mrb[1].mxu1 }
 0x46b   :  { %v1207_v52 = vmul.f32 1.442695, %v1142_v16  ;;  %v1080_v63 = vmax.f32 %v894_v51, 0.0  ;;  %v2424_v42 = vmax.f32 %v2234_v57, 0.0 }
 0x46c   :  { %v1143_v6 = vsub.f32 0.0, %v1079_v48  ;;  %v2487_v37 = vsub.f32 0.0, %v2423_v22  ;;  %4733 = vpow2.f32 %v1205_v9 }
 0x46d   :  { %v1144_v55 = vsub.f32 0.0, %v1080_v63  ;;  %v2488_v29 = vsub.f32 0.0, %v2424_v42  ;;  %v898_v26 = vpop.f32.mrb[4].mxu0  ;;  %v2238_v44 = vpop.f32.mrb[2].mxu1  ;;  %4735 = vpow2.f32 %v1207_v52 }
 0x46e   :  { %v1209_v0 = vmul.f32 1.442695, %v1143_v6  ;;  %v2551_v62 = vmul.f32 1.442695, %v2487_v37  ;;  %v1081_v2 = vmax.f32 %v898_v26, 0.0  ;;  %v2425_v34 = vmax.f32 %v2238_v44, 0.0 }
 0x46f   :  { %v1211_v20 = vmul.f32 1.442695, %v1144_v55  ;;  %v2553_v3 = vmul.f32 1.442695, %v2488_v29  ;;  %v900_v23 = vpop.f32.mrb[5].mxu0  ;;  %v2240_v4 = vpop.f32.mrb[3].mxu1 }
 0x470   :  { %4737 = vpow2.f32 %v1209_v0  ;;  %v1145_v45 = vsub.f32 0.0, %v1081_v2  ;;  %v2489_v46 = vsub.f32 0.0, %v2425_v34  ;;  %v1082_v18 = vmax.f32 %v900_v23, 0.0 }
 0x471   :  { %4739 = vpow2.f32 %v2551_v62  ;;  %v2426_v7 = vmax.f32 %v2240_v4, 0.0  ;;  %v904_v30 = vpop.f32.mrb[6].mxu0  ;;  %v2244_v24 = vpop.f32.mrb[4].mxu1 }
 0x472   :  { %4741 = vpow2.f32 %v1211_v20  ;;  %v1213_v8 = vmul.f32 1.442695, %v1145_v45  ;;  %v2555_v15 = vmul.f32 1.442695, %v2489_v46  ;;  %v1146_v59 = vsub.f32 0.0, %v1082_v18  ;;  %v906_v39 = vpop.f32.mrb[7].mxu0 }
 0x473   :  { %4743 = vpow2.f32 %v2553_v3  ;;  %v2490_v17 = vsub.f32 0.0, %v2426_v7  ;;  %v1083_v49 = vmax.f32 %v904_v30, 0.0  ;;  %v2427_v47 = vmax.f32 %v2244_v24, 0.0  ;;  %v2246_v13 = vpop.f32.mrb[5].mxu1 }
 0x474   :  { %4745 = vpow2.f32 %v1213_v8  ;;  %v1215_v56 = vmul.f32 1.442695, %v1146_v59  ;;  %v1084_v61 = vmax.f32 %v906_v39, 0.0  ;;  %v2428_v54 = vmax.f32 %v2246_v13, 0.0 }
 0x475   :  { %4747 = vpow2.f32 %v2555_v15  ;;  %v2557_v50 = vmul.f32 1.442695, %v2490_v17  ;;  %v1147_v58 = vsub.f32 0.0, %v1083_v49  ;;  %v2491_v60 = vsub.f32 0.0, %v2427_v47  ;;  %v910_v53 = vpop.f32.mrb[8].mxu0  ;;  %v2250_v38 = vpop.f32.mrb[6].mxu1 }
 0x476   :  { %4749 = vpow2.f32 %v1215_v56  ;;  %v1148_v11 = vsub.f32 0.0, %v1084_v61  ;;  %v2492_v25 = vsub.f32 0.0, %v2428_v54  ;;  %v1085_v10 = vmax.f32 %v910_v53, 0.0  ;;  %v912_v32 = vpop.f32.mrb[9].mxu0  ;;  %v2252_v19 = vpop.f32.mrb[7].mxu1 }
 0x477   :  { %v6650_v40 = vpop.eup %4733  ;;  %4751 = vpow2.f32 %v2557_v50  ;;  %v1217_v5 = vmul.f32 1.442695, %v1147_v58  ;;  %v2559_v27 = vmul.f32 1.442695, %v2491_v60  ;;  %v2429_v31 = vmax.f32 %v2250_v38, 0.0 }
 0x478   :  { %v1219_v1 = vmul.f32 1.442695, %v1148_v11  ;;  %v2561_v36 = vmul.f32 1.442695, %v2492_v25  ;;  %v1149_v14 = vsub.f32 0.0, %v1085_v10  ;;  %v1086_v35 = vmax.f32 %v912_v32, 0.0  ;;  %v4736_v16 = vpop.eup %4735 }
 0x479   :  { %4753 = vpow2.f32 %v1217_v5  ;;  %v2493_v43 = vsub.f32 0.0, %v2429_v31  ;;  %v2430_v28 = vmax.f32 %v2252_v19, 0.0  ;;  %v916_v9 = vpop.f32.mrb[10].mxu0  ;;  %v2256_v48 = vpop.f32.mrb[8].mxu1 }
 0x47a   :  { %v4738_v51 = vpop.eup %4737  ;;  %4755 = vpow2.f32 %v2559_v27  ;;  %v1221_v57 = vmul.f32 1.442695, %v1149_v14  ;;  %v1150_v52 = vsub.f32 0.0, %v1086_v35  ;;  %v1087_v63 = vmax.f32 %v916_v9, 0.0  ;;  %v918_v42 = vpop.f32.mrb[11].mxu0 }
 0x47b   :  { %v2258_v6 = vpop.f32.mrb[9].mxu1  ;;  %v6653_v37 = vpop.eup %4739  ;;  %4757 = vpow2.f32 %v1219_v1  ;;  %v2563_v55 = vmul.f32 1.442695, %v2493_v43  ;;  %v2494_v29 = vsub.f32 0.0, %v2430_v28  ;;  %v2431_v26 = vmax.f32 %v2256_v48, 0.0 }
 0x47c   :  { %v4742_v44 = vpop.eup %4741  ;;  %4759 = vpow2.f32 %v2561_v36  ;;  %v1223_v0 = vmul.f32 1.442695, %v1150_v52  ;;  %v1151_v62 = vsub.f32 0.0, %v1087_v63  ;;  %v1088_v2 = vmax.f32 %v918_v42, 0.0 }
 0x47d   :  { %v4744_v34 = vpop.eup %4743  ;;  %4761 = vpow2.f32 %v1221_v57  ;;  %v2565_v20 = vmul.f32 1.442695, %v2494_v29  ;;  %v2495_v3 = vsub.f32 0.0, %v2431_v26  ;;  %v2432_v23 = vmax.f32 %v2258_v6, 0.0  ;;  %v922_v4 = vpop.f32.mrb[12].mxu0 }
 0x47e   :  { %v2262_v45 = vpop.f32.mrb[10].mxu1  ;;  %v6655_v46 = vpop.eup %4745  ;;  %4763 = vpow2.f32 %v2563_v55  ;;  %v1225_v18 = vmul.f32 1.442695, %v1151_v62  ;;  %v1152_v7 = vsub.f32 0.0, %v1088_v2  ;;  %v1089_v30 = vmax.f32 %v922_v4, 0.0 }
 0x47f   :  { %v924_v24 = vpop.f32.mrb[13].mxu0  ;;  %v2264_v8 = vpop.f32.mrb[11].mxu1  ;;  %4765 = vpow2.f32 %v1223_v0  ;;  %v2567_v59 = vmul.f32 1.442695, %v2495_v3  ;;  %v2496_v39 = vsub.f32 0.0, %v2432_v23  ;;  %v2433_v17 = vmax.f32 %v2262_v45, 0.0 }
 0x480   :  { %v4748_v15 = vpop.eup %4747  ;;  %4767 = vpow2.f32 %v2565_v20  ;;  %v1227_v47 = vmul.f32 1.442695, %v1152_v7  ;;  %v1153_v13 = vsub.f32 0.0, %v1089_v30  ;;  %v1090_v56 = vmax.f32 %v924_v24, 0.0 }
 0x481   :  { %v6657_v49 = vpop.eup %4749  ;;  %4769 = vpow2.f32 %v1225_v18  ;;  %v2569_v54 = vmul.f32 1.442695, %v2496_v39  ;;  %v2497_v50 = vsub.f32 0.0, %v2433_v17  ;;  %v2434_v58 = vmax.f32 %v2264_v8, 0.0  ;;  %v928_v60 = vpop.f32.mrb[14].mxu0 }
 0x482   :  { %v4752_v61 = vpop.eup %4751  ;;  %v2268_v53 = vpop.f32.mrb[12].mxu1  ;;  %4771 = vpow2.f32 %v2567_v59  ;;  %v1229_v38 = vmul.f32 1.442695, %v1153_v13  ;;  %v1154_v11 = vsub.f32 0.0, %v1090_v56  ;;  %v6659_v25 = vpack.c.bf16 %v4742_v44, %v4736_v16 }
 0x483   :  { %v930_v10 = vpop.f32.mrb[15].mxu0  ;;  %v2270_v32 = vpop.f32.mrb[13].mxu1  ;;  %4773 = vpow2.f32 %v1227_v47  ;;  %v2571_v5 = vmul.f32 1.442695, %v2497_v50  ;;  %v2498_v27 = vsub.f32 0.0, %v2434_v58  ;;  %v6662_v31 = vpack.c.bf16 %v4738_v51, %v6650_v40 }
 0x484   :  { %7897 = vst [vmem:[#allocation60_spill] sm:$0xff] %v6659_v25  ;;  %v4754_v19 = vpop.eup %4753  ;;  %4775 = vpow2.f32 %v2569_v54  ;;  %v1231_v36 = vmul.f32 1.442695, %v1154_v11  ;;  %2905 = vmatprep.subr.bf16.mxu0 %v6659_v25  ;;  %v1091_v14 = vmax.f32 %v928_v60, 0.0  ;;  %v2435_v35 = vmax.f32 %v2268_v53, 0.0 }
 0x485   :  { %v6664_v1 = vpop.eup %4755  ;;  %4777 = vpow2.f32 %v1229_v38  ;;  %v2573_v16 = vmul.f32 1.442695, %v2498_v27  ;;  %2906 = vmatpush1.bf16.msra.mxu0 %v6662_v31  ;;  %v1092_v28 = vmax.f32 %v930_v10, 0.0  ;;  %v2436_v9 = vmax.f32 %v2270_v32, 0.0  ;;  %v934_v48 = vpop.f32.mrb[16].mxu0 }
 0x486   :  { %v4758_v43 = vpop.eup %4757  ;;  %v2274_v57 = vpop.f32.mrb[14].mxu1  ;;  %4779 = vpow2.f32 %v2571_v5  ;;  %v1155_v40 = vsub.f32 0.0, %v1091_v14  ;;  %v2499_v51 = vsub.f32 0.0, %v2435_v35  ;;  %v6668_v63 = vpack.c.bf16 %v4752_v61, %v4744_v34 }
 0x487   :  { %v4760_v52 = vpop.eup %4759  ;;  %v936_v42 = vpop.f32.mrb[17].mxu0  ;;  %4781 = vpow2.f32 %v1231_v36  ;;  %v1156_v29 = vsub.f32 0.0, %v1092_v28  ;;  %v2500_v26 = vsub.f32 0.0, %v2436_v9  ;;  %v6673_v44 = vpack.c.bf16 %v4748_v15, %v6653_v37 }
 0x488   :  { %7898 = vst [vmem:[#allocation56_spill] sm:$0xff] %v6668_v63  ;;  %v2276_v6 = vpop.f32.mrb[15].mxu1  ;;  %v6670_v55 = vpop.eup %4761  ;;  %4783 = vpow2.f32 %v2573_v16  ;;  %v1233_v62 = vmul.f32 1.442695, %v1155_v40  ;;  %v2575_v2 = vmul.f32 1.442695, %v2499_v51  ;;  %2946 = vmatprep.subr.bf16.mxu1 %v6668_v63  ;;  %v6680_v30 = vpack.c.bf16 %v4758_v43, %v6657_v49 }
 0x489   :  { %v4764_v0 = vpop.eup %4763  ;;  %v1093_v20 = vmax.f32 %v934_v48, 0.0  ;;  %v1235_v34 = vmul.f32 1.442695, %v1156_v29  ;;  %v2577_v23 = vmul.f32 1.442695, %v2500_v26  ;;  %2947 = vmatpush1.bf16.msra.mxu1 %v6673_v44  ;;  %v2437_v4 = vmax.f32 %v2274_v57, 0.0 }
 0x48a   :  { %v6676_v3 = vpop.eup %4765  ;;  %v1094_v45 = vmax.f32 %v936_v42, 0.0  ;;  %4785 = vpow2.f32 %v1233_v62  ;;  %v2438_v37 = vmax.f32 %v2276_v6, 0.0  ;;  %v940_v24 = vpop.f32.mrb[18].mxu0  ;;  %v6685_v17 = vpack.c.bf16 %v4754_v19, %v6655_v46  ;;  %2907 = vmatprep.subr.bf16.mxu0 %v6680_v30 }
 0x48b   :  { %v4768_v18 = vpop.eup %4767  ;;  %v1157_v7 = vsub.f32 0.0, %v1093_v20  ;;  %v2280_v8 = vpop.f32.mrb[16].mxu1  ;;  %4787 = vpow2.f32 %v2575_v2  ;;  %v2501_v59 = vsub.f32 0.0, %v2437_v4  ;;  %v1095_v49 = vmax.f32 %v940_v24, 0.0 }
 0x48c   :  { %v6682_v15 = vpop.eup %4769  ;;  %v1158_v39 = vsub.f32 0.0, %v1094_v45  ;;  %v942_v47 = vpop.f32.mrb[19].mxu0  ;;  %4789 = vpow2.f32 %v1235_v34  ;;  %v2502_v54 = vsub.f32 0.0, %v2438_v37  ;;  %2908 = vmatpush1.bf16.msra.mxu0 %v6685_v17  ;;  %v2439_v53 = vmax.f32 %v2280_v8, 0.0 }
 0x48d   :  { %v2282_v13 = vpop.f32.mrb[17].mxu1  ;;  %v6687_v56 = vpop.eup %4771  ;;  %v1237_v61 = vmul.f32 1.442695, %v1157_v7  ;;  %4791 = vpow2.f32 %v2577_v23  ;;  %v2579_v58 = vmul.f32 1.442695, %v2501_v59  ;;  %v1159_v10 = vsub.f32 0.0, %v1095_v49 }
 0x48e   :  { %v4774_v50 = vpop.eup %4773  ;;  %v1239_v60 = vmul.f32 1.442695, %v1158_v39  ;;  %v946_v38 = vpop.f32.mrb[20].mxu0  ;;  %v2581_v11 = vmul.f32 1.442695, %v2502_v54  ;;  %v1096_v32 = vmax.f32 %v942_v47, 0.0  ;;  %v6695_v35 = vpack.c.bf16 %v4768_v18, %v4760_v52 }
 0x48f   :  { %v6691_v46 = vpop.eup %4775  ;;  %4793 = vpow2.f32 %v1237_v61  ;;  %v2286_v19 = vpop.f32.mrb[18].mxu1  ;;  %v2503_v36 = vsub.f32 0.0, %v2439_v53  ;;  %v2440_v14 = vmax.f32 %v2282_v13, 0.0  ;;  %v1241_v28 = vmul.f32 1.442695, %v1159_v10 }
 0x490   :  { %v948_v5 = vpop.f32.mrb[21].mxu0  ;;  %v6693_v27 = vpop.eup %4777  ;;  %4795 = vpow2.f32 %v2579_v58  ;;  %v1160_v9 = vsub.f32 0.0, %v1096_v32  ;;  %v6698_v48 = vpack.c.bf16 %v4764_v0, %v6664_v1  ;;  %2948 = vmatprep.subr.bf16.mxu1 %v6695_v35  ;;  %v1097_v42 = vmax.f32 %v946_v38, 0.0 }
 0x491   :  { %v2288_v43 = vpop.f32.mrb[19].mxu1  ;;  %v4780_v16 = vpop.eup %4779  ;;  %4797 = vpow2.f32 %v1239_v60  ;;  %v2583_v40 = vmul.f32 1.442695, %v2503_v36  ;;  %v2504_v51 = vsub.f32 0.0, %v2440_v14  ;;  %v2441_v62 = vmax.f32 %v2286_v19, 0.0 }
 0x492   :  { %v6700_v57 = vpop.eup %4781  ;;  %4799 = vpow2.f32 %v2581_v11  ;;  %v952_v6 = vpop.f32.mrb[22].mxu0  ;;  %v1243_v26 = vmul.f32 1.442695, %v1160_v9  ;;  %2949 = vmatpush1.bf16.msra.mxu1 %v6698_v48  ;;  %v1098_v2 = vmax.f32 %v948_v5, 0.0  ;;  %v1161_v34 = vsub.f32 0.0, %v1097_v42 }
 0x493   :  { %v2292_v29 = vpop.f32.mrb[20].mxu1  ;;  %v4784_v52 = vpop.eup %4783  ;;  %4801 = vpow2.f32 %v1241_v28  ;;  %v2585_v0 = vmul.f32 1.442695, %v2504_v51  ;;  %v2442_v23 = vmax.f32 %v2288_v43, 0.0  ;;  %v2505_v45 = vsub.f32 0.0, %v2441_v62 }
 0x494   :  { %v954_v20 = vpop.f32.mrb[23].mxu0  ;;  %v2294_v1 = vpop.f32.mrb[21].mxu1  ;;  %4803 = vpow2.f32 %v2583_v40  ;;  %v1162_v18 = vsub.f32 0.0, %v1098_v2  ;;  %v6705_v7 = vpack.c.bf16 %v4774_v50, %v6676_v3  ;;  %v1245_v24 = vmul.f32 1.442695, %v1161_v34 }
 0x495   :  { %v4786_v4 = vpop.eup %4785  ;;  %4805 = vpow2.f32 %v1243_v26  ;;  %v2506_v8 = vsub.f32 0.0, %v2442_v23  ;;  %v6711_v59 = vpack.c.bf16 %v6682_v15, %v6670_v55  ;;  %v958_v39 = vpop.f32.mrb[24].mxu0  ;;  %v2587_v61 = vmul.f32 1.442695, %v2505_v45 }
 0x496   :  { %v6707_v37 = vpop.eup %4787  ;;  %4807 = vpow2.f32 %v2585_v0  ;;  %v2298_v47 = vpop.f32.mrb[22].mxu1  ;;  %v1247_v54 = vmul.f32 1.442695, %v1162_v18  ;;  %2909 = vmatprep.subr.bf16.mxu0 %v6705_v7  ;;  %v1099_v49 = vmax.f32 %v952_v6, 0.0  ;;  %v2443_v58 = vmax.f32 %v2292_v29, 0.0 }
 0x497   :  { %v4790_v13 = vpop.eup %4789  ;;  %4809 = vpow2.f32 %v1245_v24  ;;  %v2589_v50 = vmul.f32 1.442695, %v2506_v8  ;;  %2910 = vmatpush1.bf16.msra.mxu0 %v6711_v59  ;;  %v1100_v60 = vmax.f32 %v954_v20, 0.0  ;;  %v2444_v53 = vmax.f32 %v2294_v1, 0.0  ;;  %v960_v38 = vpop.f32.mrb[25].mxu0 }
 0x498   :  { %v6714_v3 = vpop.eup %4791  ;;  %v2300_v55 = vpop.f32.mrb[23].mxu1  ;;  %4811 = vpow2.f32 %v2587_v61  ;;  %v1163_v11 = vsub.f32 0.0, %v1099_v49  ;;  %v2507_v10 = vsub.f32 0.0, %v2443_v58  ;;  %v6720_v32 = vpack.c.bf16 %v4784_v52, %v6691_v46 }
 0x499   :  { %v6717_v15 = vpop.eup %4793  ;;  %4813 = vpow2.f32 %v1247_v54  ;;  %v1164_v5 = vsub.f32 0.0, %v1100_v60  ;;  %v2508_v36 = vsub.f32 0.0, %v2444_v53  ;;  %v6723_v14 = vpack.c.bf16 %v4780_v16, %v6687_v56  ;;  %v964_v43 = vpop.f32.mrb[26].mxu0 }
 0x49a   :  { %v4796_v19 = vpop.eup %4795  ;;  %v2304_v28 = vpop.f32.mrb[24].mxu1  ;;  %4815 = vpow2.f32 %v2589_v50  ;;  %v1249_v40 = vmul.f32 1.442695, %v1163_v11  ;;  %v2591_v51 = vmul.f32 1.442695, %v2507_v10  ;;  %2950 = vmatprep.subr.bf16.mxu1 %v6720_v32  ;;  %v1101_v42 = vmax.f32 %v958_v39, 0.0 }
 0x49b   :  { %v6725_v9 = vpop.eup %4797  ;;  %v966_v6 = vpop.f32.mrb[27].mxu0  ;;  %v1251_v29 = vmul.f32 1.442695, %v1164_v5  ;;  %v2593_v52 = vmul.f32 1.442695, %v2508_v36  ;;  %2951 = vmatpush1.bf16.msra.mxu1 %v6723_v14  ;;  %v2445_v26 = vmax.f32 %v2298_v47, 0.0  ;;  %v6732_v20 = vpack.c.bf16 %v4790_v13, %v6700_v57 }
 0x49c   :  { %v4800_v46 = vpop.eup %4799  ;;  %v1102_v62 = vmax.f32 %v960_v38, 0.0  ;;  %4817 = vpow2.f32 %v1249_v40  ;;  %v1165_v16 = vsub.f32 0.0, %v1101_v42  ;;  %v2446_v2 = vmax.f32 %v2300_v55, 0.0  ;;  %v2306_v1 = vpop.f32.mrb[25].mxu1 }
 0x49d   :  { %v6729_v56 = vpop.eup %4801  ;;  %4819 = vpow2.f32 %v2591_v51  ;;  %v2509_v34 = vsub.f32 0.0, %v2445_v26  ;;  %v6737_v45 = vpack.c.bf16 %v4786_v4, %v6693_v27  ;;  %v970_v18 = vpop.f32.mrb[28].mxu0  ;;  %2911 = vmatprep.subr.bf16.mxu0 %v6732_v20  ;;  %v1103_v61 = vmax.f32 %v964_v43, 0.0 }
 0x49e   :  { %v6734_v0 = vpop.eup %4803  ;;  %v1166_v23 = vsub.f32 0.0, %v1102_v62  ;;  %v2310_v24 = vpop.f32.mrb[26].mxu1  ;;  %4821 = vpow2.f32 %v1251_v29  ;;  %v1253_v39 = vmul.f32 1.442695, %v1165_v16  ;;  %v2510_v47 = vsub.f32 0.0, %v2446_v2 }
 0x49f   :  { %v4806_v8 = vpop.eup %4805  ;;  %v972_v57 = vpop.f32.mrb[29].mxu0  ;;  %4823 = vpow2.f32 %v2593_v52  ;;  %v2595_v49 = vmul.f32 1.442695, %v2509_v34  ;;  %2912 = vmatpush1.bf16.msra.mxu0 %v6737_v45  ;;  %v2447_v27 = vmax.f32 %v2304_v28, 0.0  ;;  %v1167_v50 = vsub.f32 0.0, %v1103_v61 }
 0x4a0   :  { %v2312_v13 = vpop.f32.mrb[27].mxu1  ;;  %v6740_v54 = vpop.eup %4807  ;;  %v1255_v58 = vmul.f32 1.442695, %v1166_v23  ;;  %4825 = vpow2.f32 %v1253_v39  ;;  %v2597_v4 = vmul.f32 1.442695, %v2510_v47  ;;  %v1104_v60 = vmax.f32 %v966_v6, 0.0 }
 0x4a1   :  { %v6743_v53 = vpop.eup %4809  ;;  %4827 = vpow2.f32 %v2595_v49  ;;  %v2511_v38 = vsub.f32 0.0, %v2447_v27  ;;  %v2448_v55 = vmax.f32 %v2306_v1, 0.0  ;;  %v6746_v11 = vpack.c.bf16 %v4800_v46, %v6714_v3  ;;  %v976_v10 = vpop.f32.mrb[30].mxu0 }
 0x4a2   :  { %v2316_v5 = vpop.f32.mrb[28].mxu1  ;;  %v4812_v36 = vpop.eup %4811  ;;  %4829 = vpow2.f32 %v1255_v58  ;;  %v1257_v43 = vmul.f32 1.442695, %v1167_v50  ;;  %v1168_v40 = vsub.f32 0.0, %v1104_v60  ;;  %v6749_v28 = vpack.c.bf16 %v4796_v19, %v6707_v37 }
 0x4a3   :  { %v978_v51 = vpop.f32.mrb[31].mxu0  ;;  %v2318_v42 = vpop.f32.mrb[29].mxu1  ;;  %4831 = vpow2.f32 %v2597_v4  ;;  %v2599_v29 = vmul.f32 1.442695, %v2511_v38  ;;  %v2512_v52 = vsub.f32 0.0, %v2448_v55  ;;  %2952 = vmatprep.subr.bf16.mxu1 %v6746_v11  ;;  %v1105_v3 = vmax.f32 %v970_v18, 0.0 }
 0x4a4   :  { %v6751_v6 = vpop.eup %4813  ;;  %4833 = vpow2.f32 %v1257_v43  ;;  %v1259_v26 = vmul.f32 1.442695, %v1168_v40  ;;  %2953 = vmatpush1.bf16.msra.mxu1 %v6749_v28  ;;  %v2449_v62 = vmax.f32 %v2310_v24, 0.0  ;;  %v1106_v16 = vmax.f32 %v972_v57, 0.0 }
 0x4a5   :  { %v4816_v46 = vpop.eup %4815  ;;  %4835 = vpow2.f32 %v2599_v29  ;;  %v2601_v37 = vmul.f32 1.442695, %v2512_v52  ;;  %v1169_v19 = vsub.f32 0.0, %v1105_v3  ;;  %v2450_v2 = vmax.f32 %v2312_v13, 0.0  ;;  %v982_v1 = vpop.f32.mrb[32].mxu0 }
 0x4a6   :  { %v2322_v34 = vpop.f32.mrb[30].mxu1  ;;  %v4818_v23 = vpop.eup %4817  ;;  %4837 = vpow2.f32 %v1259_v26  ;;  %v2513_v39 = vsub.f32 0.0, %v2449_v62  ;;  %v1170_v47 = vsub.f32 0.0, %v1106_v16  ;;  %v6756_v61 = vpack.c.bf16 %v4806_v8, %v6725_v9 }
 0x4a7   :  { %v984_v18 = vpop.f32.mrb[33].mxu0  ;;  %v2324_v49 = vpop.f32.mrb[31].mxu1  ;;  %4839 = vpow2.f32 %v2601_v37  ;;  %v1261_v24 = vmul.f32 1.442695, %v1169_v19  ;;  %v2514_v57 = vsub.f32 0.0, %v2450_v2  ;;  %v6762_v27 = vpack.c.bf16 %v6729_v56, %v6717_v15 }
 0x4a8   :  { %v6758_v58 = vpop.eup %4819  ;;  %v2603_v4 = vmul.f32 1.442695, %v2513_v39  ;;  %v1263_v50 = vmul.f32 1.442695, %v1170_v47  ;;  %2913 = vmatprep.subr.bf16.mxu0 %v6756_v61  ;;  %v1107_v60 = vmax.f32 %v976_v10, 0.0  ;;  %v2451_v38 = vmax.f32 %v2316_v5, 0.0 }
 0x4a9   :  { %v4822_v13 = vpop.eup %4821  ;;  %4841 = vpow2.f32 %v1261_v24  ;;  %v2605_v8 = vmul.f32 1.442695, %v2514_v57  ;;  %2914 = vmatpush1.bf16.msra.mxu0 %v6762_v27  ;;  %v1108_v55 = vmax.f32 %v978_v51, 0.0  ;;  %v2452_v43 = vmax.f32 %v2318_v42, 0.0  ;;  %v988_v40 = vpop.f32.mrb[34].mxu0 }
 0x4aa   :  { %v6765_v9 = vpop.eup %4823  ;;  %v2328_v29 = vpop.f32.mrb[32].mxu1  ;;  %4843 = vpow2.f32 %v2603_v4  ;;  %v1171_v15 = vsub.f32 0.0, %v1107_v60  ;;  %v2515_v56 = vsub.f32 0.0, %v2451_v38  ;;  %v6771_v3 = vpack.c.bf16 %v4816_v46, %v6740_v54 }
 0x4ab   :  { %v6768_v52 = vpop.eup %4825  ;;  %v990_v10 = vpop.f32.mrb[35].mxu0  ;;  %4845 = vpow2.f32 %v1263_v50  ;;  %v1172_v62 = vsub.f32 0.0, %v1108_v55  ;;  %v2516_v16 = vsub.f32 0.0, %v2452_v43  ;;  %v6776_v51 = vpack.c.bf16 %v4812_v36, %v6734_v0 }
 0x4ac   :  { %v6773_v5 = vpop.f32.mrb[33].mxu1  ;;  %v4828_v26 = vpop.eup %4827  ;;  %4847 = vpow2.f32 %v2605_v8  ;;  %v1265_v37 = vmul.f32 1.442695, %v1171_v15  ;;  %v2607_v19 = vmul.f32 1.442695, %v2515_v56  ;;  %2954 = vmatprep.subr.bf16.mxu1 %v6771_v3  ;;  %v1109_v2 = vmax.f32 %v982_v1, 0.0 }
 0x4ad   :  { %v6778_v42 = vpop.eup %4829  ;;  %v1267_v46 = vmul.f32 1.442695, %v1172_v62  ;;  %v2609_v39 = vmul.f32 1.442695, %v2516_v16  ;;  %2955 = vmatpush1.bf16.msra.mxu1 %v6776_v51  ;;  %v2453_v47 = vmax.f32 %v2322_v34, 0.0  ;;  %v1110_v24 = vmax.f32 %v984_v18, 0.0 }
 0x4ae   :  { %v4832_v54 = vpop.eup %4831  ;;  %4849 = vpow2.f32 %v1265_v37  ;;  %v1173_v0 = vsub.f32 0.0, %v1109_v2  ;;  %v2454_v36 = vmax.f32 %v2324_v49, 0.0  ;;  %v6785_v4 = vpack.c.bf16 %v4822_v13, %v6751_v6  ;;  %v994_v50 = vpop.f32.mrb[36].mxu0 }
 0x4af   :  { %v6782_v57 = vpop.eup %4833  ;;  %v2334_v60 = vpop.f32.mrb[34].mxu1  ;;  %4851 = vpow2.f32 %v2607_v19  ;;  %v2517_v1 = vsub.f32 0.0, %v2453_v47  ;;  %v1174_v8 = vsub.f32 0.0, %v1110_v24  ;;  %v6790_v55 = vpack.c.bf16 %v4818_v23, %v6743_v53 }
 0x4b0   :  { %7899 = vst [vmem:[#allocation61_spill] sm:$0xff] %v6785_v4  ;;  %v6787_v38 = vpop.eup %4835  ;;  %v996_v34 = vpop.f32.mrb[37].mxu0  ;;  %4853 = vpow2.f32 %v1267_v46  ;;  %v1269_v15 = vmul.f32 1.442695, %v1173_v0  ;;  %v2518_v56 = vsub.f32 0.0, %v2454_v36  ;;  %2915 = vmatprep.subr.bf16.mxu0 %v6785_v4  ;;  %v1111_v6 = vmax.f32 %v988_v40, 0.0 }
 0x4b1   :  { %7900 = vst [vmem:[#allocation63_spill] sm:$0xff] %v6790_v55  ;;  %v2336_v18 = vpop.f32.mrb[35].mxu1  ;;  %v4838_v43 = vpop.eup %4837  ;;  %4855 = vpow2.f32 %v2609_v39  ;;  %v2611_v13 = vmul.f32 1.442695, %v2517_v1  ;;  %v1271_v62 = vmul.f32 1.442695, %v1174_v8  ;;  %2916 = vmatpush1.bf16.msra.mxu0 %v6790_v55  ;;  %v6804_v24 = vpack.c.bf16 %v4832_v54, %v6765_v9 }
 0x4b2   :  { %v6793_v49 = vpop.eup %4839  ;;  %v2455_v16 = vmax.f32 %v2328_v29, 0.0  ;;  %v6796_v37 = vpop.f32.mrb[38].mxu0  ;;  %4857 = vpow2.f32 %v1269_v15  ;;  %v2613_v53 = vmul.f32 1.442695, %v2518_v56  ;;  %v1175_v23 = vsub.f32 0.0, %v1111_v6 }
 0x4b3   :  { %v1112_v19 = vmax.f32 %v990_v10, 0.0  ;;  %v2340_v2 = vpop.f32.mrb[36].mxu1  ;;  %v6798_v46 = vpop.f32.mrb[39].mxu0  ;;  %4859 = vpow2.f32 %v2611_v13  ;;  %v2456_v39 = vmax.f32 %v6773_v5, 0.0  ;;  %7901 = vst [vmem:[#allocation52_spill] sm:$0xff] %v6804_v24  ;;  %v6807_v8 = vpack.c.bf16 %v4828_v26, %v6758_v58  ;;  %2956 = vmatprep.subr.bf16.mxu1 %v6804_v24 }
 0x4b4   :  { %v6800_v47 = vpop.eup %4841  ;;  %v2519_v40 = vsub.f32 0.0, %v2455_v16  ;;  %v2342_v0 = vpop.f32.mrb[37].mxu1  ;;  %4861 = vpow2.f32 %v1271_v62  ;;  %v1273_v36 = vmul.f32 1.442695, %v1175_v23  ;;  %v1113_v6 = vmax.f32 %v994_v50, 0.0 }
 0x4b5   :  { %v4844_v29 = vpop.eup %4843  ;;  %v1176_v1 = vsub.f32 0.0, %v1112_v19  ;;  %7902 = vst [vmem:[#allocation57_spill] sm:$0xff] %v6807_v8  ;;  %4863 = vpow2.f32 %v2613_v53  ;;  %v2520_v56 = vsub.f32 0.0, %v2456_v39  ;;  %v6812_v5 = vpop.f32.mrb[40].mxu0  ;;  %2957 = vmatpush1.bf16.msra.mxu1 %v6807_v8  ;;  %v2457_v62 = vmax.f32 %v2334_v60, 0.0 }
 0x4b6   :  { %v6809_v10 = vpop.eup %4845  ;;  %v2615_v15 = vmul.f32 1.442695, %v2519_v40  ;;  %v6814_v9 = vpop.f32.mrb[38].mxu1  ;;  %4865 = vpow2.f32 %v1273_v36  ;;  %v1114_v58 = vmax.f32 %v996_v34, 0.0  ;;  %v1177_v23 = vsub.f32 0.0, %v1113_v6 }
 0x4b7   :  { %v4848_v54 = vpop.eup %4847  ;;  %v1275_v13 = vmul.f32 1.442695, %v1176_v1  ;;  %v6817_v26 = vpop.f32.mrb[41].mxu0  ;;  %v2617_v53 = vmul.f32 1.442695, %v2520_v56  ;;  %v2458_v19 = vmax.f32 %v2336_v18, 0.0  ;;  %v6822_v22 = vpack.c.bf16 %v4838_v43, %v6778_v42 }
 0x4b8   :  { %v6819_v16 = vpop.f32.mrb[39].mxu1  ;;  %4867 = vpow2.f32 %v2615_v15  ;;  %v4850_v50 = vpop.eup %4849  ;;  %v2521_v40 = vsub.f32 0.0, %v2457_v62  ;;  %v1178_v39 = vsub.f32 0.0, %v1114_v58  ;;  %v1277_v60 = vmul.f32 1.442695, %v1177_v23 }
 0x4b9   :  { %4869 = vpow2.f32 %v1275_v13  ;;  %7903 = vst [vmem:[#allocation62_spill] sm:$0xff] %v6822_v22  ;;  %v6824_v36 = vpop.eup %4851  ;;  %v2522_v34 = vsub.f32 0.0, %v2458_v19  ;;  %v6828_v1 = vpack.c.bf16 %v6782_v57, %v6768_v52  ;;  %v6830_v15 = vpop.f32.mrb[42].mxu0  ;;  %2917 = vmatprep.subr.bf16.mxu0 %v6822_v22  ;;  %v1115_v42 = vmax.f32 %v6796_v37, 0.0 }
 0x4ba   :  { %4871 = vpow2.f32 %v2617_v53  ;;  %v6832_v56 = vpop.f32.mrb[40].mxu1  ;;  %v4854_v18 = vpop.eup %4853  ;;  %v2619_v6 = vmul.f32 1.442695, %v2521_v40  ;;  %v1279_v13 = vmul.f32 1.442695, %v1178_v39  ;;  %v2459_v43 = vmax.f32 %v2340_v2, 0.0 }
 0x4bb   :  { %7904 = vst [vmem:[#allocation64_spill] sm:$0xff] %v6828_v1  ;;  %v6836_v62 = vpop.eup %4855  ;;  %4873 = vpow2.f32 %v1277_v60  ;;  %v2621_v58 = vmul.f32 1.442695, %v2522_v34  ;;  %2918 = vmatpush1.bf16.msra.mxu0 %v6828_v1  ;;  %v1116_v52 = vmax.f32 %v6798_v46, 0.0  ;;  %v2460_v57 = vmax.f32 %v2342_v0, 0.0  ;;  %v6840_v53 = vpop.f32.mrb[43].mxu0 }
 0x4bc   :  { %v6842_v23 = vpop.f32.mrb[41].mxu1  ;;  %v6844_v19 = vpop.eup %4857  ;;  %4875 = vpow2.f32 %v2619_v6  ;;  %v1179_v40 = vsub.f32 0.0, %v1115_v42  ;;  %v2523_v39 = vsub.f32 0.0, %v2459_v43  ;;  %v6847_v37 = vpack.c.bf16 %v4848_v54, %v6793_v49 }
 0x4bd   :  { %v4860_v2 = vpop.eup %4859  ;;  %4877 = vpow2.f32 %v1279_v13  ;;  %v1180_v60 = vsub.f32 0.0, %v1116_v52  ;;  %v2524_v34 = vsub.f32 0.0, %v2460_v57  ;;  %v6850_v1 = vpack.c.bf16 %v4844_v29, %v6787_v38  ;;  %v6852_v46 = vpop.f32.mrb[44].mxu0 }
 0x4be   :  { %7905 = vst [vmem:[#allocation17_spill] sm:$0xff] %v6847_v37  ;;  %v6854_v0 = vpop.f32.mrb[42].mxu1  ;;  %v6856_v22 = vpop.eup %4861  ;;  %4879 = vpow2.f32 %v2621_v58  ;;  %v1281_v6 = vmul.f32 1.442695, %v1179_v40  ;;  %v2623_v42 = vmul.f32 1.442695, %v2523_v39  ;;  %2958 = vmatprep.subr.bf16.mxu1 %v6847_v37  ;;  %v6869_v39 = vpack.c.bf16 %v4854_v18, %v6809_v10 }
 0x4bf   :  { %7906 = vst [vmem:[#allocation58_spill] sm:$0xff] %v6850_v1  ;;  %v1117_v49 = vmax.f32 %v6812_v5, 0.0  ;;  %v6860_v54 = vpop.f32.mrb[45].mxu0  ;;  %v4864_v13 = vpop.eup %4863  ;;  %v1283_v43 = vmul.f32 1.442695, %v1180_v60  ;;  %2959 = vmatpush1.bf16.msra.mxu1 %v6850_v1  ;;  %v2461_v38 = vmax.f32 %v6814_v9, 0.0  ;;  %v6876_v9 = vpack.c.bf16 %v4850_v50, %v6800_v47 }
 0x4c0   :  { %v2625_v52 = vmul.f32 1.442695, %v2524_v34  ;;  %v1118_v29 = vmax.f32 %v6817_v26, 0.0  ;;  %v6865_v57 = vpop.eup %4865  ;;  %4881 = vpow2.f32 %v1281_v6  ;;  %v2462_v40 = vmax.f32 %v6819_v16, 0.0  ;;  %7907 = vst [vmem:[#allocation59_spill] sm:$0xff] %v6869_v39  ;;  %v6871_v5 = vpop.f32.mrb[43].mxu1  ;;  %2919 = vmatprep.subr.bf16.mxu0 %v6869_v39 }
 0x4c1   :  { %v1181_v58 = vsub.f32 0.0, %v1117_v49  ;;  %4883 = vpow2.f32 %v2623_v42  ;;  %v2525_v60 = vsub.f32 0.0, %v2461_v38  ;;  %7908 = vst [vmem:[#allocation19_spill] sm:$0xff] %v6876_v9  ;;  %v6878_v26 = vpop.f32.mrb[46].mxu0  ;;  %v6880_v1 = vpop.f32.mrb[44].mxu1  ;;  %v1119_v10 = vmax.f32 %v6830_v15, 0.0  ;;  %2920 = vmatpush1.bf16.msra.mxu0 %v6876_v9 }
 0x4c2   :  { %v6873_v37 = vpop.eup %4867  ;;  %v1182_v34 = vsub.f32 0.0, %v1118_v29  ;;  %4885 = vpow2.f32 %v1283_v43  ;;  %v2526_v49 = vsub.f32 0.0, %v2462_v40  ;;  %v6884_v18 = vpop.f32.mrb[47].mxu0  ;;  %v2463_v29 = vmax.f32 %v6832_v56, 0.0 }
 0x4c3   :  { %v4870_v6 = vpop.eup %4869  ;;  %v1285_v16 = vmul.f32 1.442695, %v1181_v58  ;;  %v6886_v42 = vpop.f32.mrb[45].mxu1  ;;  %4887 = vpow2.f32 %v2625_v52  ;;  %v2627_v47 = vmul.f32 1.442695, %v2525_v60  ;;  %v1183_v58 = vsub.f32 0.0, %v1119_v10 }
 0x4c4   :  { %v6888_v38 = vpop.eup %4871  ;;  %v1287_v50 = vmul.f32 1.442695, %v1182_v34  ;;  %v2629_v43 = vmul.f32 1.442695, %v2526_v49  ;;  %v1120_v40 = vmax.f32 %v6840_v53, 0.0  ;;  %v2527_v15 = vsub.f32 0.0, %v2463_v29 }
 0x4c5   :  { %4889 = vpow2.f32 %v1285_v16  ;;  %v6893_v39 = vpop.eup %4873  ;;  %v2464_v8 = vmax.f32 %v6842_v23, 0.0  ;;  %v6897_v55 = vpack.c.bf16 %v4864_v13, %v6836_v62  ;;  %v6899_v52 = vpop.f32.mrb[48].mxu0  ;;  %v1289_v56 = vmul.f32 1.442695, %v1183_v58 }
 0x4c6   :  { %4891 = vpow2.f32 %v2627_v47  ;;  %v6901_v60 = vpop.f32.mrb[46].mxu1  ;;  %v4876_v34 = vpop.eup %4875  ;;  %v1184_v16 = vsub.f32 0.0, %v1120_v40  ;;  %v6904_v49 = vpack.c.bf16 %v4860_v2, %v6824_v36  ;;  %v2631_v62 = vmul.f32 1.442695, %v2527_v15 }
 0x4c7   :  { %7909 = vst [vmem:[#allocation16_spill] sm:$0xff] %v6897_v55  ;;  %4893 = vpow2.f32 %v1287_v50  ;;  %v6906_v53 = vpop.f32.mrb[49].mxu0  ;;  %v6908_v10 = vpop.f32.mrb[47].mxu1  ;;  %v2528_v23 = vsub.f32 0.0, %v2464_v8  ;;  %2960 = vmatprep.subr.bf16.mxu1 %v6897_v55  ;;  %v1121_v13 = vmax.f32 %v6852_v46, 0.0  ;;  %v2465_v36 = vmax.f32 %v6854_v0, 0.0 }
 0x4c8   :  { %7910 = vst [vmem:[#allocation18_spill] sm:$0xff] %v6904_v49  ;;  %v6910_v47 = vpop.eup %4877  ;;  %4895 = vpow2.f32 %v2629_v43  ;;  %v1291_v50 = vmul.f32 1.442695, %v1184_v16  ;;  %2961 = vmatpush1.bf16.msra.mxu1 %v6904_v49  ;;  %v1122_v2 = vmax.f32 %v6860_v54, 0.0  ;;  %v2466_v43 = vmax.f32 %v6871_v5, 0.0 }
 0x4c9   :  { %v4880_v29 = vpop.eup %4879  ;;  %4897 = vpow2.f32 %v1289_v56  ;;  %v2633_v58 = vmul.f32 1.442695, %v2528_v23  ;;  %v1185_v40 = vsub.f32 0.0, %v1121_v13  ;;  %v6918_v15 = vpop.f32.mrb[50].mxu0  ;;  %v2529_v46 = vsub.f32 0.0, %v2465_v36 }
 0x4ca   :  { %4899 = vpow2.f32 %v2631_v62  ;;  %v6920_v8 = vpop.f32.mrb[48].mxu1  ;;  %v4882_v9 = vpop.eup %4881  ;;  %v1186_v56 = vsub.f32 0.0, %v1122_v2  ;;  %v6923_v16 = vpack.c.bf16 %v4870_v6, %v6856_v22  ;;  %v2530_v5 = vsub.f32 0.0, %v2466_v43 }
 0x4cb   :  { %4901 = vpow2.f32 %v1291_v50  ;;  %v6925_v49 = vpop.f32.mrb[51].mxu0  ;;  %v6927_v0 = vpop.f32.mrb[49].mxu1  ;;  %v1293_v62 = vmul.f32 1.442695, %v1185_v40  ;;  %v6933_v23 = vpack.c.bf16 %v6865_v57, %v6844_v19  ;;  %v2635_v50 = vmul.f32 1.442695, %v2529_v46 }
 0x4cc   :  { %7911 = vst [vmem:[#allocation25_spill] sm:$0xff] %v6923_v16  ;;  %v6929_v54 = vpop.eup %4883  ;;  %4903 = vpow2.f32 %v2633_v58  ;;  %v1295_v36 = vmul.f32 1.442695, %v1186_v56  ;;  %2921 = vmatprep.subr.bf16.mxu0 %v6923_v16  ;;  %v1123_v22 = vmax.f32 %v6878_v26, 0.0  ;;  %v2467_v6 = vmax.f32 %v6880_v1, 0.0 }
 0x4cd   :  { %7912 = vst [vmem:[#allocation24_spill] sm:$0xff] %v6933_v23  ;;  %v4886_v13 = vpop.eup %4885  ;;  %4905 = vpow2.f32 %v1293_v62  ;;  %v2637_v55 = vmul.f32 1.442695, %v2530_v5  ;;  %2922 = vmatpush1.bf16.msra.mxu0 %v6933_v23  ;;  %v1124_v58 = vmax.f32 %v6884_v18, 0.0  ;;  %v2468_v19 = vmax.f32 %v6886_v42, 0.0  ;;  %v6943_v57 = vpop.f32.mrb[52].mxu0 }
 0x4ce   :  { %v6938_v2 = vpop.eup %4887  ;;  %v6945_v40 = vpop.f32.mrb[50].mxu1  ;;  %4907 = vpow2.f32 %v2635_v50  ;;  %v1187_v26 = vsub.f32 0.0, %v1123_v22  ;;  %v2531_v46 = vsub.f32 0.0, %v2467_v6  ;;  %v6950_v1 = vpack.c.bf16 %v4880_v29, %v6888_v38 }
 0x4cf   :  { %v6947_v43 = vpop.eup %4889  ;;  %v6952_v56 = vpop.f32.mrb[53].mxu0  ;;  %4909 = vpow2.f32 %v1295_v36  ;;  %v1188_v18 = vsub.f32 0.0, %v1124_v58  ;;  %v2532_v42 = vsub.f32 0.0, %v2468_v19  ;;  %v6957_v23 = vpack.c.bf16 %v4876_v34, %v6873_v37 }
 0x4d0   :  { %7913 = vst [vmem:[#allocation27_spill] sm:$0xff] %v6950_v1  ;;  %v6954_v62 = vpop.f32.mrb[51].mxu1  ;;  %v4892_v5 = vpop.eup %4891  ;;  %4911 = vpow2.f32 %v2637_v55  ;;  %v1297_v50 = vmul.f32 1.442695, %v1187_v26  ;;  %v2639_v22 = vmul.f32 1.442695, %v2531_v46  ;;  %2962 = vmatprep.subr.bf16.mxu1 %v6950_v1  ;;  %v6970_v19 = vpack.c.bf16 %v4886_v13, %v6910_v47 }
 0x4d1   :  { %7914 = vst [vmem:[#allocation26_spill] sm:$0xff] %v6957_v23  ;;  %v6959_v16 = vpop.eup %4893  ;;  %v1125_v38 = vmax.f32 %v6899_v52, 0.0  ;;  %v1299_v6 = vmul.f32 1.442695, %v1188_v18  ;;  %v2641_v24 = vmul.f32 1.442695, %v2532_v42  ;;  %2963 = vmatpush1.bf16.msra.mxu1 %v6957_v23 }
 0x4d2   :  { %v4896_v29 = vpop.eup %4895  ;;  %v2469_v36 = vmax.f32 %v6901_v60, 0.0  ;;  %v1126_v58 = vmax.f32 %v6906_v53, 0.0  ;;  %4913 = vpow2.f32 %v1297_v50  ;;  %v2470_v55 = vmax.f32 %v6908_v10, 0.0  ;;  %7915 = vst [vmem:[#allocation32_spill] sm:$0xff] %v6970_v19  ;;  %v6972_v26 = vpop.f32.mrb[54].mxu0  ;;  %2923 = vmatprep.subr.bf16.mxu0 %v6970_v19 }
 0x4d3   :  { %v6966_v37 = vpop.eup %4897  ;;  %v1189_v34 = vsub.f32 0.0, %v1125_v38  ;;  %v6974_v52 = vpop.f32.mrb[52].mxu1  ;;  %4915 = vpow2.f32 %v2639_v22  ;;  %v6979_v53 = vpack.c.bf16 %v4882_v9, %v6893_v39  ;;  %v1127_v38 = vmax.f32 %v6918_v15, 0.0 }
 0x4d4   :  { %v6976_v46 = vpop.eup %4899  ;;  %v2533_v18 = vsub.f32 0.0, %v2469_v36  ;;  %v1190_v60 = vsub.f32 0.0, %v1126_v58  ;;  %v6981_v42 = vpop.f32.mrb[55].mxu0  ;;  %4917 = vpow2.f32 %v1299_v6  ;;  %v2534_v13 = vsub.f32 0.0, %v2470_v55 }
 0x4d5   :  { %7916 = vst [vmem:[#allocation33_spill] sm:$0xff] %v6979_v53  ;;  %v6983_v50 = vpop.f32.mrb[53].mxu1  ;;  %v4902_v10 = vpop.eup %4901  ;;  %v1301_v47 = vmul.f32 1.442695, %v1189_v34  ;;  %4919 = vpow2.f32 %v2641_v24  ;;  %2924 = vmatpush1.bf16.msra.mxu0 %v6979_v53  ;;  %v2471_v39 = vmax.f32 %v6920_v8, 0.0  ;;  %v1191_v6 = vsub.f32 0.0, %v1127_v38 }
 0x4d6   :  { %v6987_v23 = vpop.eup %4903  ;;  %v2643_v22 = vmul.f32 1.442695, %v2533_v18  ;;  %v1303_v36 = vmul.f32 1.442695, %v1190_v60  ;;  %v6991_v9 = vpop.f32.mrb[56].mxu0  ;;  %v1128_v34 = vmax.f32 %v6925_v49, 0.0  ;;  %v7002_v60 = vpack.c.bf16 %v4896_v29, %v6938_v2 }
 0x4d7   :  { %4921 = vpow2.f32 %v1301_v47  ;;  %v2645_v58 = vmul.f32 1.442695, %v2534_v13  ;;  %v6994_v55 = vpop.f32.mrb[54].mxu1  ;;  %v6996_v19 = vpop.f32.mrb[57].mxu0  ;;  %v2535_v24 = vsub.f32 0.0, %v2471_v39  ;;  %v2472_v18 = vmax.f32 %v6927_v0, 0.0 }
 0x4d8   :  { %v6998_v15 = vpop.eup %4905  ;;  %4923 = vpow2.f32 %v2643_v22  ;;  %7917 = vst [vmem:[#allocation34_spill] sm:$0xff] %v7002_v60  ;;  %v7004_v8 = vpop.f32.mrb[55].mxu1  ;;  %v1305_v13 = vmul.f32 1.442695, %v1191_v6  ;;  %v1192_v38 = vsub.f32 0.0, %v1128_v34  ;;  %v7007_v49 = vpack.c.bf16 %v4892_v5, %v6929_v54  ;;  %2964 = vmatprep.subr.bf16.mxu1 %v7002_v60 }
 0x4d9   :  { %v4908_v47 = vpop.eup %4907  ;;  %4925 = vpow2.f32 %v1303_v36  ;;  %v2647_v1 = vmul.f32 1.442695, %v2535_v24  ;;  %v2536_v22 = vsub.f32 0.0, %v2472_v18  ;;  %v1129_v0 = vmax.f32 %v6943_v57, 0.0  ;;  %v7013_v2 = vpop.f32.mrb[58].mxu0 }
 0x4da   :  { %7918 = vst [vmem:[#allocation35_spill] sm:$0xff] %v7007_v49  ;;  %v7009_v53 = vpop.eup %4909  ;;  %4927 = vpow2.f32 %v2645_v58  ;;  %v7015_v29 = vpop.f32.mrb[56].mxu1  ;;  %v1307_v36 = vmul.f32 1.442695, %v1192_v38  ;;  %2965 = vmatpush1.bf16.msra.mxu1 %v7007_v49  ;;  %v2473_v54 = vmax.f32 %v6945_v40, 0.0  ;;  %v1130_v5 = vmax.f32 %v6952_v56, 0.0 }
 0x4db   :  { %v4912_v39 = vpop.eup %4911  ;;  %4929 = vpow2.f32 %v1305_v13  ;;  %v7020_v58 = vpop.f32.mrb[59].mxu0  ;;  %v2649_v34 = vmul.f32 1.442695, %v2536_v22  ;;  %v1193_v57 = vsub.f32 0.0, %v1129_v0  ;;  %v2474_v24 = vmax.f32 %v6954_v62, 0.0 }
 0x4dc   :  { %v7022_v6 = vpop.f32.mrb[57].mxu1  ;;  %4931 = vpow2.f32 %v2647_v1  ;;  %v4914_v18 = vpop.eup %4913  ;;  %v2537_v60 = vsub.f32 0.0, %v2473_v54  ;;  %v1194_v13 = vsub.f32 0.0, %v1130_v5  ;;  %v7026_v38 = vpack.c.bf16 %v4902_v10, %v6959_v16 }
 0x4dd   :  { %4933 = vpow2.f32 %v1307_v36  ;;  %v7028_v49 = vpop.eup %4915  ;;  %v1309_v40 = vmul.f32 1.442695, %v1193_v57  ;;  %v2538_v56 = vsub.f32 0.0, %v2474_v24  ;;  %v7032_v4 = vpack.c.bf16 %v6966_v37, %v6947_v43  ;;  %v7034_v1 = vpop.f32.mrb[60].mxu0 }
 0x4de   :  { %7919 = vst [vmem:[#allocation40_spill] sm:$0xff] %v7026_v38  ;;  %4935 = vpow2.f32 %v2649_v34  ;;  %v7036_v22 = vpop.f32.mrb[58].mxu1  ;;  %v4918_v62 = vpop.eup %4917  ;;  %v2651_v0 = vmul.f32 1.442695, %v2537_v60  ;;  %v1311_v36 = vmul.f32 1.442695, %v1194_v13  ;;  %2925 = vmatprep.subr.bf16.mxu0 %v7026_v38 }
 0x4df   :  { %7920 = vst [vmem:[#allocation41_spill] sm:$0xff] %v7032_v4  ;;  %v1131_v16 = vmax.f32 %v6972_v26, 0.0  ;;  %v2475_v10 = vmax.f32 %v6974_v52, 0.0  ;;  %v7041_v54 = vpop.eup %4919  ;;  %4937 = vpow2.f32 %v1309_v40  ;;  %v2653_v5 = vmul.f32 1.442695, %v2538_v56  ;;  %2926 = vmatpush1.bf16.msra.mxu0 %v7032_v4  ;;  %v7046_v34 = vpop.f32.mrb[61].mxu0 }
 0x4e0   :  { %v1132_v43 = vmax.f32 %v6981_v42, 0.0  ;;  %v2476_v37 = vmax.f32 %v6983_v50, 0.0  ;;  %v7048_v60 = vpop.f32.mrb[59].mxu1  ;;  %4939 = vpow2.f32 %v2651_v0  ;;  %v7053_v52 = vpack.c.bf16 %v4912_v39, %v6987_v23 }
 0x4e1   :  { %v7050_v57 = vpop.eup %4921  ;;  %v1195_v26 = vsub.f32 0.0, %v1131_v16  ;;  %v2539_v24 = vsub.f32 0.0, %v2475_v10  ;;  %4941 = vpow2.f32 %v1311_v36  ;;  %v7056_v42 = vpack.c.bf16 %v4908_v47, %v6976_v46  ;;  %v7058_v50 = vpop.f32.mrb[62].mxu0 }
 0x4e2   :  { %7921 = vst [vmem:[#allocation42_spill] sm:$0xff] %v7053_v52  ;;  %v4924_v13 = vpop.eup %4923  ;;  %v1196_v40 = vsub.f32 0.0, %v1132_v43  ;;  %v2540_v56 = vsub.f32 0.0, %v2476_v37  ;;  %v7060_v4 = vpop.f32.mrb[60].mxu1  ;;  %4943 = vpow2.f32 %v2653_v5  ;;  %2966 = vmatprep.subr.bf16.mxu1 %v7053_v52  ;;  %v1133_v23 = vmax.f32 %v6991_v9, 0.0 }
 0x4e3   :  { %7922 = vst [vmem:[#allocation43_spill] sm:$0xff] %v7056_v42  ;;  %v7062_v38 = vpop.eup %4925  ;;  %v1313_v0 = vmul.f32 1.442695, %v1195_v26  ;;  %v2655_v16 = vmul.f32 1.442695, %v2539_v24  ;;  %v7066_v39 = vpop.f32.mrb[63].mxu0  ;;  %2967 = vmatpush1.bf16.msra.mxu1 %v7056_v42  ;;  %v7075_v24 = vpack.c.bf16 %v4918_v62, %v7009_v53 }
 0x4e4   :  { %v4928_v36 = vpop.eup %4927  ;;  %v1315_v10 = vmul.f32 1.442695, %v1196_v40  ;;  %v2657_v43 = vmul.f32 1.442695, %v2540_v56  ;;  %v2477_v46 = vmax.f32 %v6994_v55, 0.0  ;;  %v1134_v47 = vmax.f32 %v6996_v19, 0.0 }
 0x4e5   :  { %v7071_v37 = vpop.eup %4929  ;;  %4945 = vpow2.f32 %v1313_v0  ;;  %v1197_v5 = vsub.f32 0.0, %v1133_v23  ;;  %v2478_v26 = vmax.f32 %v7004_v8, 0.0  ;;  %7923 = vst [vmem:[#allocation48_spill] sm:$0xff] %v7075_v24  ;;  %v7077_v9 = vpop.f32.mrb[61].mxu1  ;;  %v7082_v55 = vpack.c.bf16 %v4914_v18, %v6998_v15  ;;  %2927 = vmatprep.subr.bf16.mxu0 %v7075_v24 }
 0x4e6   :  { %v7079_v52 = vpop.eup %4931  ;;  %4947 = vpow2.f32 %v2655_v16  ;;  %v2541_v40 = vsub.f32 0.0, %v2477_v46  ;;  %v1198_v56 = vsub.f32 0.0, %v1134_v47  ;;  %v7084_v19 = vpop.f32.mrb[62].mxu1  ;;  %v1135_v53 = vmax.f32 %v7013_v2, 0.0 }
 0x4e7   :  { %7924 = vst [vmem:[#allocation49_spill] sm:$0xff] %v7082_v55  ;;  %v4934_v42 = vpop.eup %4933  ;;  %4949 = vpow2.f32 %v1315_v10  ;;  %v1317_v0 = vmul.f32 1.442695, %v1197_v5  ;;  %v2542_v23 = vsub.f32 0.0, %v2478_v26  ;;  %v7088_v8 = vpop.f32.mrb[63].mxu1  ;;  %2928 = vmatpush1.bf16.msra.mxu0 %v7082_v55  ;;  %v2479_v15 = vmax.f32 %v7015_v29, 0.0 }
 0x4e8   :  { %v4936_v62 = vpop.eup %4935  ;;  %4951 = vpow2.f32 %v2657_v43  ;;  %v2659_v16 = vmul.f32 1.442695, %v2541_v40  ;;  %v1319_v46 = vmul.f32 1.442695, %v1198_v56  ;;  %v1199_v47 = vsub.f32 0.0, %v1135_v53 }
 0x4e9   :  { %4953 = vpow2.f32 %v1317_v0  ;;  %v2661_v18 = vmul.f32 1.442695, %v2542_v23  ;;  %v1136_v10 = vmax.f32 %v7020_v58, 0.0  ;;  %v7093_v5 = vpop.eup %4937  ;;  %v2543_v26 = vsub.f32 0.0, %v2479_v15 }
 0x4ea   :  { %4955 = vpow2.f32 %v2659_v16  ;;  %v2480_v2 = vmax.f32 %v7022_v6, 0.0  ;;  %v7097_v24 = vpack.c.bf16 %v4928_v36, %v7041_v54  ;;  %v4940_v43 = vpop.eup %4939  ;;  %v1321_v40 = vmul.f32 1.442695, %v1199_v47 }
 0x4eb   :  { %4957 = vpow2.f32 %v1319_v46  ;;  %v1200_v56 = vsub.f32 0.0, %v1136_v10  ;;  %v7100_v29 = vpack.c.bf16 %v4924_v13, %v7028_v49  ;;  %v4942_v0 = vpop.eup %4941  ;;  %v2663_v23 = vmul.f32 1.442695, %v2543_v26 }
 0x4ec   :  { %7925 = vst [vmem:[#allocation50_spill] sm:$0xff] %v7097_v24  ;;  %4959 = vpow2.f32 %v2661_v18  ;;  %v2544_v58 = vsub.f32 0.0, %v2480_v2  ;;  %2968 = vmatprep.subr.bf16.mxu1 %v7097_v24  ;;  %v1137_v53 = vmax.f32 %v7034_v1, 0.0  ;;  %v4944_v16 = vpop.eup %4943  ;;  %v2481_v54 = vmax.f32 %v7036_v22, 0.0 }
 0x4ed   :  { %7926 = vst [vmem:[#allocation51_spill] sm:$0xff] %v7100_v29  ;;  %4961 = vpow2.f32 %v1321_v40  ;;  %v1323_v6 = vmul.f32 1.442695, %v1200_v56  ;;  %2969 = vmatpush1.bf16.msra.mxu1 %v7100_v29  ;;  %v1138_v36 = vmax.f32 %v7046_v34, 0.0  ;;  %v2482_v46 = vmax.f32 %v7048_v60, 0.0 }
 0x4ee   :  { %4963 = vpow2.f32 %v2663_v23  ;;  %v2665_v49 = vmul.f32 1.442695, %v2544_v58  ;;  %v1201_v13 = vsub.f32 0.0, %v1137_v53  ;;  %v2545_v18 = vsub.f32 0.0, %v2481_v54 }
 0x4ef   :  { %v4946_v15 = vpop.eup %4945  ;;  %4965 = vpow2.f32 %v1323_v6  ;;  %v1202_v47 = vsub.f32 0.0, %v1138_v36  ;;  %v7109_v1 = vpack.c.bf16 %v4934_v42, %v7062_v38  ;;  %v2546_v2 = vsub.f32 0.0, %v2482_v46 }
 0x4f0   :  { %v4948_v10 = vpop.eup %4947  ;;  %4967 = vpow2.f32 %v2665_v49  ;;  %v1325_v26 = vmul.f32 1.442695, %v1201_v13  ;;  %v7113_v22 = vpack.c.bf16 %v7071_v37, %v7050_v57  ;;  %v2667_v40 = vmul.f32 1.442695, %v2545_v18 }
 0x4f1   :  { %7927 = vst [vmem:[#allocation13_spill] sm:$0xff] %v7109_v1  ;;  %v4950_v34 = vpop.eup %4949  ;;  %v1327_v56 = vmul.f32 1.442695, %v1202_v47  ;;  %2929 = vmatprep.subr.bf16.mxu0 %v7109_v1  ;;  %v1139_v60 = vmax.f32 %v7058_v50, 0.0  ;;  %v2483_v23 = vmax.f32 %v7060_v4, 0.0  ;;  %v1140_v42 = vmax.f32 %v7066_v39, 0.0 }
 0x4f2   :  { %7928 = vst [vmem:[#allocation12_spill] sm:$0xff] %v7113_v22  ;;  %v4952_v58 = vpop.eup %4951  ;;  %4969 = vpow2.f32 %v1325_v26  ;;  %v2669_v38 = vmul.f32 1.442695, %v2546_v2  ;;  %2930 = vmatpush1.bf16.msra.mxu0 %v7113_v22  ;;  %v2484_v53 = vmax.f32 %v7077_v9, 0.0  ;;  %v7121_v54 = vpack.c.bf16 %v4944_v16, %v4936_v62 }
 0x4f3   :  { %v4954_v57 = vpop.eup %4953  ;;  %4971 = vpow2.f32 %v2667_v40  ;;  %v1203_v37 = vsub.f32 0.0, %v1139_v60  ;;  %v2547_v6 = vsub.f32 0.0, %v2483_v23  ;;  %v1204_v50 = vsub.f32 0.0, %v1140_v42 }
 0x4f4   :  { %7929 = vst [vmem:[#allocation15_spill] sm:$0xff] %v7121_v54  ;;  %v4956_v36 = vpop.eup %4955  ;;  %4973 = vpow2.f32 %v1327_v56  ;;  %v2548_v49 = vsub.f32 0.0, %v2484_v53  ;;  %v7124_v4 = vpack.c.bf16 %v4940_v43, %v7079_v52  ;;  %2970 = vmatprep.subr.bf16.mxu1 %v7121_v54  ;;  %v2485_v39 = vmax.f32 %v7084_v19, 0.0 }
 0x4f5   :  { %v4958_v13 = vpop.eup %4957  ;;  %4975 = vpow2.f32 %v2669_v38  ;;  %v1329_v46 = vmul.f32 1.442695, %v1203_v37  ;;  %v2671_v18 = vmul.f32 1.442695, %v2547_v6  ;;  %v1331_v47 = vmul.f32 1.442695, %v1204_v50 }
 0x4f6   :  { %7930 = vst [vmem:[#allocation14_spill] sm:$0xff] %v7124_v4  ;;  %v4960_v9 = vpop.eup %4959  ;;  %v2673_v26 = vmul.f32 1.442695, %v2548_v49  ;;  %2971 = vmatpush1.bf16.msra.mxu1 %v7124_v4  ;;  %v2486_v62 = vmax.f32 %v7088_v8, 0.0  ;;  %v7130_v16 = vpack.c.bf16 %v4950_v34, %v4942_v0  ;;  %v2549_v52 = vsub.f32 0.0, %v2485_v39 }
 0x4f7   :  { %v4962_v2 = vpop.eup %4961  ;;  %4977 = vpow2.f32 %v1329_v46  ;;  %v7133_v43 = vpack.c.bf16 %v4946_v15, %v7093_v5  ;;  %v7135_v40 = vpack.c.bf16 %v4960_v9, %v4952_v58  ;;  %v7138_v60 = vpack.c.bf16 %v4956_v36, %v4948_v10 }
 0x4f8   :  { %7931 = vst [vmem:[#allocation21_spill] sm:$0xff] %v7130_v16  ;;  %v4964_v56 = vpop.eup %4963  ;;  %4979 = vpow2.f32 %v2671_v18  ;;  %v2550_v19 = vsub.f32 0.0, %v2486_v62  ;;  %2931 = vmatprep.subr.bf16.mxu0 %v7130_v16  ;;  %v7140_v23 = vpack.c.bf16 %v4962_v2, %v4954_v57  ;;  %v2675_v0 = vmul.f32 1.442695, %v2549_v52 }
 0x4f9   :  { %7932 = vst [vmem:[#allocation20_spill] sm:$0xff] %v7133_v43  ;;  %7933 = vst [vmem:[#allocation23_spill] sm:$0xff] %v7135_v40  ;;  %v4966_v8 = vpop.eup %4965  ;;  %4981 = vpow2.f32 %v1331_v47  ;;  %2932 = vmatpush1.bf16.msra.mxu0 %v7133_v43  ;;  %2972 = vmatprep.subr.bf16.mxu1 %v7135_v40  ;;  %v7936_v5 = vrot.slane %v6648_v12, 9 }
 0x4fa   :  { %7934 = vst [vmem:[#allocation22_spill] sm:$0xff] %v7138_v60  ;;  %7935 = vst [vmem:[#allocation28_spill] sm:$0xff] %v7140_v23  ;;  %v4968_v34 = vpop.eup %4967  ;;  %4983 = vpow2.f32 %v2673_v26  ;;  %v2677_v58 = vmul.f32 1.442695, %v2550_v19  ;;  %2973 = vmatpush1.bf16.msra.mxu1 %v7138_v60  ;;  %v7148_v10 = vpack.c.bf16 %v4966_v8, %v4958_v13 }
 0x4fb   :  { %v2795_v15 = vadd.f32 %v6648_v12, %v7936_v5  ;;  %4985 = vpow2.f32 %v2675_v0 }
 0x4fc   :  { %7937 = vst [vmem:[#allocation29_spill] sm:$0xff] %v7148_v10  ;;  %v4970_v38 = vpop.eup %4969  ;;  %4987 = vpow2.f32 %v2677_v58  ;;  %2933 = vmatprep.subr.bf16.mxu0 %v7148_v10 }
 0x4fd   :  { %v4972_v42 = vpop.eup %4971  ;;  %2934 = vmatpush1.bf16.msra.mxu0 %v7140_v23  ;;  %4989 = vrcp.f32 %v2795_v15 }
 0x4fe   :  { %v4974_v53 = vpop.eup %4973  ;;  %v7152_v57 = vpack.c.bf16 %v4972_v42, %v4964_v56  ;;  %v7945_v42 = vld [vmem:[#allocation52_spill] sm:$0xff] }
 0x4ff   :  { %v4976_v37 = vpop.eup %4975 }
 0x500   :  { %7938 = vst [vmem:[#allocation30_spill] sm:$0xff] %v7152_v57  ;;  %v7154_v6 = vpack.c.bf16 %v4976_v37, %v4968_v34  ;;  %v7947_v37 = vld [vmem:[#allocation57_spill] sm:$0xff] }
 0x501   :  { %v4978_v36 = vpop.eup %4977 }
 0x502   :  { %7939 = vst [vmem:[#allocation31_spill] sm:$0xff] %v7154_v6  ;;  %v4980_v50 = vpop.eup %4979  ;;  %2974 = vmatprep.subr.bf16.mxu1 %v7154_v6  ;;  %v7157_v49 = vpack.c.bf16 %v4978_v36, %v4970_v38  ;;  %v7948_v36 = vld [vmem:[#allocation62_spill] sm:$0xff] }
 0x503   :  { %v4982_v13 = vpop.eup %4981  ;;  %2975 = vmatpush1.bf16.msra.mxu1 %v7152_v57 }
 0x504   :  { %7940 = vst [vmem:[#allocation36_spill] sm:$0xff] %v7157_v49  ;;  %v4984_v46 = vpop.eup %4983  ;;  %v7160_v18 = vpack.c.bf16 %v4982_v13, %v4974_v53  ;;  %v7946_v53 = vld [vmem:[#allocation63_spill] sm:$0xff]  ;;  %v7950_v13 = vld [vmem:[#allocation64_spill] sm:$0xff] }
 0x505   :  { %v4986_v39 = vpop.eup %4985 }
 0x506   :  { %7941 = vst [vmem:[#allocation37_spill] sm:$0xff] %v7160_v18  ;;  %v4988_v9 = vpop.eup %4987  ;;  %2935 = vmatprep.subr.bf16.mxu0 %v7160_v18  ;;  %v7163_v47 = vpack.c.bf16 %v4986_v39, %v4980_v50  ;;  %v7949_v50 = vld [vmem:[#allocation17_spill] sm:$0xff]  ;;  %v7952_v39 = vld [vmem:[#allocation59_spill] sm:$0xff] }
 0x507   :  { %v4990_v26 = vpop.eup %4989  ;;  %2936 = vmatpush1.bf16.msra.mxu0 %v7157_v49  ;;  %v7166_v62 = vpack.c.bf16 %v4988_v9, %v4984_v46  ;;  %v7951_v46 = vld [vmem:[#allocation58_spill] sm:$0xff]  ;;  %v7953_v9 = vld [vmem:[#allocation16_spill] sm:$0xff] }
 0x508   :  { %7942 = vst [vmem:[#allocation38_spill] sm:$0xff] %v7163_v47  ;;  %3156 = vmatprep.subr.bf16.mxu0 %v6659_v25  ;;  %v2801_v2 = vrot.slane %v4990_v26, %v6637_v41  ;;  %v2805_v52 = vrot.slane %v4990_v26, %v6639_v33  ;;  %v7954_v26 = vld [vmem:[#allocation19_spill] sm:$0xff] }
 0x509   :  { %7943 = vst [vmem:[#allocation39_spill] sm:$0xff] %v7166_v62  ;;  %2976 = vmatprep.subr.bf16.mxu1 %v7166_v62 }
 0x50a   :  { %v2811_v56 = vrot.slane %v2801_v2, %v6637_v41  ;;  %v2815_v19 = vrot.slane %v2805_v52, %v6637_v41  ;;  %2977 = vmatpush1.bf16.msra.mxu1 %v7163_v47  ;;  %v7955_v2 = vld [vmem:[#allocation18_spill] sm:$0xff]  ;;  %v7956_v52 = vld [vmem:[#allocation25_spill] sm:$0xff] }
 0x50b   :  { %3197 = vmatprep.subr.bf16.mxu1 %v6668_v63 }
 0x50c   :  { %v2818_v8 = vcombine.low %v2811_v56, %v2815_v19  ;;  %v7957_v56 = vld [vmem:[#allocation27_spill] sm:$0xff]  ;;  %v7958_v19 = vld [vmem:[#allocation24_spill] sm:$0xff] }
 0x50e   :  { %v2825_v0 = vrot.slane %v2818_v8, %v6645_v21  ;;  %v7959_v8 = vld [vmem:[#allocation26_spill] sm:$0xff] }
 0x510   :  { %v2827_v5 = vmul.f32 %v6648_v12, %v2825_v0  ;;  %v7944_v12 = vld [vmem:[#allocation61_spill] sm:$0xff]  ;;  %v7960_v0 = vld [vmem:[#allocation32_spill] sm:$0xff] }
 0x512   :  { %v2835_v15 = vrot.slane %v2827_v5, %v6645_v21  ;;  %v7961_v5 = vld [vmem:[#allocation34_spill] sm:$0xff] }
 0x514   :  { %v2836_v34 = vcombine.high %v2835_v15, %v2835_v15  ;;  %v2839_v58 = vpack.c.bf16 %v2835_v15, %v2835_v15  ;;  %v7962_v15 = vld [vmem:[#allocation33_spill] sm:$0xff] }
 0x516   :  { %v2840_v38 = vpack.c.bf16 %v2836_v34, %v2836_v34  ;;  %v7963_v34 = vld [vmem:[#allocation35_spill] sm:$0xff] }
 0x518   :  { %2937 = vmatprep.mubr.bf16.mxu0 %v2840_v38  ;;  %2978 = vmatprep.mubr.bf16.mxu1 %v2840_v38  ;;  %v7965_v38 = vld [vmem:[#allocation42_spill] sm:$0xff] }
 0x519   :  { %2938 = vmatmul.mubr.bf16.vlgmr.msra.gmra.mrb[64].mxu0 %v2839_v58  ;;  %2979 = vmatmul.mubr.bf16.vlgmr.msra.gmra.mrb[64].mxu1 %v2839_v58  ;;  %v7964_v58 = vld [vmem:[#allocation40_spill] sm:$0xff] }
 0x51a   :  { %3157 = vmatpush1.bf16.msra.mxu0 %v6662_v31  ;;  %3198 = vmatpush1.bf16.msra.mxu1 %v6673_v44 }
 0x51b   :  { %3158 = vmatprep.subr.bf16.mxu0 %v6680_v30  ;;  %3199 = vmatprep.subr.bf16.mxu1 %v6695_v35 }
 0x51e   :  { %3159 = vmatpush1.bf16.msra.mxu0 %v6685_v17  ;;  %3200 = vmatpush1.bf16.msra.mxu1 %v6698_v48 }
 0x51f   :  { %3160 = vmatprep.subr.bf16.mxu0 %v6705_v7  ;;  %3201 = vmatprep.subr.bf16.mxu1 %v6720_v32 }
 0x522   :  { %3161 = vmatpush1.bf16.msra.mxu0 %v6711_v59  ;;  %3202 = vmatpush1.bf16.msra.mxu1 %v6723_v14 }
 0x523   :  { %3162 = vmatprep.subr.bf16.mxu0 %v6732_v20  ;;  %3203 = vmatprep.subr.bf16.mxu1 %v6746_v11 }
 0x526   :  { %3163 = vmatpush1.bf16.msra.mxu0 %v6737_v45  ;;  %3204 = vmatpush1.bf16.msra.mxu1 %v6749_v28 }
 0x527   :  { %3164 = vmatprep.subr.bf16.mxu0 %v6756_v61  ;;  %3205 = vmatprep.subr.bf16.mxu1 %v6771_v3 }
 0x52a   :  { %3165 = vmatpush1.bf16.msra.mxu0 %v6762_v27  ;;  %3206 = vmatpush1.bf16.msra.mxu1 %v6776_v51 }
 0x52b   :  { %3166 = vmatprep.subr.bf16.mxu0 %v7944_v12  ;;  %3207 = vmatprep.subr.bf16.mxu1 %v7945_v42 }
 0x52e   :  { %3167 = vmatpush1.bf16.msra.mxu0 %v7946_v53  ;;  %3208 = vmatpush1.bf16.msra.mxu1 %v7947_v37 }
 0x52f   :  { %3168 = vmatprep.subr.bf16.mxu0 %v7948_v36  ;;  %3209 = vmatprep.subr.bf16.mxu1 %v7949_v50 }
 0x532   :  { %3169 = vmatpush1.bf16.msra.mxu0 %v7950_v13  ;;  %3210 = vmatpush1.bf16.msra.mxu1 %v7951_v46 }
 0x533   :  { %3170 = vmatprep.subr.bf16.mxu0 %v7952_v39  ;;  %3211 = vmatprep.subr.bf16.mxu1 %v7953_v9 }
 0x536   :  { %3171 = vmatpush1.bf16.msra.mxu0 %v7954_v26  ;;  %3212 = vmatpush1.bf16.msra.mxu1 %v7955_v2  ;;  %v7966_v2 = vld [vmem:[#allocation41_spill] sm:$0xff] }
 0x537   :  { %3172 = vmatprep.subr.bf16.mxu0 %v7956_v52  ;;  %3213 = vmatprep.subr.bf16.mxu1 %v7957_v56  ;;  %v7967_v52 = vld [vmem:[#allocation43_spill] sm:$0xff]  ;;  %v7968_v56 = vld [vmem:[#allocation48_spill] sm:$0xff] }
 0x53a   :  { %3173 = vmatpush1.bf16.msra.mxu0 %v7958_v19  ;;  %3214 = vmatpush1.bf16.msra.mxu1 %v7959_v8 }
 0x53b   :  { %3174 = vmatprep.subr.bf16.mxu0 %v7960_v0  ;;  %3215 = vmatprep.subr.bf16.mxu1 %v7961_v5 }
 0x53e   :  { %3175 = vmatpush1.bf16.msra.mxu0 %v7962_v15  ;;  %3216 = vmatpush1.bf16.msra.mxu1 %v7963_v34 }
 0x53f   :  { %3176 = vmatprep.subr.bf16.mxu0 %v7964_v58  ;;  %3217 = vmatprep.subr.bf16.mxu1 %v7965_v38 }
 0x542   :  { %3177 = vmatpush1.bf16.msra.mxu0 %v7966_v2  ;;  %3218 = vmatpush1.bf16.msra.mxu1 %v7967_v52 }
 0x543   :  { %3178 = vmatprep.subr.bf16.mxu0 %v7968_v56  ;;  %3219 = vmatprep.subr.bf16.mxu1 %v7097_v24 }
 0x546   :  { %3179 = vmatpush1.bf16.msra.mxu0 %v7082_v55  ;;  %3220 = vmatpush1.bf16.msra.mxu1 %v7100_v29 }
 0x547   :  { %3180 = vmatprep.subr.bf16.mxu0 %v7109_v1  ;;  %3221 = vmatprep.subr.bf16.mxu1 %v7121_v54 }
 0x54a   :  { %3181 = vmatpush1.bf16.msra.mxu0 %v7113_v22  ;;  %3222 = vmatpush1.bf16.msra.mxu1 %v7124_v4 }
 0x54b   :  { %3182 = vmatprep.subr.bf16.mxu0 %v7130_v16  ;;  %3223 = vmatprep.subr.bf16.mxu1 %v7135_v40 }
 0x54e   :  { %3183 = vmatpush1.bf16.msra.mxu0 %v7133_v43  ;;  %3224 = vmatpush1.bf16.msra.mxu1 %v7138_v60 }
 0x54f   :  { %3184 = vmatprep.subr.bf16.mxu0 %v7148_v10  ;;  %3225 = vmatprep.subr.bf16.mxu1 %v7154_v6 }
 0x552   :  { %3185 = vmatpush1.bf16.msra.mxu0 %v7140_v23  ;;  %3226 = vmatpush1.bf16.msra.mxu1 %v7152_v57  ;;  %v7243_v57 = vstv %s2745_s0  ;;  %v7257_v23 = vstv %s4265_s10 }
 0x553   :  { %3186 = vmatprep.subr.bf16.mxu0 %v7160_v18  ;;  %3227 = vmatprep.subr.bf16.mxu1 %v7166_v62  ;;  %v7245_v18 = vstv %s4260_s11  ;;  %v7247_v62 = vstv %s4261_s5 }
 0x554   :  { %7969 = vst [vmem:[#allocation44_spill] sm:$0xff] %v7245_v18 }
 0x556   :  { %3187 = vmatpush1.bf16.msra.mxu0 %v7157_v49  ;;  %3228 = vmatpush1.bf16.msra.mxu1 %v7163_v47  ;;  %v7249_v49 = vstv %s4262_s30  ;;  %v7251_v47 = vstv %s2749_s7 }
 0x557   :  { %3398 = vmatprep.subr.bf16.mxu0 %v6659_v25  ;;  %3439 = vmatprep.subr.bf16.mxu1 %v6668_v63  ;;  %7970 = vst [vmem:[#allocation45_spill] sm:$0xff] %v7249_v49  ;;  %7971 = vst [vmem:[#allocation46_spill] sm:$0xff] %v7251_v47  ;;  %v7253_v25 = vstv %s4263_s8  ;;  %v7255_v63 = vstv %s4264_s9 }
 0x558   :  { %7972 = vst [vmem:[#allocation47_spill] sm:$0xff] %v7255_v63 }
 0x5ec   :  { %v2939_v6 = vpop.f32.mrb[64].mxu0  ;;  %v2980_v10 = vpop.f32.mrb[64].mxu1 }
 0x5ed   :  { %v2988_v60 = vmul.f32 %v7243_v57, %v2939_v6  ;;  %v2996_v43 = vmul.f32 %v7245_v18, %v2939_v6  ;;  %v3018_v40 = vmul.f32 %v7247_v62, %v2939_v6  ;;  %v3026_v16 = vmul.f32 %v7249_v49, %v2939_v6  ;;  %v2941_v4 = vpop.f32.mrb[65].mxu0  ;;  %v2982_v22 = vpop.f32.mrb[65].mxu1 }
 0x5ee   :  { %v2991_v54 = vmul.f32 %v7251_v47, %v2980_v10  ;;  %v3007_v1 = vmul.f32 %v7253_v25, %v2980_v10  ;;  %v3021_v29 = vmul.f32 %v7255_v63, %v2980_v10  ;;  %v3037_v55 = vmul.f32 %v7257_v23, %v2980_v10  ;;  %v2943_v24 = vpop.f32.mrb[66].mxu0  ;;  %v2984_v56 = vpop.f32.mrb[66].mxu1 }
 0x5ef   :  { %v3000_v52 = vrot.slane %v2996_v43, 1  ;;  %v3030_v2 = vrot.slane %v3026_v16, 1  ;;  %v2989_v38 = vmul.f32 %v7243_v57, %v2941_v4  ;;  %v2997_v58 = vmul.f32 %v7245_v18, %v2941_v4  ;;  %v2944_v34 = vpop.f32.mrb[67].mxu0  ;;  %v2985_v6 = vpop.f32.mrb[67].mxu1 }
 0x5f0   :  { %v2993_v15 = vadd.f32 %v2991_v54, %v2988_v60  ;;  %v3011_v5 = vrot.slane %v3007_v1, 1  ;;  %v3023_v0 = vadd.f32 %v3021_v29, %v3018_v40  ;;  %v3041_v8 = vrot.slane %v3037_v55, 1 }
 0x5f1   :  { %v3001_v19 = vrot.slane %v2997_v58, 1  ;;  %v3019_v26 = vmul.f32 %v7247_v62, %v2941_v4  ;;  %v3027_v9 = vmul.f32 %v7249_v49, %v2941_v4  ;;  %v2992_v24 = vmul.f32 %v7251_v47, %v2982_v22 }
 0x5f2   :  { %v3004_v10 = vadd.f32 %v3000_v52, %v2993_v15  ;;  %v3034_v43 = vadd.f32 %v3030_v2, %v3023_v0  ;;  %v3008_v16 = vmul.f32 %v7253_v25, %v2982_v22  ;;  %v3022_v56 = vmul.f32 %v7255_v63, %v2982_v22 }
 0x5f3   :  { %v3031_v18 = vrot.slane %v3027_v9, 1  ;;  %v2994_v34 = vadd.f32 %v2992_v24, %v2989_v38  ;;  %v3038_v54 = vmul.f32 %v7257_v23, %v2982_v22  ;;  %v7280_v22 = vld [vmem:[%s7623_s1] sm:$0xf] }
 0x5f4   :  { %v3015_v1 = vadd.f32 %v3011_v5, %v3004_v10  ;;  %v3045_v29 = vadd.f32 %v3041_v8, %v3034_v43  ;;  %v3024_v55 = vadd.f32 %v3022_v56, %v3019_v26  ;;  %v3012_v60 = vrot.slane %v3008_v16, 1 }
 0x5f5   :  { %v3005_v40 = vadd.f32 %v3001_v19, %v2994_v34  ;;  %v3042_v6 = vrot.slane %v3038_v54, 1 }
 0x5f6   :  { %v3049_v58 = vrot.slane %v3045_v29, 7  ;;  %v3035_v4 = vadd.f32 %v3031_v18, %v3024_v55 }
 0x5f7   :  { %v3016_v47 = vadd.f32 %v3012_v60, %v3005_v40 }
 0x5f8   :  { %v3054_v2 = vsel %vm3053_vm6, %v3015_v1, %v3049_v58  ;;  %v3046_v52 = vadd.f32 %v3042_v6, %v3035_v4 }
 0x5fa   :  { %v3050_v0 = vrot.slane %v3046_v52, 7 }
 0x5fc   :  { %v3055_v15 = vsel %vm3053_vm6, %v3016_v47, %v3050_v0 }
 0x5fd   :  { %v3058_v9 = vcombine.low %v3054_v2, %v3055_v15 }
 0x5ff   :  { %v3065_v26 = vrot.slane %v3058_v9, %v6645_v21 }
 0x601   :  { %v3067_v19 = vsub.f32 %v7280_v22, %v3065_v26  ;;  %v7973_v26 = vld [vmem:[#allocation16_spill] sm:$0xff] }
 0x603   :  { %v4268_v8 = vrot.slane %v3067_v19, 9 }
 0x605   :  { %v3072_v18 = vmax.f32 %v3067_v19, %v4268_v8  ;;  %v7975_v8 = vld [vmem:[#allocation18_spill] sm:$0xff] }
 0x607   :  { %v3077_v5 = vrot.slane %v3072_v18, %v6637_v41  ;;  %v3081_v38 = vrot.slane %v3072_v18, %v6639_v33  ;;  %v7976_v18 = vld [vmem:[#allocation25_spill] sm:$0xff] }
 0x609   :  { %v3087_v24 = vrot.slane %v3077_v5, %v6637_v41  ;;  %v3091_v47 = vrot.slane %v3081_v38, %v6637_v41  ;;  %v7977_v5 = vld [vmem:[#allocation27_spill] sm:$0xff]  ;;  %v7978_v38 = vld [vmem:[#allocation24_spill] sm:$0xff] }
 0x60b   :  { %v3094_v10 = vcombine.low %v3087_v24, %v3091_v47  ;;  %v7979_v24 = vld [vmem:[#allocation26_spill] sm:$0xff]  ;;  %v7980_v47 = vld [vmem:[#allocation32_spill] sm:$0xff] }
 0x60d   :  { %v3101_v43 = vrot.slane %v3094_v10, %v6645_v21  ;;  %v7981_v10 = vld [vmem:[#allocation34_spill] sm:$0xff] }
 0x60f   :  { %v3103_v16 = vsub.f32 %v3067_v19, %v3101_v43  ;;  %v7974_v19 = vld [vmem:[#allocation19_spill] sm:$0xff]  ;;  %v7982_v43 = vld [vmem:[#allocation33_spill] sm:$0xff] }
 0x611   :  { %v3104_v56 = vmul.f32 1.442695, %v3103_v16  ;;  %v7983_v16 = vld [vmem:[#allocation35_spill] sm:$0xff] }
 0x613   :  { %4991 = vpow2.f32 %v3104_v56  ;;  %v7984_v56 = vld [vmem:[#allocation40_spill] sm:$0xff] }
 0x61d   :  { %v4992_v34 = vpop.eup %4991 }
 0x61e   :  { %v4269_v54 = vrot.slane %v4992_v34, 9 }
 0x620   :  { %v3110_v1 = vadd.f32 %v4992_v34, %v4269_v54  ;;  %v7986_v54 = vld [vmem:[#allocation41_spill] sm:$0xff] }
 0x622   :  { %4993 = vrcp.f32 %v3110_v1  ;;  %v7987_v1 = vld [vmem:[#allocation43_spill] sm:$0xff] }
 0x62c   :  { %v4994_v29 = vpop.eup %4993 }
 0x62d   :  { %v3116_v55 = vrot.slane %v4994_v29, %v6637_v41  ;;  %v3120_v40 = vrot.slane %v4994_v29, %v6639_v33  ;;  %v7988_v29 = vld [vmem:[#allocation48_spill] sm:$0xff] }
 0x62f   :  { %v3126_v60 = vrot.slane %v3116_v55, %v6637_v41  ;;  %v3130_v58 = vrot.slane %v3120_v40, %v6637_v41  ;;  %v7989_v55 = vld [vmem:[#allocation50_spill] sm:$0xff]  ;;  %v7990_v40 = vld [vmem:[#allocation49_spill] sm:$0xff] }
 0x631   :  { %v3133_v4 = vcombine.low %v3126_v60, %v3130_v58  ;;  %v7991_v60 = vld [vmem:[#allocation51_spill] sm:$0xff]  ;;  %v7992_v58 = vld [vmem:[#allocation13_spill] sm:$0xff] }
 0x633   :  { %v3140_v6 = vrot.slane %v3133_v4, %v6645_v21  ;;  %v7993_v4 = vld [vmem:[#allocation15_spill] sm:$0xff] }
 0x635   :  { %v3142_v2 = vmul.f32 %v4992_v34, %v3140_v6  ;;  %v7985_v34 = vld [vmem:[#allocation42_spill] sm:$0xff]  ;;  %v7994_v6 = vld [vmem:[#allocation12_spill] sm:$0xff] }
 0x637   :  { %v3150_v52 = vrot.slane %v3142_v2, %v6645_v21  ;;  %v7995_v2 = vld [vmem:[#allocation14_spill] sm:$0xff] }
 0x639   :  { %v3151_v0 = vcombine.high %v3150_v52, %v3150_v52  ;;  %v3154_v9 = vpack.c.bf16 %v3150_v52, %v3150_v52  ;;  %v7996_v52 = vld [vmem:[#allocation21_spill] sm:$0xff] }
 0x63b   :  { %v3155_v15 = vpack.c.bf16 %v3151_v0, %v3151_v0  ;;  %v7997_v0 = vld [vmem:[#allocation23_spill] sm:$0xff] }
 0x63d   :  { %3188 = vmatprep.mubr.bf16.mxu0 %v3155_v15  ;;  %3229 = vmatprep.mubr.bf16.mxu1 %v3155_v15  ;;  %v7998_v15 = vld [vmem:[#allocation20_spill] sm:$0xff] }
 0x63e   :  { %3189 = vmatmul.mubr.bf16.vlgmr.msra.gmra.mrb[68].mxu0 %v3154_v9  ;;  %3230 = vmatmul.mubr.bf16.vlgmr.msra.gmra.mrb[68].mxu1 %v3154_v9  ;;  %v7999_v9 = vld [vmem:[#allocation22_spill] sm:$0xff] }
 0x63f   :  { %3399 = vmatpush1.bf16.msra.mxu0 %v6662_v31  ;;  %3440 = vmatpush1.bf16.msra.mxu1 %v6673_v44 }
 0x640   :  { %3400 = vmatprep.subr.bf16.mxu0 %v6680_v30  ;;  %3441 = vmatprep.subr.bf16.mxu1 %v6695_v35 }
 0x643   :  { %3401 = vmatpush1.bf16.msra.mxu0 %v6685_v17  ;;  %3442 = vmatpush1.bf16.msra.mxu1 %v6698_v48 }
 0x644   :  { %3402 = vmatprep.subr.bf16.mxu0 %v6705_v7  ;;  %3443 = vmatprep.subr.bf16.mxu1 %v6720_v32 }
 0x647   :  { %3403 = vmatpush1.bf16.msra.mxu0 %v6711_v59  ;;  %3444 = vmatpush1.bf16.msra.mxu1 %v6723_v14 }
 0x648   :  { %3404 = vmatprep.subr.bf16.mxu0 %v6732_v20  ;;  %3445 = vmatprep.subr.bf16.mxu1 %v6746_v11 }
 0x64b   :  { %3405 = vmatpush1.bf16.msra.mxu0 %v6737_v45  ;;  %3446 = vmatpush1.bf16.msra.mxu1 %v6749_v28 }
 0x64c   :  { %3406 = vmatprep.subr.bf16.mxu0 %v6756_v61  ;;  %3447 = vmatprep.subr.bf16.mxu1 %v6771_v3 }
 0x64f   :  { %3407 = vmatpush1.bf16.msra.mxu0 %v6762_v27  ;;  %3448 = vmatpush1.bf16.msra.mxu1 %v6776_v51 }
 0x650   :  { %3408 = vmatprep.subr.bf16.mxu0 %v7944_v12  ;;  %3449 = vmatprep.subr.bf16.mxu1 %v7945_v42 }
 0x653   :  { %3409 = vmatpush1.bf16.msra.mxu0 %v7946_v53  ;;  %3450 = vmatpush1.bf16.msra.mxu1 %v7947_v37 }
 0x654   :  { %3410 = vmatprep.subr.bf16.mxu0 %v7948_v36  ;;  %3451 = vmatprep.subr.bf16.mxu1 %v7949_v50 }
 0x657   :  { %3411 = vmatpush1.bf16.msra.mxu0 %v7950_v13  ;;  %3452 = vmatpush1.bf16.msra.mxu1 %v7951_v46 }
 0x658   :  { %3412 = vmatprep.subr.bf16.mxu0 %v7952_v39  ;;  %3453 = vmatprep.subr.bf16.mxu1 %v7973_v26 }
 0x65b   :  { %3413 = vmatpush1.bf16.msra.mxu0 %v7974_v19  ;;  %3454 = vmatpush1.bf16.msra.mxu1 %v7975_v8 }
 0x65c   :  { %3414 = vmatprep.subr.bf16.mxu0 %v7976_v18  ;;  %3455 = vmatprep.subr.bf16.mxu1 %v7977_v5 }
 0x65f   :  { %3415 = vmatpush1.bf16.msra.mxu0 %v7978_v38  ;;  %3456 = vmatpush1.bf16.msra.mxu1 %v7979_v24 }
 0x660   :  { %3416 = vmatprep.subr.bf16.mxu0 %v7980_v47  ;;  %3457 = vmatprep.subr.bf16.mxu1 %v7981_v10 }
 0x663   :  { %3417 = vmatpush1.bf16.msra.mxu0 %v7982_v43  ;;  %3458 = vmatpush1.bf16.msra.mxu1 %v7983_v16 }
 0x664   :  { %3418 = vmatprep.subr.bf16.mxu0 %v7984_v56  ;;  %3459 = vmatprep.subr.bf16.mxu1 %v7985_v34 }
 0x667   :  { %3419 = vmatpush1.bf16.msra.mxu0 %v7986_v54  ;;  %3460 = vmatpush1.bf16.msra.mxu1 %v7987_v1  ;;  %v8011_v54 = vld [vmem:[#allocation46_spill] sm:$0xff] }
 0x668   :  { %3420 = vmatprep.subr.bf16.mxu0 %v7988_v29  ;;  %3461 = vmatprep.subr.bf16.mxu1 %v7989_v55  ;;  %v8000_v55 = vld [vmem:[#allocation29_spill] sm:$0xff]  ;;  %v8010_v29 = vld [vmem:[#allocation44_spill] sm:$0xff] }
 0x66b   :  { %3421 = vmatpush1.bf16.msra.mxu0 %v7990_v40  ;;  %3462 = vmatpush1.bf16.msra.mxu1 %v7991_v60  ;;  %v8001_v40 = vld [vmem:[#allocation31_spill] sm:$0xff]  ;;  %v8002_v60 = vld [vmem:[#allocation28_spill] sm:$0xff] }
 0x66c   :  { %3422 = vmatprep.subr.bf16.mxu0 %v7992_v58  ;;  %3463 = vmatprep.subr.bf16.mxu1 %v7993_v4  ;;  %v8003_v58 = vld [vmem:[#allocation30_spill] sm:$0xff]  ;;  %v8004_v4 = vld [vmem:[#allocation37_spill] sm:$0xff] }
 0x66f   :  { %3423 = vmatpush1.bf16.msra.mxu0 %v7994_v6  ;;  %3464 = vmatpush1.bf16.msra.mxu1 %v7995_v2  ;;  %v8005_v6 = vld [vmem:[#allocation39_spill] sm:$0xff]  ;;  %v8006_v2 = vld [vmem:[#allocation36_spill] sm:$0xff] }
 0x670   :  { %3424 = vmatprep.subr.bf16.mxu0 %v7996_v52  ;;  %3465 = vmatprep.subr.bf16.mxu1 %v7997_v0  ;;  %v8007_v52 = vld [vmem:[#allocation38_spill] sm:$0xff]  ;;  %v8008_v0 = vld [vmem:[#allocation60_spill] sm:$0xff] }
 0x673   :  { %3425 = vmatpush1.bf16.msra.mxu0 %v7998_v15  ;;  %3466 = vmatpush1.bf16.msra.mxu1 %v7999_v9  ;;  %v8009_v15 = vld [vmem:[#allocation56_spill] sm:$0xff] }
 0x674   :  { %3426 = vmatprep.subr.bf16.mxu0 %v8000_v55  ;;  %3467 = vmatprep.subr.bf16.mxu1 %v8001_v40 }
 0x677   :  { %3427 = vmatpush1.bf16.msra.mxu0 %v8002_v60  ;;  %3468 = vmatpush1.bf16.msra.mxu1 %v8003_v58 }
 0x678   :  { %3428 = vmatprep.subr.bf16.mxu0 %v8004_v4  ;;  %3469 = vmatprep.subr.bf16.mxu1 %v8005_v6 }
 0x67b   :  { %3429 = vmatpush1.bf16.msra.mxu0 %v8006_v2  ;;  %3470 = vmatpush1.bf16.msra.mxu1 %v8007_v52 }
 0x67c   :  { %3640 = vmatprep.subr.bf16.mxu0 %v8008_v0  ;;  %3681 = vmatprep.subr.bf16.mxu1 %v8009_v15 }
 0x711   :  { %v3190_v9 = vpop.f32.mrb[68].mxu0  ;;  %v3231_v55 = vpop.f32.mrb[68].mxu1 }
 0x712   :  { %v3238_v40 = vmul.f32 %v3190_v9, %v7243_v57  ;;  %v3244_v60 = vmul.f32 %v3190_v9, %v8010_v29  ;;  %v3264_v58 = vmul.f32 %v3190_v9, %v7247_v62  ;;  %v3270_v4 = vmul.f32 %v3190_v9, %v7249_v49  ;;  %v3192_v1 = vpop.f32.mrb[69].mxu0  ;;  %v3233_v6 = vpop.f32.mrb[69].mxu1 }
 0x713   :  { %v3240_v2 = vmul.f32 %v3231_v55, %v8011_v54  ;;  %v3254_v52 = vmul.f32 %v3231_v55, %v7253_v25  ;;  %v3266_v0 = vmul.f32 %v3231_v55, %v7255_v63  ;;  %v3280_v15 = vmul.f32 %v3231_v55, %v7257_v23  ;;  %v3194_v34 = vpop.f32.mrb[70].mxu0  ;;  %v3235_v56 = vpop.f32.mrb[70].mxu1 }
 0x714   :  { %v3248_v16 = vrot.slane %v3244_v60, 1  ;;  %v3274_v43 = vrot.slane %v3270_v4, 1  ;;  %v3239_v10 = vmul.f32 %v3192_v1, %v7243_v57  ;;  %v3245_v47 = vmul.f32 %v3192_v1, %v8010_v29  ;;  %v3195_v24 = vpop.f32.mrb[71].mxu0  ;;  %v3236_v9 = vpop.f32.mrb[71].mxu1 }
 0x715   :  { %v3242_v38 = vadd.f32 %v3240_v2, %v3238_v40  ;;  %v3258_v5 = vrot.slane %v3254_v52, 1  ;;  %v3268_v18 = vadd.f32 %v3266_v0, %v3264_v58  ;;  %v3284_v8 = vrot.slane %v3280_v15, 1 }
 0x716   :  { %v3249_v19 = vrot.slane %v3245_v47, 1  ;;  %v3265_v26 = vmul.f32 %v3192_v1, %v7247_v62  ;;  %v3271_v39 = vmul.f32 %v3192_v1, %v7249_v49  ;;  %v3241_v34 = vmul.f32 %v3233_v6, %v8011_v54 }
 0x717   :  { %v3252_v56 = vadd.f32 %v3248_v16, %v3242_v38  ;;  %v3278_v55 = vadd.f32 %v3274_v43, %v3268_v18  ;;  %v3255_v60 = vmul.f32 %v3233_v6, %v7253_v25  ;;  %v3267_v4 = vmul.f32 %v3233_v6, %v7255_v63 }
 0x718   :  { %v3275_v29 = vrot.slane %v3271_v39, 1  ;;  %v3243_v24 = vadd.f32 %v3241_v34, %v3239_v10  ;;  %v3281_v40 = vmul.f32 %v3233_v6, %v7257_v23 }
 0x719   :  { %v3262_v2 = vadd.f32 %v3258_v5, %v3252_v56  ;;  %v3288_v58 = vadd.f32 %v3284_v8, %v3278_v55  ;;  %v3269_v52 = vadd.f32 %v3267_v4, %v3265_v26  ;;  %v3259_v0 = vrot.slane %v3255_v60, 1 }
 0x71a   :  { %v3253_v47 = vadd.f32 %v3249_v19, %v3243_v24  ;;  %v3285_v1 = vrot.slane %v3281_v40, 1 }
 0x71b   :  { %v3292_v15 = vrot.slane %v3288_v58, 7  ;;  %v3279_v9 = vadd.f32 %v3275_v29, %v3269_v52 }
 0x71c   :  { %v3263_v49 = vadd.f32 %v3259_v0, %v3253_v47 }
 0x71d   :  { %v3296_v38 = vsel %vm3053_vm6, %v3262_v2, %v3292_v15  ;;  %v3289_v18 = vadd.f32 %v3285_v1, %v3279_v9 }
 0x71f   :  { %v3293_v43 = vrot.slane %v3289_v18, 7 }
 0x721   :  { %v3297_v16 = vsel %vm3053_vm6, %v3263_v49, %v3293_v43  ;;  %v8012_v43 = vld [vmem:[#allocation59_spill] sm:$0xff] }
 0x722   :  { %v3300_v63 = vcombine.low %v3296_v38, %v3297_v16  ;;  %v8013_v16 = vld [vmem:[#allocation16_spill] sm:$0xff] }
 0x724   :  { %v3307_v39 = vrot.slane %v3300_v63, %v6645_v21 }
 0x726   :  { %v3309_v10 = vsub.f32 %v7280_v22, %v3307_v39  ;;  %v8014_v39 = vld [vmem:[#allocation19_spill] sm:$0xff] }
 0x728   :  { %v4270_v5 = vrot.slane %v3309_v10, 9 }
 0x72a   :  { %v3314_v8 = vmax.f32 %v3309_v10, %v4270_v5  ;;  %v8016_v5 = vld [vmem:[#allocation25_spill] sm:$0xff] }
 0x72c   :  { %v3319_v26 = vrot.slane %v3314_v8, %v6637_v41  ;;  %v3323_v19 = vrot.slane %v3314_v8, %v6639_v33  ;;  %v8017_v8 = vld [vmem:[#allocation27_spill] sm:$0xff] }
 0x72e   :  { %v3329_v29 = vrot.slane %v3319_v26, %v6637_v41  ;;  %v3333_v6 = vrot.slane %v3323_v19, %v6637_v41  ;;  %v8018_v26 = vld [vmem:[#allocation24_spill] sm:$0xff]  ;;  %v8019_v19 = vld [vmem:[#allocation26_spill] sm:$0xff] }
 0x730   :  { %v3336_v34 = vcombine.low %v3329_v29, %v3333_v6  ;;  %v8020_v29 = vld [vmem:[#allocation32_spill] sm:$0xff]  ;;  %v8021_v6 = vld [vmem:[#allocation34_spill] sm:$0xff] }
 0x732   :  { %v3343_v56 = vrot.slane %v3336_v34, %v6645_v21  ;;  %v8022_v34 = vld [vmem:[#allocation33_spill] sm:$0xff] }
 0x734   :  { %v3345_v55 = vsub.f32 %v3309_v10, %v3343_v56  ;;  %v8015_v10 = vld [vmem:[#allocation18_spill] sm:$0xff]  ;;  %v8023_v56 = vld [vmem:[#allocation35_spill] sm:$0xff] }
 0x736   :  { %v3346_v49 = vmul.f32 1.442695, %v3345_v55  ;;  %v8024_v55 = vld [vmem:[#allocation40_spill] sm:$0xff] }
 0x738   :  { %4995 = vpow2.f32 %v3346_v49  ;;  %v8025_v49 = vld [vmem:[#allocation42_spill] sm:$0xff] }
 0x742   :  { %v4996_v60 = vpop.eup %4995 }
 0x743   :  { %v4271_v63 = vrot.slane %v4996_v60, 9 }
 0x745   :  { %v3352_v4 = vadd.f32 %v4996_v60, %v4271_v63  ;;  %v8027_v63 = vld [vmem:[#allocation43_spill] sm:$0xff] }
 0x747   :  { %4997 = vrcp.f32 %v3352_v4  ;;  %v8028_v4 = vld [vmem:[#allocation48_spill] sm:$0xff] }
 0x751   :  { %v4998_v24 = vpop.eup %4997 }
 0x752   :  { %v3358_v40 = vrot.slane %v4998_v24, %v6637_v41  ;;  %v3362_v2 = vrot.slane %v4998_v24, %v6639_v33  ;;  %v8029_v24 = vld [vmem:[#allocation50_spill] sm:$0xff] }
 0x754   :  { %v3368_v58 = vrot.slane %v3358_v40, %v6637_v41  ;;  %v3372_v52 = vrot.slane %v3362_v2, %v6637_v41  ;;  %v8030_v40 = vld [vmem:[#allocation49_spill] sm:$0xff]  ;;  %v8031_v2 = vld [vmem:[#allocation51_spill] sm:$0xff] }
 0x756   :  { %v3375_v47 = vcombine.low %v3368_v58, %v3372_v52  ;;  %v8032_v58 = vld [vmem:[#allocation13_spill] sm:$0xff]  ;;  %v8033_v52 = vld [vmem:[#allocation15_spill] sm:$0xff] }
 0x758   :  { %v3382_v0 = vrot.slane %v3375_v47, %v6645_v21  ;;  %v8034_v47 = vld [vmem:[#allocation12_spill] sm:$0xff] }
 0x75a   :  { %v3384_v15 = vmul.f32 %v4996_v60, %v3382_v0  ;;  %v8026_v60 = vld [vmem:[#allocation41_spill] sm:$0xff]  ;;  %v8035_v0 = vld [vmem:[#allocation14_spill] sm:$0xff] }
 0x75c   :  { %v3392_v9 = vrot.slane %v3384_v15, %v6645_v21  ;;  %v8036_v15 = vld [vmem:[#allocation21_spill] sm:$0xff] }
 0x75e   :  { %v3393_v1 = vcombine.high %v3392_v9, %v3392_v9  ;;  %v3396_v18 = vpack.c.bf16 %v3392_v9, %v3392_v9  ;;  %v8037_v9 = vld [vmem:[#allocation23_spill] sm:$0xff] }
 0x760   :  { %v3397_v38 = vpack.c.bf16 %v3393_v1, %v3393_v1  ;;  %v8038_v1 = vld [vmem:[#allocation20_spill] sm:$0xff] }
 0x762   :  { %3430 = vmatprep.mubr.bf16.mxu0 %v3397_v38  ;;  %3471 = vmatprep.mubr.bf16.mxu1 %v3397_v38  ;;  %v8039_v38 = vld [vmem:[#allocation22_spill] sm:$0xff] }
 0x763   :  { %3431 = vmatmul.mubr.bf16.vlgmr.msra.gmra.mrb[72].mxu0 %v3396_v18  ;;  %3472 = vmatmul.mubr.bf16.vlgmr.msra.gmra.mrb[72].mxu1 %v3396_v18  ;;  %v8040_v18 = vld [vmem:[#allocation29_spill] sm:$0xff] }
 0x764   :  { %3641 = vmatpush1.bf16.msra.mxu0 %v6662_v31  ;;  %3682 = vmatpush1.bf16.msra.mxu1 %v6673_v44 }
 0x765   :  { %3642 = vmatprep.subr.bf16.mxu0 %v6680_v30  ;;  %3683 = vmatprep.subr.bf16.mxu1 %v6695_v35 }
 0x768   :  { %3643 = vmatpush1.bf16.msra.mxu0 %v6685_v17  ;;  %3684 = vmatpush1.bf16.msra.mxu1 %v6698_v48 }
 0x769   :  { %3644 = vmatprep.subr.bf16.mxu0 %v6705_v7  ;;  %3685 = vmatprep.subr.bf16.mxu1 %v6720_v32 }
 0x76c   :  { %3645 = vmatpush1.bf16.msra.mxu0 %v6711_v59  ;;  %3686 = vmatpush1.bf16.msra.mxu1 %v6723_v14 }
 0x76d   :  { %3646 = vmatprep.subr.bf16.mxu0 %v6732_v20  ;;  %3687 = vmatprep.subr.bf16.mxu1 %v6746_v11 }
 0x770   :  { %3647 = vmatpush1.bf16.msra.mxu0 %v6737_v45  ;;  %3688 = vmatpush1.bf16.msra.mxu1 %v6749_v28 }
 0x771   :  { %3648 = vmatprep.subr.bf16.mxu0 %v6756_v61  ;;  %3689 = vmatprep.subr.bf16.mxu1 %v6771_v3 }
 0x774   :  { %3649 = vmatpush1.bf16.msra.mxu0 %v6762_v27  ;;  %3690 = vmatpush1.bf16.msra.mxu1 %v6776_v51 }
 0x775   :  { %3650 = vmatprep.subr.bf16.mxu0 %v7944_v12  ;;  %3691 = vmatprep.subr.bf16.mxu1 %v7945_v42 }
 0x778   :  { %3651 = vmatpush1.bf16.msra.mxu0 %v7946_v53  ;;  %3692 = vmatpush1.bf16.msra.mxu1 %v7947_v37 }
 0x779   :  { %3652 = vmatprep.subr.bf16.mxu0 %v7948_v36  ;;  %3693 = vmatprep.subr.bf16.mxu1 %v7949_v50 }
 0x77c   :  { %3653 = vmatpush1.bf16.msra.mxu0 %v7950_v13  ;;  %3694 = vmatpush1.bf16.msra.mxu1 %v7951_v46 }
 0x77d   :  { %3654 = vmatprep.subr.bf16.mxu0 %v8012_v43  ;;  %3695 = vmatprep.subr.bf16.mxu1 %v8013_v16 }
 0x780   :  { %3655 = vmatpush1.bf16.msra.mxu0 %v8014_v39  ;;  %3696 = vmatpush1.bf16.msra.mxu1 %v8015_v10 }
 0x781   :  { %3656 = vmatprep.subr.bf16.mxu0 %v8016_v5  ;;  %3697 = vmatprep.subr.bf16.mxu1 %v8017_v8 }
 0x784   :  { %3657 = vmatpush1.bf16.msra.mxu0 %v8018_v26  ;;  %3698 = vmatpush1.bf16.msra.mxu1 %v8019_v19 }
 0x785   :  { %3658 = vmatprep.subr.bf16.mxu0 %v8020_v29  ;;  %3699 = vmatprep.subr.bf16.mxu1 %v8021_v6 }
 0x788   :  { %3659 = vmatpush1.bf16.msra.mxu0 %v8022_v34  ;;  %3700 = vmatpush1.bf16.msra.mxu1 %v8023_v56 }
 0x789   :  { %3660 = vmatprep.subr.bf16.mxu0 %v8024_v55  ;;  %3701 = vmatprep.subr.bf16.mxu1 %v8025_v49 }
 0x78c   :  { %3661 = vmatpush1.bf16.msra.mxu0 %v8026_v60  ;;  %3702 = vmatpush1.bf16.msra.mxu1 %v8027_v63  ;;  %v8052_v60 = vld [vmem:[#allocation47_spill] sm:$0xff] }
 0x78d   :  { %3662 = vmatprep.subr.bf16.mxu0 %v8028_v4  ;;  %3703 = vmatprep.subr.bf16.mxu1 %v8029_v24  ;;  %v8050_v24 = vld [vmem:[#allocation44_spill] sm:$0xff]  ;;  %v8051_v4 = vld [vmem:[#allocation45_spill] sm:$0xff] }
 0x790   :  { %3663 = vmatpush1.bf16.msra.mxu0 %v8030_v40  ;;  %3704 = vmatpush1.bf16.msra.mxu1 %v8031_v2  ;;  %v8041_v40 = vld [vmem:[#allocation31_spill] sm:$0xff]  ;;  %v8042_v2 = vld [vmem:[#allocation28_spill] sm:$0xff] }
 0x791   :  { %3664 = vmatprep.subr.bf16.mxu0 %v8032_v58  ;;  %3705 = vmatprep.subr.bf16.mxu1 %v8033_v52  ;;  %v8043_v58 = vld [vmem:[#allocation30_spill] sm:$0xff]  ;;  %v8044_v52 = vld [vmem:[#allocation37_spill] sm:$0xff] }
 0x794   :  { %3665 = vmatpush1.bf16.msra.mxu0 %v8034_v47  ;;  %3706 = vmatpush1.bf16.msra.mxu1 %v8035_v0  ;;  %v8045_v47 = vld [vmem:[#allocation39_spill] sm:$0xff]  ;;  %v8046_v0 = vld [vmem:[#allocation36_spill] sm:$0xff] }
 0x795   :  { %3666 = vmatprep.subr.bf16.mxu0 %v8036_v15  ;;  %3707 = vmatprep.subr.bf16.mxu1 %v8037_v9  ;;  %v8047_v15 = vld [vmem:[#allocation38_spill] sm:$0xff]  ;;  %v8048_v9 = vld [vmem:[#allocation60_spill] sm:$0xff] }
 0x798   :  { %3667 = vmatpush1.bf16.msra.mxu0 %v8038_v1  ;;  %3708 = vmatpush1.bf16.msra.mxu1 %v8039_v38  ;;  %v8049_v1 = vld [vmem:[#allocation56_spill] sm:$0xff] }
 0x799   :  { %3668 = vmatprep.subr.bf16.mxu0 %v8040_v18  ;;  %3709 = vmatprep.subr.bf16.mxu1 %v8041_v40 }
 0x79c   :  { %3669 = vmatpush1.bf16.msra.mxu0 %v8042_v2  ;;  %3710 = vmatpush1.bf16.msra.mxu1 %v8043_v58 }
 0x79d   :  { %3670 = vmatprep.subr.bf16.mxu0 %v8044_v52  ;;  %3711 = vmatprep.subr.bf16.mxu1 %v8045_v47 }
 0x7a0   :  { %3671 = vmatpush1.bf16.msra.mxu0 %v8046_v0  ;;  %3712 = vmatpush1.bf16.msra.mxu1 %v8047_v15 }
 0x7a1   :  { %3882 = vmatprep.subr.bf16.mxu0 %v8048_v9  ;;  %3923 = vmatprep.subr.bf16.mxu1 %v8049_v1 }
 0x836   :  { %v3432_v38 = vpop.f32.mrb[72].mxu0  ;;  %v3473_v18 = vpop.f32.mrb[72].mxu1 }
 0x837   :  { %v3480_v40 = vmul.f32 %v3432_v38, %v7243_v57  ;;  %v3486_v2 = vmul.f32 %v3432_v38, %v8050_v24  ;;  %v3506_v58 = vmul.f32 %v3432_v38, %v7247_v62  ;;  %v3512_v52 = vmul.f32 %v3432_v38, %v8051_v4  ;;  %v3434_v63 = vpop.f32.mrb[73].mxu0  ;;  %v3475_v47 = vpop.f32.mrb[73].mxu1 }
 0x838   :  { %v3482_v0 = vmul.f32 %v3473_v18, %v8011_v54  ;;  %v3496_v15 = vmul.f32 %v3473_v18, %v7253_v25  ;;  %v3508_v9 = vmul.f32 %v3473_v18, %v8052_v60  ;;  %v3522_v1 = vmul.f32 %v3473_v18, %v7257_v23  ;;  %v3436_v49 = vpop.f32.mrb[74].mxu0  ;;  %v3477_v55 = vpop.f32.mrb[74].mxu1 }
 0x839   :  { %v3490_v56 = vrot.slane %v3486_v2, 1  ;;  %v3516_v34 = vrot.slane %v3512_v52, 1  ;;  %v3481_v6 = vmul.f32 %v3434_v63, %v7243_v57  ;;  %v3487_v29 = vmul.f32 %v3434_v63, %v8050_v24  ;;  %v3437_v19 = vpop.f32.mrb[75].mxu0  ;;  %v3478_v38 = vpop.f32.mrb[75].mxu1 }
 0x83a   :  { %v3484_v26 = vadd.f32 %v3482_v0, %v3480_v40  ;;  %v3500_v8 = vrot.slane %v3496_v15, 1  ;;  %v3510_v5 = vadd.f32 %v3508_v9, %v3506_v58  ;;  %v3526_v10 = vrot.slane %v3522_v1, 1 }
 0x83b   :  { %v3491_v39 = vrot.slane %v3487_v29, 1  ;;  %v3507_v16 = vmul.f32 %v3434_v63, %v7247_v62  ;;  %v3513_v43 = vmul.f32 %v3434_v63, %v8051_v4  ;;  %v3483_v49 = vmul.f32 %v3475_v47, %v8011_v54 }
 0x83c   :  { %v3494_v55 = vadd.f32 %v3490_v56, %v3484_v26  ;;  %v3520_v2 = vadd.f32 %v3516_v34, %v3510_v5  ;;  %v3497_v52 = vmul.f32 %v3475_v47, %v7253_v25  ;;  %v3509_v18 = vmul.f32 %v3475_v47, %v8052_v60 }
 0x83d   :  { %v3517_v24 = vrot.slane %v3513_v43, 1  ;;  %v3485_v19 = vadd.f32 %v3483_v49, %v3481_v6  ;;  %v3523_v40 = vmul.f32 %v3475_v47, %v7257_v23 }
 0x83e   :  { %v3504_v0 = vadd.f32 %v3500_v8, %v3494_v55  ;;  %v3530_v58 = vadd.f32 %v3526_v10, %v3520_v2  ;;  %v3511_v15 = vadd.f32 %v3509_v18, %v3507_v16  ;;  %v3501_v9 = vrot.slane %v3497_v52, 1 }
 0x83f   :  { %v3495_v29 = vadd.f32 %v3491_v39, %v3485_v19  ;;  %v3527_v63 = vrot.slane %v3523_v40, 1 }
 0x840   :  { %v3534_v1 = vrot.slane %v3530_v58, 7  ;;  %v3521_v38 = vadd.f32 %v3517_v24, %v3511_v15 }
 0x841   :  { %v3505_v4 = vadd.f32 %v3501_v9, %v3495_v29 }
 0x842   :  { %v3538_v26 = vsel %vm3053_vm6, %v3504_v0, %v3534_v1  ;;  %v3531_v5 = vadd.f32 %v3527_v63, %v3521_v38 }
 0x844   :  { %v3535_v34 = vrot.slane %v3531_v5, 7 }
 0x846   :  { %v3539_v56 = vsel %vm3053_vm6, %v3505_v4, %v3535_v34  ;;  %v8079_v34 = vld [vmem:[#allocation20_spill] sm:$0xff] }
 0x847   :  { %v3542_v60 = vcombine.low %v3538_v26, %v3539_v56  ;;  %v8080_v56 = vld [vmem:[#allocation22_spill] sm:$0xff] }
 0x849   :  { %v3549_v43 = vrot.slane %v3542_v60, %v6645_v21 }
 0x84b   :  { %v3551_v6 = vsub.f32 %v7280_v22, %v3549_v43  ;;  %v8081_v43 = vld [vmem:[#allocation29_spill] sm:$0xff] }
 0x84d   :  { %v4272_v8 = vrot.slane %v3551_v6, 9 }
 0x84f   :  { %v3556_v10 = vmax.f32 %v3551_v6, %v4272_v8  ;;  %v8083_v8 = vld [vmem:[#allocation28_spill] sm:$0xff] }
 0x851   :  { %v3561_v16 = vrot.slane %v3556_v10, %v6637_v41  ;;  %v3565_v39 = vrot.slane %v3556_v10, %v6639_v33  ;;  %v8084_v10 = vld [vmem:[#allocation30_spill] sm:$0xff] }
 0x853   :  { %v3571_v24 = vrot.slane %v3561_v16, %v6637_v41  ;;  %v3575_v47 = vrot.slane %v3565_v39, %v6637_v41  ;;  %v8085_v16 = vld [vmem:[#allocation37_spill] sm:$0xff]  ;;  %v8086_v39 = vld [vmem:[#allocation39_spill] sm:$0xff] }
 0x855   :  { %v3578_v49 = vcombine.low %v3571_v24, %v3575_v47  ;;  %v8087_v24 = vld [vmem:[#allocation36_spill] sm:$0xff]  ;;  %v8088_v47 = vld [vmem:[#allocation38_spill] sm:$0xff] }
 0x857   :  { %v3585_v55 = vrot.slane %v3578_v49, %v6645_v21 }
 0x859   :  { %v3587_v2 = vsub.f32 %v3551_v6, %v3585_v55  ;;  %v8082_v6 = vld [vmem:[#allocation31_spill] sm:$0xff] }
 0x85b   :  { %v3588_v4 = vmul.f32 1.442695, %v3587_v2 }
 0x85d   :  { %4999 = vpow2.f32 %v3588_v4  ;;  %v8089_v4 = vld [vmem:[#allocation44_spill] sm:$0xff] }
 0x867   :  { %v5000_v52 = vpop.eup %4999 }
 0x868   :  { %v4273_v60 = vrot.slane %v5000_v52, 9 }
 0x86a   :  { %v3594_v18 = vadd.f32 %v5000_v52, %v4273_v60 }
 0x86c   :  { %5001 = vrcp.f32 %v3594_v18  ;;  %v8090_v18 = vld [vmem:[#allocation45_spill] sm:$0xff] }
 0x876   :  { %v5002_v19 = vpop.eup %5001 }
 0x877   :  { %v3600_v40 = vrot.slane %v5002_v19, %v6637_v41  ;;  %v3604_v0 = vrot.slane %v5002_v19, %v6639_v33 }
 0x879   :  { %v3610_v58 = vrot.slane %v3600_v40, %v6637_v41  ;;  %v3614_v15 = vrot.slane %v3604_v0, %v6637_v41 }
 0x87b   :  { %v3617_v29 = vcombine.low %v3610_v58, %v3614_v15 }
 0x87d   :  { %v3624_v9 = vrot.slane %v3617_v29, %v6645_v21  ;;  %v8091_v29 = vld [vmem:[#allocation47_spill] sm:$0xff] }
 0x87f   :  { %v3626_v1 = vmul.f32 %v5000_v52, %v3624_v9 }
 0x881   :  { %v3634_v38 = vrot.slane %v3626_v1, %v6645_v21 }
 0x883   :  { %v3635_v63 = vcombine.high %v3634_v38, %v3634_v38  ;;  %v3638_v5 = vpack.c.bf16 %v3634_v38, %v3634_v38 }
 0x885   :  { %v3639_v26 = vpack.c.bf16 %v3635_v63, %v3635_v63 }
 0x887   :  { %3672 = vmatprep.mubr.bf16.mxu0 %v3639_v26  ;;  %3713 = vmatprep.mubr.bf16.mxu1 %v3639_v26 }
 0x888   :  { %3673 = vmatmul.mubr.bf16.vlgmr.msra.gmra.mrb[76].mxu0 %v3638_v5  ;;  %3714 = vmatmul.mubr.bf16.vlgmr.msra.gmra.mrb[76].mxu1 %v3638_v5 }
 0x889   :  { %3883 = vmatpush1.bf16.msra.mxu0 %v6662_v31  ;;  %3924 = vmatpush1.bf16.msra.mxu1 %v6673_v44  ;;  %v8053_v31 = vld [vmem:[#allocation59_spill] sm:$0xff]  ;;  %v8054_v44 = vld [vmem:[#allocation16_spill] sm:$0xff] }
 0x88a   :  { %3884 = vmatprep.subr.bf16.mxu0 %v6680_v30  ;;  %3925 = vmatprep.subr.bf16.mxu1 %v6695_v35  ;;  %v8055_v30 = vld [vmem:[#allocation19_spill] sm:$0xff]  ;;  %v8057_v35 = vld [vmem:[#allocation25_spill] sm:$0xff] }
 0x88d   :  { %3885 = vmatpush1.bf16.msra.mxu0 %v6685_v17  ;;  %3926 = vmatpush1.bf16.msra.mxu1 %v6698_v48  ;;  %v8056_v17 = vld [vmem:[#allocation18_spill] sm:$0xff]  ;;  %v8058_v48 = vld [vmem:[#allocation27_spill] sm:$0xff] }
 0x88e   :  { %3886 = vmatprep.subr.bf16.mxu0 %v6705_v7  ;;  %3927 = vmatprep.subr.bf16.mxu1 %v6720_v32  ;;  %v8059_v7 = vld [vmem:[#allocation24_spill] sm:$0xff] }
 0x88f   :  { %v8061_v32 = vld [vmem:[#allocation32_spill] sm:$0xff] }
 0x891   :  { %3887 = vmatpush1.bf16.msra.mxu0 %v6711_v59  ;;  %3928 = vmatpush1.bf16.msra.mxu1 %v6723_v14  ;;  %v8060_v59 = vld [vmem:[#allocation26_spill] sm:$0xff] }
 0x892   :  { %3888 = vmatprep.subr.bf16.mxu0 %v6732_v20  ;;  %3929 = vmatprep.subr.bf16.mxu1 %v6746_v11  ;;  %v8062_v14 = vld [vmem:[#allocation34_spill] sm:$0xff]  ;;  %v8063_v20 = vld [vmem:[#allocation33_spill] sm:$0xff]  ;;  %v8065_v11 = vld [vmem:[#allocation40_spill] sm:$0xff] }
 0x895   :  { %3889 = vmatpush1.bf16.msra.mxu0 %v6737_v45  ;;  %3930 = vmatpush1.bf16.msra.mxu1 %v6749_v28  ;;  %v8064_v45 = vld [vmem:[#allocation35_spill] sm:$0xff]  ;;  %v8066_v28 = vld [vmem:[#allocation42_spill] sm:$0xff] }
 0x896   :  { %3890 = vmatprep.subr.bf16.mxu0 %v6756_v61  ;;  %3931 = vmatprep.subr.bf16.mxu1 %v6771_v3  ;;  %v8067_v61 = vld [vmem:[#allocation41_spill] sm:$0xff]  ;;  %v8069_v3 = vld [vmem:[#allocation48_spill] sm:$0xff] }
 0x899   :  { %3891 = vmatpush1.bf16.msra.mxu0 %v6762_v27  ;;  %3932 = vmatpush1.bf16.msra.mxu1 %v6776_v51  ;;  %v8068_v27 = vld [vmem:[#allocation43_spill] sm:$0xff]  ;;  %v8070_v51 = vld [vmem:[#allocation50_spill] sm:$0xff] }
 0x89a   :  { %3892 = vmatprep.subr.bf16.mxu0 %v7944_v12  ;;  %3933 = vmatprep.subr.bf16.mxu1 %v7945_v42  ;;  %v8071_v12 = vld [vmem:[#allocation49_spill] sm:$0xff]  ;;  %v8072_v42 = vld [vmem:[#allocation51_spill] sm:$0xff] }
 0x89d   :  { %3893 = vmatpush1.bf16.msra.mxu0 %v7946_v53  ;;  %3934 = vmatpush1.bf16.msra.mxu1 %v7947_v37  ;;  %v8073_v53 = vld [vmem:[#allocation13_spill] sm:$0xff]  ;;  %v8074_v37 = vld [vmem:[#allocation15_spill] sm:$0xff] }
 0x89e   :  { %3894 = vmatprep.subr.bf16.mxu0 %v7948_v36  ;;  %3935 = vmatprep.subr.bf16.mxu1 %v7949_v50  ;;  %v8075_v36 = vld [vmem:[#allocation12_spill] sm:$0xff]  ;;  %v8076_v50 = vld [vmem:[#allocation14_spill] sm:$0xff] }
 0x8a1   :  { %3895 = vmatpush1.bf16.msra.mxu0 %v7950_v13  ;;  %3936 = vmatpush1.bf16.msra.mxu1 %v7951_v46  ;;  %v8077_v13 = vld [vmem:[#allocation21_spill] sm:$0xff]  ;;  %v8078_v46 = vld [vmem:[#allocation23_spill] sm:$0xff] }
 0x8a2   :  { %3896 = vmatprep.subr.bf16.mxu0 %v8053_v31  ;;  %3937 = vmatprep.subr.bf16.mxu1 %v8054_v44 }
 0x8a5   :  { %3897 = vmatpush1.bf16.msra.mxu0 %v8055_v30  ;;  %3938 = vmatpush1.bf16.msra.mxu1 %v8056_v17 }
 0x8a6   :  { %3898 = vmatprep.subr.bf16.mxu0 %v8057_v35  ;;  %3939 = vmatprep.subr.bf16.mxu1 %v8058_v48 }
 0x8a9   :  { %3899 = vmatpush1.bf16.msra.mxu0 %v8059_v7  ;;  %3940 = vmatpush1.bf16.msra.mxu1 %v8060_v59 }
 0x8aa   :  { %3900 = vmatprep.subr.bf16.mxu0 %v8061_v32  ;;  %3941 = vmatprep.subr.bf16.mxu1 %v8062_v14 }
 0x8ad   :  { %3901 = vmatpush1.bf16.msra.mxu0 %v8063_v20  ;;  %3942 = vmatpush1.bf16.msra.mxu1 %v8064_v45 }
 0x8ae   :  { %3902 = vmatprep.subr.bf16.mxu0 %v8065_v11  ;;  %3943 = vmatprep.subr.bf16.mxu1 %v8066_v28 }
 0x8b1   :  { %3903 = vmatpush1.bf16.msra.mxu0 %v8067_v61  ;;  %3944 = vmatpush1.bf16.msra.mxu1 %v8068_v27 }
 0x8b2   :  { %3904 = vmatprep.subr.bf16.mxu0 %v8069_v3  ;;  %3945 = vmatprep.subr.bf16.mxu1 %v8070_v51 }
 0x8b5   :  { %3905 = vmatpush1.bf16.msra.mxu0 %v8071_v12  ;;  %3946 = vmatpush1.bf16.msra.mxu1 %v8072_v42 }
 0x8b6   :  { %3906 = vmatprep.subr.bf16.mxu0 %v8073_v53  ;;  %3947 = vmatprep.subr.bf16.mxu1 %v8074_v37 }
 0x8b9   :  { %3907 = vmatpush1.bf16.msra.mxu0 %v8075_v36  ;;  %3948 = vmatpush1.bf16.msra.mxu1 %v8076_v50 }
 0x8ba   :  { %3908 = vmatprep.subr.bf16.mxu0 %v8077_v13  ;;  %3949 = vmatprep.subr.bf16.mxu1 %v8078_v46 }
 0x8bd   :  { %3909 = vmatpush1.bf16.msra.mxu0 %v8079_v34  ;;  %3950 = vmatpush1.bf16.msra.mxu1 %v8080_v56 }
 0x8be   :  { %3910 = vmatprep.subr.bf16.mxu0 %v8081_v43  ;;  %3951 = vmatprep.subr.bf16.mxu1 %v8082_v6 }
 0x8c1   :  { %3911 = vmatpush1.bf16.msra.mxu0 %v8083_v8  ;;  %3952 = vmatpush1.bf16.msra.mxu1 %v8084_v10 }
 0x8c2   :  { %3912 = vmatprep.subr.bf16.mxu0 %v8085_v16  ;;  %3953 = vmatprep.subr.bf16.mxu1 %v8086_v39 }
 0x8c5   :  { %3913 = vmatpush1.bf16.msra.mxu0 %v8087_v24  ;;  %3954 = vmatpush1.bf16.msra.mxu1 %v8088_v47 }
 0x95b   :  { %v3674_v49 = vpop.f32.mrb[76].mxu0  ;;  %v3715_v55 = vpop.f32.mrb[76].mxu1 }
 0x95c   :  { %v3722_v2 = vmul.f32 %v3674_v49, %v7243_v57  ;;  %v3728_v52 = vmul.f32 %v3674_v49, %v8089_v4  ;;  %v3748_v60 = vmul.f32 %v3674_v49, %v7247_v62  ;;  %v3754_v19 = vmul.f32 %v3674_v49, %v8090_v18  ;;  %v3676_v40 = vpop.f32.mrb[77].mxu0  ;;  %v3717_v0 = vpop.f32.mrb[77].mxu1 }
 0x95d   :  { %v3724_v58 = vmul.f32 %v3715_v55, %v8011_v54  ;;  %v3738_v15 = vmul.f32 %v3715_v55, %v7253_v25  ;;  %v3750_v9 = vmul.f32 %v3715_v55, %v8091_v29  ;;  %v3764_v1 = vmul.f32 %v3715_v55, %v7257_v23  ;;  %v3678_v38 = vpop.f32.mrb[78].mxu0  ;;  %v3719_v63 = vpop.f32.mrb[78].mxu1 }
 0x95e   :  { %v3732_v26 = vrot.slane %v3728_v52, 1  ;;  %v3758_v5 = vrot.slane %v3754_v19, 1  ;;  %v3723_v31 = vmul.f32 %v3676_v40, %v7243_v57  ;;  %v3729_v44 = vmul.f32 %v3676_v40, %v8089_v4  ;;  %v3679_v30 = vpop.f32.mrb[79].mxu0  ;;  %v3720_v17 = vpop.f32.mrb[79].mxu1 }
 0x95f   :  { %v3726_v35 = vadd.f32 %v3724_v58, %v3722_v2  ;;  %v3742_v48 = vrot.slane %v3738_v15, 1  ;;  %v3752_v7 = vadd.f32 %v3750_v9, %v3748_v60  ;;  %v3768_v59 = vrot.slane %v3764_v1, 1 }
 0x960   :  { %v3733_v32 = vrot.slane %v3729_v44, 1  ;;  %v3749_v14 = vmul.f32 %v3676_v40, %v7247_v62  ;;  %v3755_v20 = vmul.f32 %v3676_v40, %v8090_v18  ;;  %v3725_v45 = vmul.f32 %v3717_v0, %v8011_v54 }
 0x961   :  { %v3736_v11 = vadd.f32 %v3732_v26, %v3726_v35  ;;  %v3762_v28 = vadd.f32 %v3758_v5, %v3752_v7  ;;  %v3739_v61 = vmul.f32 %v3717_v0, %v7253_v25  ;;  %v3751_v27 = vmul.f32 %v3717_v0, %v8091_v29 }
 0x962   :  { %v3759_v3 = vrot.slane %v3755_v20, 1  ;;  %v3727_v51 = vadd.f32 %v3725_v45, %v3723_v31  ;;  %v3765_v12 = vmul.f32 %v3717_v0, %v7257_v23 }
 0x963   :  { %v3746_v42 = vadd.f32 %v3742_v48, %v3736_v11  ;;  %v3772_v53 = vadd.f32 %v3768_v59, %v3762_v28  ;;  %v3753_v37 = vadd.f32 %v3751_v27, %v3749_v14  ;;  %v3743_v50 = vrot.slane %v3739_v61, 1 }
 0x964   :  { %v3737_v36 = vadd.f32 %v3733_v32, %v3727_v51  ;;  %v3769_v34 = vrot.slane %v3765_v12, 1 }
 0x965   :  { %v3776_v13 = vrot.slane %v3772_v53, 7  ;;  %v3763_v46 = vadd.f32 %v3759_v3, %v3753_v37 }
 0x966   :  { %v3747_v56 = vadd.f32 %v3743_v50, %v3737_v36 }
 0x967   :  { %v3780_v43 = vsel %vm3053_vm6, %v3746_v42, %v3776_v13  ;;  %v3773_v6 = vadd.f32 %v3769_v34, %v3763_v46 }
 0x969   :  { %v3777_v8 = vrot.slane %v3773_v6, 7 }
 0x96b   :  { %v3781_v10 = vsel %vm3053_vm6, %v3747_v56, %v3777_v8 }
 0x96c   :  { %v3784_v16 = vcombine.low %v3780_v43, %v3781_v10 }
 0x96e   :  { %v3791_v39 = vrot.slane %v3784_v16, %v6645_v21 }
 0x970   :  { %v3793_v24 = vsub.f32 %v7280_v22, %v3791_v39 }
 0x972   :  { %v4274_v47 = vrot.slane %v3793_v24, 9 }
 0x974   :  { %v3798_v49 = vmax.f32 %v3793_v24, %v4274_v47 }
 0x976   :  { %v3803_v55 = vrot.slane %v3798_v49, %v6637_v41  ;;  %v3807_v2 = vrot.slane %v3798_v49, %v6639_v33 }
 0x978   :  { %v3813_v52 = vrot.slane %v3803_v55, %v6637_v41  ;;  %v3817_v60 = vrot.slane %v3807_v2, %v6637_v41 }
 0x97a   :  { %v3820_v19 = vcombine.low %v3813_v52, %v3817_v60 }
 0x97c   :  { %v3827_v40 = vrot.slane %v3820_v19, %v6645_v21 }
 0x97e   :  { %v3829_v0 = vsub.f32 %v3793_v24, %v3827_v40 }
 0x980   :  { %v3830_v58 = vmul.f32 1.442695, %v3829_v0 }
 0x982   :  { %5003 = vpow2.f32 %v3830_v58 }
 0x98c   :  { %v5004_v15 = vpop.eup %5003 }
 0x98d   :  { %v4275_v9 = vrot.slane %v5004_v15, 9 }
 0x98f   :  { %v3836_v1 = vadd.f32 %v5004_v15, %v4275_v9 }
 0x991   :  { %5005 = vrcp.f32 %v3836_v1 }
 0x99b   :  { %v5006_v22 = vpop.eup %5005 }
 0x99c   :  { %v3842_v38 = vrot.slane %v5006_v22, %v6637_v41  ;;  %v3846_v63 = vrot.slane %v5006_v22, %v6639_v33 }
 0x99e   :  { %v3852_v26 = vrot.slane %v3842_v38, %v6637_v41  ;;  %v3856_v5 = vrot.slane %v3846_v63, %v6637_v41 }
 0x9a0   :  { %v3859_v31 = vcombine.low %v3852_v26, %v3856_v5 }
 0x9a2   :  { %v3866_v44 = vrot.slane %v3859_v31, %v6645_v21 }
 0x9a4   :  { %v3868_v30 = vmul.f32 %v5004_v15, %v3866_v44 }
 0x9a6   :  { %v3876_v17 = vrot.slane %v3868_v30, %v6645_v21 }
 0x9a8   :  { %v3877_v35 = vcombine.high %v3876_v17, %v3876_v17  ;;  %v3880_v7 = vpack.c.bf16 %v3876_v17, %v3876_v17 }
 0x9aa   :  { %v3881_v48 = vpack.c.bf16 %v3877_v35, %v3877_v35 }
 0x9ac   :  { %3914 = vmatprep.mubr.bf16.mxu0 %v3881_v48  ;;  %3955 = vmatprep.mubr.bf16.mxu1 %v3881_v48 }
 0x9ad   :  { %3915 = vmatmul.mubr.bf16.vlgmr.msra.gmra.mrb[80].mxu0 %v3880_v7  ;;  %3956 = vmatmul.mubr.bf16.vlgmr.msra.gmra.mrb[80].mxu1 %v3880_v7 }
 0xa80   :  { %v3916_v59 = vpop.f32.mrb[80].mxu0  ;;  %v3957_v32 = vpop.f32.mrb[80].mxu1 }
 0xa81   :  { %v3964_v14 = vmul.f32 %v3916_v59, %v7243_v57  ;;  %v3970_v20 = vmul.f32 %v3916_v59, %v8089_v4  ;;  %v3990_v45 = vmul.f32 %v3916_v59, %v7247_v62  ;;  %v3996_v11 = vmul.f32 %v3916_v59, %v8090_v18  ;;  %v3918_v28 = vpop.f32.mrb[81].mxu0  ;;  %v3959_v61 = vpop.f32.mrb[81].mxu1 }
 0xa82   :  { %v3966_v27 = vmul.f32 %v3957_v32, %v8011_v54  ;;  %v3980_v3 = vmul.f32 %v3957_v32, %v7253_v25  ;;  %v3992_v51 = vmul.f32 %v3957_v32, %v8091_v29  ;;  %v4006_v12 = vmul.f32 %v3957_v32, %v7257_v23  ;;  %v3920_v42 = vpop.f32.mrb[82].mxu0  ;;  %v3961_v53 = vpop.f32.mrb[82].mxu1 }
 0xa83   :  { %v3974_v37 = vrot.slane %v3970_v20, 1  ;;  %v4000_v36 = vrot.slane %v3996_v11, 1  ;;  %v3965_v50 = vmul.f32 %v3918_v28, %v7243_v57  ;;  %v3971_v13 = vmul.f32 %v3918_v28, %v8089_v4  ;;  %v3921_v46 = vpop.f32.mrb[83].mxu0  ;;  %v3962_v34 = vpop.f32.mrb[83].mxu1 }
 0xa84   :  { %v3968_v56 = vadd.f32 %v3966_v27, %v3964_v14  ;;  %v3984_v43 = vrot.slane %v3980_v3, 1  ;;  %v3994_v6 = vadd.f32 %v3992_v51, %v3990_v45  ;;  %v4010_v8 = vrot.slane %v4006_v12, 1 }
 0xa85   :  { %v3975_v10 = vrot.slane %v3971_v13, 1  ;;  %v3991_v16 = vmul.f32 %v3918_v28, %v7247_v62  ;;  %v3997_v39 = vmul.f32 %v3918_v28, %v8090_v18  ;;  %v3967_v24 = vmul.f32 %v3959_v61, %v8011_v54 }
 0xa86   :  { %v3978_v47 = vadd.f32 %v3974_v37, %v3968_v56  ;;  %v4004_v49 = vadd.f32 %v4000_v36, %v3994_v6  ;;  %v3981_v55 = vmul.f32 %v3959_v61, %v7253_v25  ;;  %v3993_v57 = vmul.f32 %v3959_v61, %v8091_v29 }
 0xa87   :  { %v4001_v4 = vrot.slane %v3997_v39, 1  ;;  %v3969_v2 = vadd.f32 %v3967_v24, %v3965_v50  ;;  %v4007_v52 = vmul.f32 %v3959_v61, %v7257_v23  ;;  %v5035_v23 = vld [vmem:[%s7623_s1] sm:$0xf]  ;;  %s5092_s1 = smov [#allocation8]  }
 0xa88   :  { %v3988_v60 = vadd.f32 %v3984_v43, %v3978_v47  ;;  %v4014_v19 = vadd.f32 %v4010_v8, %v4004_v49  ;;  %v3995_v40 = vadd.f32 %v3993_v57, %v3991_v16  ;;  %v3985_v58 = vrot.slane %v3981_v55, 1  ;;  %s4122_s16 = sshll.u32 %s5092_s1, 4  ;;  %s4123_s16 = int_to_ptr.vmem [resolvable:$true] %s4122_s16 }
 0xa89   :  { %v3979_v0 = vadd.f32 %v3975_v10, %v3969_v2  ;;  %v4011_v18 = vrot.slane %v4007_v52, 1  ;;  %s5060_s17 = scalar_lea.vmem %s4123_s16, 64  ;;  %p5065_p11 = scmp.lt.s32.totalorder %s4123_s16, %s4123_s16 }
 0xa8a   :  { %v4018_v62 = vrot.slane %v4014_v19, 7  ;;  %v4005_v15 = vadd.f32 %v4001_v4, %v3995_v40  ;;  %p5061_p10 = scmp.ne.s32.totalorder %s4123_s16, %s5060_s17  ;;  %p5066_p12 = scmp.lt.s32.totalorder %s5060_s17, %s5060_s17 }
 0xa8b   :  { %v3989_v9 = vadd.f32 %v3985_v58, %v3979_v0 }
 0xa8c   :  { %v4022_v54 = vsel %vm3053_vm6, %v3988_v60, %v4018_v62  ;;  %v4015_v1 = vadd.f32 %v4011_v18, %v4005_v15  ;;  %p5067_p13 = por %p5066_p12, %p5065_p11 }
 0xa8e   :  { %v4019_v22 = vrot.slane %v4015_v1, 7  ;;  %p5068_p0 = pnand %p5067_p13, %p5061_p10 }
 0xa90   :  { %v4023_v25 = vsel %vm3053_vm6, %v3989_v9, %v4019_v22 }
 0xa91   :  { %v4026_v29 = vcombine.low %v4022_v54, %v4023_v25 }
 0xa93   :  { %v4033_v38 = vrot.slane %v4026_v29, %v6645_v21 }
 0xa95   :  { %v4035_v63 = vsub.f32 %v5035_v23, %v4033_v38 }
 0xa97   :  { %v4276_v26 = vrot.slane %v4035_v63, 9 }
 0xa99   :  { %v4040_v5 = vmax.f32 %v4035_v63, %v4276_v26 }
 0xa9b   :  { %v4045_v31 = vrot.slane %v4040_v5, %v6637_v41  ;;  %v4049_v44 = vrot.slane %v4040_v5, %v6639_v33 }
 0xa9d   :  { %v4055_v30 = vrot.slane %v4045_v31, %v6637_v41  ;;  %v4059_v17 = vrot.slane %v4049_v44, %v6637_v41 }
 0xa9f   :  { %v4062_v35 = vcombine.low %v4055_v30, %v4059_v17 }
 0xaa1   :  { %v4069_v48 = vrot.slane %v4062_v35, %v6645_v21 }
 0xaa3   :  { %v4071_v7 = vsub.f32 %v4035_v63, %v4069_v48 }
 0xaa5   :  { %v4072_v59 = vmul.f32 1.442695, %v4071_v7 }
 0xaa7   :  { %5007 = vpow2.f32 %v4072_v59 }
 0xab1   :  { %v5008_v32 = vpop.eup %5007 }
 0xab2   :  { %v4277_v14 = vrot.slane %v5008_v32, 9 }
 0xab4   :  { %v4078_v20 = vadd.f32 %v5008_v32, %v4277_v14 }
 0xab6   :  { %v4083_v45 = vrot.slane %v4078_v20, %v6637_v41  ;;  %v4087_v11 = vrot.slane %v4078_v20, %v6639_v33 }
 0xab8   :  { %v4093_v28 = vrot.slane %v4083_v45, %v6637_v41  ;;  %v4097_v61 = vrot.slane %v4087_v11, %v6637_v41 }
 0xaba   :  { %v4100_v27 = vcombine.low %v4093_v28, %v4097_v61 }
 0xabc   :  { %v4107_v3 = vrot.slane %v4100_v27, %v6645_v21 }
 0xabe   :  { %5009 = vrcp.f32 %v4107_v3 }
 0xac8   :  { %v5010_v51 = vpop.eup %5009 }
 0xac9   :  { %v4110_v12 = vmul.f32 %v5010_v51, %v5008_v32 }
 0xacb   :  { %vm4111_vm7 = vcmp.ne.f32.partialorder %v4110_v12, %v4110_v12 }
 0xacc   :  { %v4112_v42 = vsel %vm4111_vm7, 0.0, %v4110_v12 }
 0xacd   :  { %vm4113_vm8 = vcmp.gt.f32.partialorder %v4112_v42, 0.5 }
 0xace   :  { %v4114_v53 = vsel %vm4113_vm8, %v4112_v42, 0.0 }
 0xacf   :  { %4115 = vst [vmem:[#allocation8] sm:$0xf] %v4114_v53 }
 0xad0   :  { %5071 = shalt.err (!%p5068_p0)
}
 0xad1   :  { %s5072_s20 = scalar_lea.hbm %s7628_s6, 64 }
 0xad2   :  { %p5073_p1 = scmp.ne.s32.totalorder %s7628_s6, %s5072_s20  ;;  %p5076_p2 = scmp.lt.u32.totalorder %s5072_s20, %s7628_s6 }
 0xad4   :  { %p5078_p3 = pnand %p5076_p2, %p5073_p1 }
 0xad6   :  { %5081 = shalt.err (!%p5078_p3)
}
 0xad7   :  { %4125 = dma.vmem_to_hbm [thread:$0]  %s4123_s16, 64, %s7628_s6, [#allocation4]  }
 0xad8   :  { %5086 = dma.done.wait [#allocation4], 64  }
 0xad9   :  { %5087 = vsyncadd [#allocation4], 4294967232 }
 0xada   :  { %4129 = vsyncpa [#allocation4], 1 }
 0xadb   :  { %4130 = vsyncpa [#allocation5], 1 }
 0xadc   :  { %4131 = vsyncpa [#allocation7], 1 }

</bundles_post_ra>
